<compile_context>
chip_gen: v5e
topology: v5e:2x2
jax: 0.10.0
libtpu: 0.0.40
codegen_flags: <defaults>
</compile_context>

<pallas_src>
import math
from functools import partial

import jax
import jax.numpy as jnp
from jax.experimental import pallas as pl
from jax.experimental.pallas import tpu as pltpu

# ----------------------------- config ---------------------------------------
VOCAB = 16
PAD = 0
MAX_LEN = 32
HID = 32
N_HEADS = 4
HEAD_DIM = HID // N_HEADS
PF_DIM = 64
ENC_LAYERS = 2
DEC_LAYERS = 2

_ATTN_SCALE = 1.0 / math.sqrt(HEAD_DIM)


# --------------------------- in-kernel helpers -------------------------------
def _layer_norm(x, g, b):
    mu = jnp.mean(x, axis=-1, keepdims=True)
    var = jnp.mean(jnp.square(x - mu), axis=-1, keepdims=True)
    return (x - mu) * jax.lax.rsqrt(var + 1e-5) * g + b


def _attend(q, k, v, key_pad, *, causal, scale):
    """q:(Lq,HID)  k,v:(Lk,HID)  key_pad:(1,Lk) float. Heads unrolled (static)."""
    Lq, Lk = q.shape[0], k.shape[0]
    key_ok = key_pad > 0.5                                      # (1, Lk) bool
    if causal:
        row = jax.lax.broadcasted_iota(jnp.int32, (Lq, Lk), 0)
        col = jax.lax.broadcasted_iota(jnp.int32, (Lq, Lk), 1)
        mask = key_ok & (col <= row)                            # (Lq, Lk)
    else:
        mask = jnp.broadcast_to(key_ok, (Lq, Lk))
    ctxs, probs = [], []
    for h in range(N_HEADS):
        sl = slice(h * HEAD_DIM, (h + 1) * HEAD_DIM)
        # contract last dims directly (no explicit transpose of k)
        s = jax.lax.dot_general(q[:, sl], k[:, sl],
                                (((1,), (1,)), ((), ())),
                                preferred_element_type=jnp.float32) * scale
        s = jnp.where(mask, s, jnp.float32(-1e10))              # masked_fill
        s = s - jnp.max(s, axis=-1, keepdims=True)
        p = jnp.exp(s)
        p = p / jnp.sum(p, axis=-1, keepdims=True)              # softmax
        probs.append(p)
        ctxs.append(jnp.dot(p, v[:, sl], preferred_element_type=jnp.float32))
    return jnp.concatenate(ctxs, axis=-1), probs


# --------------------------- fused layer kernels -----------------------------
def _encoder_layer_kernel(x_ref, pad_ref,
                          wqkv_ref, bqkv_ref, wo_ref, bo_ref, ln_ref,
                          w1_ref, b1_ref, w2_ref, b2_ref, o_ref):
    x = x_ref[0]                                   # (S, HID)
    pad = pad_ref[0]                               # (1, S)
    ln = ln_ref[...]                               # (4, HID)

    # ---- self attention (fused QKV) ----
    qkv = jnp.dot(x, wqkv_ref[...], preferred_element_type=jnp.float32) + bqkv_ref[...]
    ctx, _ = _attend(qkv[:, :HID], qkv[:, HID:2 * HID], qkv[:, 2 * HID:],
                     pad, causal=False, scale=_ATTN_SCALE)
    a = jnp.dot(ctx, wo_ref[...], preferred_element_type=jnp.float32) + bo_ref[...]
    x = _layer_norm(x + a, ln[0:1], ln[1:2])

    # ---- position-wise FFN ----
    h = jnp.maximum(jnp.dot(x, w1_ref[...], preferred_element_type=jnp.float32)
                    + b1_ref[...], 0.0)
    f = jnp.dot(h, w2_ref[...], preferred_element_type=jnp.float32) + b2_ref[...]
    x = _layer_norm(x + f, ln[2:3], ln[3:4])

    o_ref[0] = x


def _decoder_layer_kernel(y_ref, enc_ref, trgpad_ref, srcpad_ref,
                          swqkv_ref, sbqkv_ref, swo_ref, sbo_ref,
                          cwq_ref, cbq_ref, cwkv_ref, cbkv_ref, cwo_ref, cbo_ref,
                          ln_ref, w1_ref, b1_ref, w2_ref, b2_ref,
                          *rest, is_last):
    if is_last:
        fcw_ref, fcb_ref, logits_ref, attn_ref = rest
    else:
        (y_out_ref,) = rest

    y = y_ref[0]                                   # (T, HID)
    enc = enc_ref[0]                               # (S, HID)
    trg_pad = trgpad_ref[0]                        # (1, T)
    src_pad = srcpad_ref[0]                        # (1, S)
    ln = ln_ref[...]                               # (6, HID)

    # ---- masked self attention (fused QKV, causal + trg pad mask in-kernel) ----
    qkv = jnp.dot(y, swqkv_ref[...], preferred_element_type=jnp.float32) + sbqkv_ref[...]
    ctx, _ = _attend(qkv[:, :HID], qkv[:, HID:2 * HID], qkv[:, 2 * HID:],
                     trg_pad, causal=True, scale=_ATTN_SCALE)
    a = jnp.dot(ctx, swo_ref[...], preferred_element_type=jnp.float32) + sbo_ref[...]
    y = _layer_norm(y + a, ln[0:1], ln[1:2])

    # ---- cross attention (fused KV projection) ----
    q = jnp.dot(y, cwq_ref[...], preferred_element_type=jnp.float32) + cbq_ref[...]
    kv = jnp.dot(enc, cwkv_ref[...], preferred_element_type=jnp.float32) + cbkv_ref[...]
    ctx, probs = _attend(q, kv[:, :HID], kv[:, HID:],
                         src_pad, causal=False, scale=_ATTN_SCALE)
    c = jnp.dot(ctx, cwo_ref[...], preferred_element_type=jnp.float32) + cbo_ref[...]
    y = _layer_norm(y + c, ln[2:3], ln[3:4])

    # ---- position-wise FFN ----
    h = jnp.maximum(jnp.dot(y, w1_ref[...], preferred_element_type=jnp.float32)
                    + b1_ref[...], 0.0)
    f = jnp.dot(h, w2_ref[...], preferred_element_type=jnp.float32) + b2_ref[...]
    y = _layer_norm(y + f, ln[4:5], ln[5:6])

    if is_last:
        # fused final vocabulary projection; only the LAST layer writes attn probs
        logits_ref[0] = (jnp.dot(y, fcw_ref[...], preferred_element_type=jnp.float32)
                         + fcb_ref[...])
        for hh in range(N_HEADS):
            attn_ref[0, hh] = probs[hh]
    else:
        y_out_ref[0] = y


# --------------------------- pallas_call wrappers ----------------------------
def _full(shape):
    return pl.BlockSpec(shape, lambda b: (0,) * len(shape))


def encoder_layer(x, src_pad, lp):
    B, S, H = x.shape
    return pl.pallas_call(
        _encoder_layer_kernel,
        out_shape=jax.ShapeDtypeStruct((B, S, H), jnp.float32),
        grid=(B,),
        in_specs=[pl.BlockSpec((1, S, H), lambda b: (b, 0, 0)),
                  pl.BlockSpec((1, 1, S), lambda b: (b, 0, 0)),
                  _full((H, 3 * H)), _full((1, 3 * H)),
                  _full((H, H)), _full((1, H)),
                  _full((4, H)),
                  _full((H, PF_DIM)), _full((1, PF_DIM)),
                  _full((PF_DIM, H)), _full((1, H))],
        out_specs=pl.BlockSpec((1, S, H), lambda b: (b, 0, 0)),
        compiler_params=pltpu.CompilerParams(dimension_semantics=("parallel",)),
    )(x, src_pad,
      lp["wqkv"], lp["bqkv"], lp["wo"], lp["bo"], lp["ln"],
      lp["w1"], lp["b1"], lp["w2"], lp["b2"])


def decoder_layer(y, enc_src, trg_pad, src_pad, lp, *, is_last,
                  fc_w=None, fc_b=None):
    B, T, H = y.shape
    S = enc_src.shape[1]
    in_specs = [pl.BlockSpec((1, T, H), lambda b: (b, 0, 0)),
                pl.BlockSpec((1, S, H), lambda b: (b, 0, 0)),
                pl.BlockSpec((1, 1, T), lambda b: (b, 0, 0)),
                pl.BlockSpec((1, 1, S), lambda b: (b, 0, 0)),
                _full((H, 3 * H)), _full((1, 3 * H)),
                _full((H, H)), _full((1, H)),
                _full((H, H)), _full((1, H)),
                _full((H, 2 * H)), _full((1, 2 * H)),
                _full((H, H)), _full((1, H)),
                _full((6, H)),
                _full((H, PF_DIM)), _full((1, PF_DIM)),
                _full((PF_DIM, H)), _full((1, H))]
    args = [y, enc_src, trg_pad, src_pad,
            lp["swqkv"], lp["sbqkv"], lp["swo"], lp["sbo"],
            lp["cwq"], lp["cbq"], lp["cwkv"], lp["cbkv"], lp["cwo"], lp["cbo"],
            lp["ln"], lp["w1"], lp["b1"], lp["w2"], lp["b2"]]
    if is_last:
        in_specs += [_full((H, VOCAB)), _full((1, VOCAB))]
        args += [fc_w, fc_b]
        out_shape = (jax.ShapeDtypeStruct((B, T, VOCAB), jnp.float32),
                     jax.ShapeDtypeStruct((B, N_HEADS, T, S), jnp.float32))
        out_specs = (pl.BlockSpec((1, T, VOCAB), lambda b: (b, 0, 0)),
                     pl.BlockSpec((1, N_HEADS, T, S), lambda b: (b, 0, 0, 0)))
    else:
        out_shape = jax.ShapeDtypeStruct((B, T, H), jnp.float32)
        out_specs = pl.BlockSpec((1, T, H), lambda b: (b, 0, 0))
    return pl.pallas_call(
        partial(_decoder_layer_kernel, is_last=is_last),
        out_shape=out_shape,
        grid=(B,),
        in_specs=in_specs,
        out_specs=out_specs,
        compiler_params=pltpu.CompilerParams(dimension_semantics=("parallel",)),
    )(*args)


# ----------------------------- forward pass ----------------------------------
def seq2seq_forward(params, src, trg):
    B, S = src.shape
    T = trg.shape[1]

    # pad masks as tiny (B,1,L) float vectors; full masks are built in-kernel.
    src_pad = (src != PAD).astype(jnp.float32).reshape(B, 1, S)
    trg_pad = (trg != PAD).astype(jnp.float32).reshape(B, 1, T)

    emb_scale = math.sqrt(HID)

    # ----- encoder -----
    enc = params["enc"]
    x = enc["tok_emb"][src] * emb_scale + enc["pos_emb"][jnp.arange(S)][None]
    for lp in enc["layers"]:
        x = encoder_layer(x, src_pad, lp)
    enc_src = x

    # ----- decoder -----
    dec = params["dec"]
    y = dec["tok_emb"][trg] * emb_scale + dec["pos_emb"][jnp.arange(T)][None]
    n_layers = len(dec["layers"])
    output = attention = None
    for li, lp in enumerate(dec["layers"]):
        if li < n_layers - 1:
            y = decoder_layer(y, enc_src, trg_pad, src_pad, lp, is_last=False)
        else:
            output, attention = decoder_layer(
                y, enc_src, trg_pad, src_pad, lp, is_last=True,
                fc_w=dec["fc_out_w"], fc_b=dec["fc_out_b"])
    return output, attention


# --------------------------- parameter init ----------------------------------
def _xavier(key, shape):
    lim = math.sqrt(6.0 / (shape[0] + shape[1]))
    return jax.random.uniform(key, shape, jnp.float32, -lim, lim)


def _init_enc_layer(key):
    ks = jax.random.split(key, 6)
    return dict(
        wqkv=jnp.concatenate([_xavier(ks[0], (HID, HID)),
                              _xavier(ks[1], (HID, HID)),
                              _xavier(ks[2], (HID, HID))], axis=1),
        bqkv=jnp.zeros((1, 3 * HID), jnp.float32),
        wo=_xavier(ks[3], (HID, HID)), bo=jnp.zeros((1, HID), jnp.float32),
        ln=jnp.stack([jnp.ones(HID), jnp.zeros(HID),
                      jnp.ones(HID), jnp.zeros(HID)]).astype(jnp.float32),
        w1=_xavier(ks[4], (HID, PF_DIM)), b1=jnp.zeros((1, PF_DIM), jnp.float32),
        w2=_xavier(ks[5], (PF_DIM, HID)), b2=jnp.zeros((1, HID), jnp.float32))


def _init_dec_layer(key):
    ks = jax.random.split(key, 10)
    return dict(
        swqkv=jnp.concatenate([_xavier(ks[0], (HID, HID)),
                               _xavier(ks[1], (HID, HID)),
                               _xavier(ks[2], (HID, HID))], axis=1),
        sbqkv=jnp.zeros((1, 3 * HID), jnp.float32),
        swo=_xavier(ks[3], (HID, HID)), sbo=jnp.zeros((1, HID), jnp.float32),
        cwq=_xavier(ks[4], (HID, HID)), cbq=jnp.zeros((1, HID), jnp.float32),
        cwkv=jnp.concatenate([_xavier(ks[5], (HID, HID)),
                              _xavier(ks[6], (HID, HID))], axis=1),
        cbkv=jnp.zeros((1, 2 * HID), jnp.float32),
        cwo=_xavier(ks[7], (HID, HID)), cbo=jnp.zeros((1, HID), jnp.float32),
        ln=jnp.stack([jnp.ones(HID), jnp.zeros(HID),
                      jnp.ones(HID), jnp.zeros(HID),
                      jnp.ones(HID), jnp.zeros(HID)]).astype(jnp.float32),
        w1=_xavier(ks[8], (HID, PF_DIM)), b1=jnp.zeros((1, PF_DIM), jnp.float32),
        w2=_xavier(ks[9], (PF_DIM, HID)), b2=jnp.zeros((1, HID), jnp.float32))


def init_params(key):
    ks = jax.random.split(key, 6 + ENC_LAYERS + DEC_LAYERS)
    enc = dict(
        tok_emb=0.02 * jax.random.normal(ks[0], (VOCAB, HID), jnp.float32),
        pos_emb=0.02 * jax.random.normal(ks[1], (MAX_LEN, HID), jnp.float32),
        layers=[_init_enc_layer(ks[6 + i]) for i in range(ENC_LAYERS)])
    dec = dict(
        tok_emb=0.02 * jax.random.normal(ks[2], (VOCAB, HID), jnp.float32),
        pos_emb=0.02 * jax.random.normal(ks[3], (MAX_LEN, HID), jnp.float32),
        layers=[_init_dec_layer(ks[6 + ENC_LAYERS + i]) for i in range(DEC_LAYERS)],
        fc_out_w=_xavier(ks[4], (HID, VOCAB)),
        fc_out_b=jnp.zeros((1, VOCAB), jnp.float32))
    return dict(enc=enc, dec=dec)


# ------------------------------- main ----------------------------------------
if __name__ == "__main__":
    key = jax.random.PRNGKey(0)
    pkey, skey, tkey = jax.random.split(key, 3)
    params = init_params(pkey)

    B, S, T = 2, 8, 8
    src = jax.random.randint(skey, (B, S), 1, VOCAB).astype(jnp.int32)
    trg = jax.random.randint(tkey, (B, T), 1, VOCAB).astype(jnp.int32)
    # sprinkle some PAD tokens to exercise the masks
    src = src.at[1, 6:].set(PAD)
    trg = trg.at[0, 7:].set(PAD)

    output, attention = jax.jit(seq2seq_forward)(params, src, trg)
    jax.block_until_ready((output, attention))

    assert output.shape == (B, T, VOCAB)
    assert attention.shape == (B, N_HEADS, T, S)
    assert bool(jnp.all(jnp.isfinite(output)))
    # attention rows are softmax distributions
    assert bool(jnp.allclose(attention.sum(-1), 1.0, atol=1e-4))
    print("KERNEL_OK")
</pallas_src>

<mosaic_0001>
module attributes {stable_mosaic.version = 11 : i64} {
  func.func @_encoder_layer_kernel(%arg0: i32, %arg1: memref<1x8x32xf32, #tpu.memory_space<vmem>>, %arg2: memref<1x1x8xf32, #tpu.memory_space<vmem>>, %arg3: memref<32x96xf32, #tpu.memory_space<vmem>>, %arg4: memref<1x96xf32, #tpu.memory_space<vmem>>, %arg5: memref<32x32xf32, #tpu.memory_space<vmem>>, %arg6: memref<1x32xf32, #tpu.memory_space<vmem>>, %arg7: memref<4x32xf32, #tpu.memory_space<vmem>>, %arg8: memref<32x64xf32, #tpu.memory_space<vmem>>, %arg9: memref<1x64xf32, #tpu.memory_space<vmem>>, %arg10: memref<64x32xf32, #tpu.memory_space<vmem>>, %arg11: memref<1x32xf32, #tpu.memory_space<vmem>>, %arg12: memref<1x8x32xf32, #tpu.memory_space<vmem>>) attributes {dimension_semantics = [#tpu.dimension_semantics<parallel>], iteration_bounds = array<i64: 2>, scalar_prefetch = 0 : i64, scratch_operands = 0 : i64, tpu.core_type = #tpu.core_type<tc>, window_params = [{transform_indices = @transform_0, window_bounds = array<i64: 1, 8, 32>}, {transform_indices = @transform_1, window_bounds = array<i64: 1, 1, 8>}, {pipeline_mode = #tpu.pipeline_mode<synchronous>, transform_indices = @transform_2, window_bounds = array<i64: 32, 96>}, {pipeline_mode = #tpu.pipeline_mode<synchronous>, transform_indices = @transform_3, window_bounds = array<i64: 1, 96>}, {pipeline_mode = #tpu.pipeline_mode<synchronous>, transform_indices = @transform_4, window_bounds = array<i64: 32, 32>}, {pipeline_mode = #tpu.pipeline_mode<synchronous>, transform_indices = @transform_5, window_bounds = array<i64: 1, 32>}, {pipeline_mode = #tpu.pipeline_mode<synchronous>, transform_indices = @transform_6, window_bounds = array<i64: 4, 32>}, {pipeline_mode = #tpu.pipeline_mode<synchronous>, transform_indices = @transform_7, window_bounds = array<i64: 32, 64>}, {pipeline_mode = #tpu.pipeline_mode<synchronous>, transform_indices = @transform_8, window_bounds = array<i64: 1, 64>}, {pipeline_mode = #tpu.pipeline_mode<synchronous>, transform_indices = @transform_9, window_bounds = array<i64: 64, 32>}, {pipeline_mode = #tpu.pipeline_mode<synchronous>, transform_indices = @transform_10, window_bounds = array<i64: 1, 32>}, {transform_indices = @transform_11, window_bounds = array<i64: 1, 8, 32>}]} {
    %c0 = arith.constant 0 : index
    %c0_0 = arith.constant 0 : index
    %c0_1 = arith.constant 0 : index
    %0 = vector.load %arg1[%c0, %c0_0, %c0_1] : memref<1x8x32xf32, #tpu.memory_space<vmem>>, vector<1x8x32xf32>
    %1 = vector.shape_cast %0 : vector<1x8x32xf32> to vector<8x32xf32>
    %c0_2 = arith.constant 0 : index
    %c0_3 = arith.constant 0 : index
    %c0_4 = arith.constant 0 : index
    %2 = vector.load %arg2[%c0_2, %c0_3, %c0_4] : memref<1x1x8xf32, #tpu.memory_space<vmem>>, vector<1x1x8xf32>
    %3 = vector.shape_cast %2 : vector<1x1x8xf32> to vector<1x8xf32>
    %c0_5 = arith.constant 0 : index
    %c0_6 = arith.constant 0 : index
    %4 = vector.load %arg7[%c0_5, %c0_6] : memref<4x32xf32, #tpu.memory_space<vmem>>, vector<4x32xf32>
    %c0_7 = arith.constant 0 : index
    %c0_8 = arith.constant 0 : index
    %5 = vector.load %arg3[%c0_7, %c0_8] : memref<32x96xf32, #tpu.memory_space<vmem>>, vector<32x96xf32>
    %cst = arith.constant dense<0.000000e+00> : vector<8x96xf32>
    %6 = tpu.matmul %1, %5, %cst {dimension_numbers = #tpu.dot_dimension_numbers<[1], [0], [0], [1], [0, 0, 1, 1], [], []>} : vector<8x32xf32>, vector<32x96xf32>, vector<8x96xf32> -> vector<8x96xf32>
    %c0_9 = arith.constant 0 : index
    %c0_10 = arith.constant 0 : index
    %7 = vector.load %arg4[%c0_9, %c0_10] : memref<1x96xf32, #tpu.memory_space<vmem>>, vector<1x96xf32>
    %8 = vector.broadcast %7 : vector<1x96xf32> to vector<8x96xf32>
    %9 = arith.addf %6, %8 : vector<8x96xf32>
    %10 = vector.extract_strided_slice %9 {offsets = [0, 0], sizes = [8, 32], strides = [1, 1]} : vector<8x96xf32> to vector<8x32xf32>
    %11 = vector.extract_strided_slice %9 {offsets = [0, 32], sizes = [8, 32], strides = [1, 1]} : vector<8x96xf32> to vector<8x32xf32>
    %12 = vector.extract_strided_slice %9 {offsets = [0, 64], sizes = [8, 32], strides = [1, 1]} : vector<8x96xf32> to vector<8x32xf32>
    %cst_11 = arith.constant 5.000000e-01 : f32
    %13 = vector.broadcast %cst_11 : f32 to vector<1x8xf32>
    %14 = arith.cmpf ogt, %3, %13 : vector<1x8xf32>
    %15 = vector.shape_cast %14 : vector<1x8xi1> to vector<1x8xi1>
    %16 = vector.broadcast %15 : vector<1x8xi1> to vector<8x8xi1>
    %17 = vector.extract_strided_slice %10 {offsets = [0, 0], sizes = [8, 8], strides = [1, 1]} : vector<8x32xf32> to vector<8x8xf32>
    %18 = vector.extract_strided_slice %11 {offsets = [0, 0], sizes = [8, 8], strides = [1, 1]} : vector<8x32xf32> to vector<8x8xf32>
    %cst_12 = arith.constant dense<0.000000e+00> : vector<8x8xf32>
    %19 = tpu.matmul %17, %18, %cst_12 {dimension_numbers = #tpu.dot_dimension_numbers<[1], [1], [0], [0], [0, 0, 1, 0], [], []>} : vector<8x8xf32>, vector<8x8xf32>, vector<8x8xf32> -> vector<8x8xf32>
    %cst_13 = arith.constant 0.353553385 : f32
    %20 = vector.broadcast %cst_13 : f32 to vector<8x8xf32>
    %21 = arith.mulf %19, %20 : vector<8x8xf32>
    %cst_14 = arith.constant -1.000000e+10 : f32
    %22 = vector.broadcast %cst_14 : f32 to vector<8x8xf32>
    %23 = arith.select %16, %21, %22 : vector<8x8xi1>, vector<8x8xf32>
    %cst_15 = arith.constant dense<0xFF800000> : vector<8xf32>
    %24 = vector.multi_reduction <maximumf>, %23, %cst_15 [1] : vector<8x8xf32> to vector<8xf32>
    %25 = vector.shape_cast %24 : vector<8xf32> to vector<8x1xf32>
    %26 = vector.broadcast %25 : vector<8x1xf32> to vector<8x8xf32>
    %27 = arith.subf %23, %26 : vector<8x8xf32>
    %28 = math.exp %27 : vector<8x8xf32>
    %cst_16 = arith.constant dense<0.000000e+00> : vector<8xf32>
    %29 = vector.multi_reduction <add>, %28, %cst_16 [1] : vector<8x8xf32> to vector<8xf32>
    %30 = vector.shape_cast %29 : vector<8xf32> to vector<8x1xf32>
    %31 = vector.broadcast %30 : vector<8x1xf32> to vector<8x8xf32>
    %32 = arith.divf %28, %31 : vector<8x8xf32>
    %33 = vector.extract_strided_slice %12 {offsets = [0, 0], sizes = [8, 8], strides = [1, 1]} : vector<8x32xf32> to vector<8x8xf32>
    %cst_17 = arith.constant dense<0.000000e+00> : vector<8x8xf32>
    %34 = tpu.matmul %32, %33, %cst_17 {dimension_numbers = #tpu.dot_dimension_numbers<[1], [0], [0], [1], [0, 0, 1, 1], [], []>} : vector<8x8xf32>, vector<8x8xf32>, vector<8x8xf32> -> vector<8x8xf32>
    %35 = vector.extract_strided_slice %10 {offsets = [0, 8], sizes = [8, 8], strides = [1, 1]} : vector<8x32xf32> to vector<8x8xf32>
    %36 = vector.extract_strided_slice %11 {offsets = [0, 8], sizes = [8, 8], strides = [1, 1]} : vector<8x32xf32> to vector<8x8xf32>
    %cst_18 = arith.constant dense<0.000000e+00> : vector<8x8xf32>
    %37 = tpu.matmul %35, %36, %cst_18 {dimension_numbers = #tpu.dot_dimension_numbers<[1], [1], [0], [0], [0, 0, 1, 0], [], []>} : vector<8x8xf32>, vector<8x8xf32>, vector<8x8xf32> -> vector<8x8xf32>
    %cst_19 = arith.constant 0.353553385 : f32
    %38 = vector.broadcast %cst_19 : f32 to vector<8x8xf32>
    %39 = arith.mulf %37, %38 : vector<8x8xf32>
    %cst_20 = arith.constant -1.000000e+10 : f32
    %40 = vector.broadcast %cst_20 : f32 to vector<8x8xf32>
    %41 = arith.select %16, %39, %40 : vector<8x8xi1>, vector<8x8xf32>
    %cst_21 = arith.constant dense<0xFF800000> : vector<8xf32>
    %42 = vector.multi_reduction <maximumf>, %41, %cst_21 [1] : vector<8x8xf32> to vector<8xf32>
    %43 = vector.shape_cast %42 : vector<8xf32> to vector<8x1xf32>
    %44 = vector.broadcast %43 : vector<8x1xf32> to vector<8x8xf32>
    %45 = arith.subf %41, %44 : vector<8x8xf32>
    %46 = math.exp %45 : vector<8x8xf32>
    %cst_22 = arith.constant dense<0.000000e+00> : vector<8xf32>
    %47 = vector.multi_reduction <add>, %46, %cst_22 [1] : vector<8x8xf32> to vector<8xf32>
    %48 = vector.shape_cast %47 : vector<8xf32> to vector<8x1xf32>
    %49 = vector.broadcast %48 : vector<8x1xf32> to vector<8x8xf32>
    %50 = arith.divf %46, %49 : vector<8x8xf32>
    %51 = vector.extract_strided_slice %12 {offsets = [0, 8], sizes = [8, 8], strides = [1, 1]} : vector<8x32xf32> to vector<8x8xf32>
    %cst_23 = arith.constant dense<0.000000e+00> : vector<8x8xf32>
    %52 = tpu.matmul %50, %51, %cst_23 {dimension_numbers = #tpu.dot_dimension_numbers<[1], [0], [0], [1], [0, 0, 1, 1], [], []>} : vector<8x8xf32>, vector<8x8xf32>, vector<8x8xf32> -> vector<8x8xf32>
    %53 = vector.extract_strided_slice %10 {offsets = [0, 16], sizes = [8, 8], strides = [1, 1]} : vector<8x32xf32> to vector<8x8xf32>
    %54 = vector.extract_strided_slice %11 {offsets = [0, 16], sizes = [8, 8], strides = [1, 1]} : vector<8x32xf32> to vector<8x8xf32>
    %cst_24 = arith.constant dense<0.000000e+00> : vector<8x8xf32>
    %55 = tpu.matmul %53, %54, %cst_24 {dimension_numbers = #tpu.dot_dimension_numbers<[1], [1], [0], [0], [0, 0, 1, 0], [], []>} : vector<8x8xf32>, vector<8x8xf32>, vector<8x8xf32> -> vector<8x8xf32>
    %cst_25 = arith.constant 0.353553385 : f32
    %56 = vector.broadcast %cst_25 : f32 to vector<8x8xf32>
    %57 = arith.mulf %55, %56 : vector<8x8xf32>
    %cst_26 = arith.constant -1.000000e+10 : f32
    %58 = vector.broadcast %cst_26 : f32 to vector<8x8xf32>
    %59 = arith.select %16, %57, %58 : vector<8x8xi1>, vector<8x8xf32>
    %cst_27 = arith.constant dense<0xFF800000> : vector<8xf32>
    %60 = vector.multi_reduction <maximumf>, %59, %cst_27 [1] : vector<8x8xf32> to vector<8xf32>
    %61 = vector.shape_cast %60 : vector<8xf32> to vector<8x1xf32>
    %62 = vector.broadcast %61 : vector<8x1xf32> to vector<8x8xf32>
    %63 = arith.subf %59, %62 : vector<8x8xf32>
    %64 = math.exp %63 : vector<8x8xf32>
    %cst_28 = arith.constant dense<0.000000e+00> : vector<8xf32>
    %65 = vector.multi_reduction <add>, %64, %cst_28 [1] : vector<8x8xf32> to vector<8xf32>
    %66 = vector.shape_cast %65 : vector<8xf32> to vector<8x1xf32>
    %67 = vector.broadcast %66 : vector<8x1xf32> to vector<8x8xf32>
    %68 = arith.divf %64, %67 : vector<8x8xf32>
    %69 = vector.extract_strided_slice %12 {offsets = [0, 16], sizes = [8, 8], strides = [1, 1]} : vector<8x32xf32> to vector<8x8xf32>
    %cst_29 = arith.constant dense<0.000000e+00> : vector<8x8xf32>
    %70 = tpu.matmul %68, %69, %cst_29 {dimension_numbers = #tpu.dot_dimension_numbers<[1], [0], [0], [1], [0, 0, 1, 1], [], []>} : vector<8x8xf32>, vector<8x8xf32>, vector<8x8xf32> -> vector<8x8xf32>
    %71 = vector.extract_strided_slice %10 {offsets = [0, 24], sizes = [8, 8], strides = [1, 1]} : vector<8x32xf32> to vector<8x8xf32>
    %72 = vector.extract_strided_slice %11 {offsets = [0, 24], sizes = [8, 8], strides = [1, 1]} : vector<8x32xf32> to vector<8x8xf32>
    %cst_30 = arith.constant dense<0.000000e+00> : vector<8x8xf32>
    %73 = tpu.matmul %71, %72, %cst_30 {dimension_numbers = #tpu.dot_dimension_numbers<[1], [1], [0], [0], [0, 0, 1, 0], [], []>} : vector<8x8xf32>, vector<8x8xf32>, vector<8x8xf32> -> vector<8x8xf32>
    %cst_31 = arith.constant 0.353553385 : f32
    %74 = vector.broadcast %cst_31 : f32 to vector<8x8xf32>
    %75 = arith.mulf %73, %74 : vector<8x8xf32>
    %cst_32 = arith.constant -1.000000e+10 : f32
    %76 = vector.broadcast %cst_32 : f32 to vector<8x8xf32>
    %77 = arith.select %16, %75, %76 : vector<8x8xi1>, vector<8x8xf32>
    %cst_33 = arith.constant dense<0xFF800000> : vector<8xf32>
    %78 = vector.multi_reduction <maximumf>, %77, %cst_33 [1] : vector<8x8xf32> to vector<8xf32>
    %79 = vector.shape_cast %78 : vector<8xf32> to vector<8x1xf32>
    %80 = vector.broadcast %79 : vector<8x1xf32> to vector<8x8xf32>
    %81 = arith.subf %77, %80 : vector<8x8xf32>
    %82 = math.exp %81 : vector<8x8xf32>
    %cst_34 = arith.constant dense<0.000000e+00> : vector<8xf32>
    %83 = vector.multi_reduction <add>, %82, %cst_34 [1] : vector<8x8xf32> to vector<8xf32>
    %84 = vector.shape_cast %83 : vector<8xf32> to vector<8x1xf32>
    %85 = vector.broadcast %84 : vector<8x1xf32> to vector<8x8xf32>
    %86 = arith.divf %82, %85 : vector<8x8xf32>
    %87 = vector.extract_strided_slice %12 {offsets = [0, 24], sizes = [8, 8], strides = [1, 1]} : vector<8x32xf32> to vector<8x8xf32>
    %cst_35 = arith.constant dense<0.000000e+00> : vector<8x8xf32>
    %88 = tpu.matmul %86, %87, %cst_35 {dimension_numbers = #tpu.dot_dimension_numbers<[1], [0], [0], [1], [0, 0, 1, 1], [], []>} : vector<8x8xf32>, vector<8x8xf32>, vector<8x8xf32> -> vector<8x8xf32>
    %89 = tpu.concatenate %34, %52, %70, %88 in 1 : vector<8x8xf32>, vector<8x8xf32>, vector<8x8xf32>, vector<8x8xf32> -> vector<8x32xf32>
    %c0_36 = arith.constant 0 : index
    %c0_37 = arith.constant 0 : index
    %90 = vector.load %arg5[%c0_36, %c0_37] : memref<32x32xf32, #tpu.memory_space<vmem>>, vector<32x32xf32>
    %cst_38 = arith.constant dense<0.000000e+00> : vector<8x32xf32>
    %91 = tpu.matmul %89, %90, %cst_38 {dimension_numbers = #tpu.dot_dimension_numbers<[1], [0], [0], [1], [0, 0, 1, 1], [], []>} : vector<8x32xf32>, vector<32x32xf32>, vector<8x32xf32> -> vector<8x32xf32>
    %c0_39 = arith.constant 0 : index
    %c0_40 = arith.constant 0 : index
    %92 = vector.load %arg6[%c0_39, %c0_40] : memref<1x32xf32, #tpu.memory_space<vmem>>, vector<1x32xf32>
    %93 = vector.broadcast %92 : vector<1x32xf32> to vector<8x32xf32>
    %94 = arith.addf %91, %93 : vector<8x32xf32>
    %95 = arith.addf %1, %94 : vector<8x32xf32>
    %96 = vector.extract_strided_slice %4 {offsets = [0, 0], sizes = [1, 32], strides = [1, 1]} : vector<4x32xf32> to vector<1x32xf32>
    %97 = vector.extract_strided_slice %4 {offsets = [1, 0], sizes = [1, 32], strides = [1, 1]} : vector<4x32xf32> to vector<1x32xf32>
    %cst_41 = arith.constant dense<0.000000e+00> : vector<8xf32>
    %98 = vector.multi_reduction <add>, %95, %cst_41 [1] : vector<8x32xf32> to vector<8xf32>
    %99 = vector.shape_cast %98 : vector<8xf32> to vector<8x1xf32>
    %cst_42 = arith.constant 3.200000e+01 : f32
    %100 = vector.broadcast %cst_42 : f32 to vector<8x1xf32>
    %101 = arith.divf %99, %100 : vector<8x1xf32>
    %102 = vector.broadcast %101 : vector<8x1xf32> to vector<8x32xf32>
    %103 = arith.subf %95, %102 : vector<8x32xf32>
    %104 = arith.mulf %103, %103 : vector<8x32xf32>
    %cst_43 = arith.constant dense<0.000000e+00> : vector<8xf32>
    %105 = vector.multi_reduction <add>, %104, %cst_43 [1] : vector<8x32xf32> to vector<8xf32>
    %106 = vector.shape_cast %105 : vector<8xf32> to vector<8x1xf32>
    %cst_44 = arith.constant 3.200000e+01 : f32
    %107 = vector.broadcast %cst_44 : f32 to vector<8x1xf32>
    %108 = arith.divf %106, %107 : vector<8x1xf32>
    %109 = vector.broadcast %101 : vector<8x1xf32> to vector<8x32xf32>
    %110 = arith.subf %95, %109 : vector<8x32xf32>
    %cst_45 = arith.constant 9.99999974E-6 : f32
    %111 = vector.broadcast %cst_45 : f32 to vector<8x1xf32>
    %112 = arith.addf %108, %111 : vector<8x1xf32>
    %113 = math.rsqrt %112 : vector<8x1xf32>
    %114 = vector.broadcast %113 : vector<8x1xf32> to vector<8x32xf32>
    %115 = arith.mulf %110, %114 : vector<8x32xf32>
    %116 = vector.broadcast %96 : vector<1x32xf32> to vector<8x32xf32>
    %117 = arith.mulf %115, %116 : vector<8x32xf32>
    %118 = vector.broadcast %97 : vector<1x32xf32> to vector<8x32xf32>
    %119 = arith.addf %117, %118 : vector<8x32xf32>
    %c0_46 = arith.constant 0 : index
    %c0_47 = arith.constant 0 : index
    %120 = vector.load %arg8[%c0_46, %c0_47] : memref<32x64xf32, #tpu.memory_space<vmem>>, vector<32x64xf32>
    %cst_48 = arith.constant dense<0.000000e+00> : vector<8x64xf32>
    %121 = tpu.matmul %119, %120, %cst_48 {dimension_numbers = #tpu.dot_dimension_numbers<[1], [0], [0], [1], [0, 0, 1, 1], [], []>} : vector<8x32xf32>, vector<32x64xf32>, vector<8x64xf32> -> vector<8x64xf32>
    %c0_49 = arith.constant 0 : index
    %c0_50 = arith.constant 0 : index
    %122 = vector.load %arg9[%c0_49, %c0_50] : memref<1x64xf32, #tpu.memory_space<vmem>>, vector<1x64xf32>
    %123 = vector.broadcast %122 : vector<1x64xf32> to vector<8x64xf32>
    %124 = arith.addf %121, %123 : vector<8x64xf32>
    %cst_51 = arith.constant 0.000000e+00 : f32
    %125 = vector.broadcast %cst_51 : f32 to vector<8x64xf32>
    %126 = arith.maximumf %124, %125 : vector<8x64xf32>
    %c0_52 = arith.constant 0 : index
    %c0_53 = arith.constant 0 : index
    %127 = vector.load %arg10[%c0_52, %c0_53] : memref<64x32xf32, #tpu.memory_space<vmem>>, vector<64x32xf32>
    %cst_54 = arith.constant dense<0.000000e+00> : vector<8x32xf32>
    %128 = tpu.matmul %126, %127, %cst_54 {dimension_numbers = #tpu.dot_dimension_numbers<[1], [0], [0], [1], [0, 0, 1, 1], [], []>} : vector<8x64xf32>, vector<64x32xf32>, vector<8x32xf32> -> vector<8x32xf32>
    %c0_55 = arith.constant 0 : index
    %c0_56 = arith.constant 0 : index
    %129 = vector.load %arg11[%c0_55, %c0_56] : memref<1x32xf32, #tpu.memory_space<vmem>>, vector<1x32xf32>
    %130 = vector.broadcast %129 : vector<1x32xf32> to vector<8x32xf32>
    %131 = arith.addf %128, %130 : vector<8x32xf32>
    %132 = arith.addf %119, %131 : vector<8x32xf32>
    %133 = vector.extract_strided_slice %4 {offsets = [2, 0], sizes = [1, 32], strides = [1, 1]} : vector<4x32xf32> to vector<1x32xf32>
    %134 = vector.extract_strided_slice %4 {offsets = [3, 0], sizes = [1, 32], strides = [1, 1]} : vector<4x32xf32> to vector<1x32xf32>
    %cst_57 = arith.constant dense<0.000000e+00> : vector<8xf32>
    %135 = vector.multi_reduction <add>, %132, %cst_57 [1] : vector<8x32xf32> to vector<8xf32>
    %136 = vector.shape_cast %135 : vector<8xf32> to vector<8x1xf32>
    %cst_58 = arith.constant 3.200000e+01 : f32
    %137 = vector.broadcast %cst_58 : f32 to vector<8x1xf32>
    %138 = arith.divf %136, %137 : vector<8x1xf32>
    %139 = vector.broadcast %138 : vector<8x1xf32> to vector<8x32xf32>
    %140 = arith.subf %132, %139 : vector<8x32xf32>
    %141 = arith.mulf %140, %140 : vector<8x32xf32>
    %cst_59 = arith.constant dense<0.000000e+00> : vector<8xf32>
    %142 = vector.multi_reduction <add>, %141, %cst_59 [1] : vector<8x32xf32> to vector<8xf32>
    %143 = vector.shape_cast %142 : vector<8xf32> to vector<8x1xf32>
    %cst_60 = arith.constant 3.200000e+01 : f32
    %144 = vector.broadcast %cst_60 : f32 to vector<8x1xf32>
    %145 = arith.divf %143, %144 : vector<8x1xf32>
    %146 = vector.broadcast %138 : vector<8x1xf32> to vector<8x32xf32>
    %147 = arith.subf %132, %146 : vector<8x32xf32>
    %cst_61 = arith.constant 9.99999974E-6 : f32
    %148 = vector.broadcast %cst_61 : f32 to vector<8x1xf32>
    %149 = arith.addf %145, %148 : vector<8x1xf32>
    %150 = math.rsqrt %149 : vector<8x1xf32>
    %151 = vector.broadcast %150 : vector<8x1xf32> to vector<8x32xf32>
    %152 = arith.mulf %147, %151 : vector<8x32xf32>
    %153 = vector.broadcast %133 : vector<1x32xf32> to vector<8x32xf32>
    %154 = arith.mulf %152, %153 : vector<8x32xf32>
    %155 = vector.broadcast %134 : vector<1x32xf32> to vector<8x32xf32>
    %156 = arith.addf %154, %155 : vector<8x32xf32>
    %c0_62 = arith.constant 0 : index
    %c0_63 = arith.constant 0 : index
    %c0_64 = arith.constant 0 : index
    %157 = vector.load %arg12[%c0_62, %c0_63, %c0_64] : memref<1x8x32xf32, #tpu.memory_space<vmem>>, vector<1x8x32xf32>
    %158 = vector.shape_cast %157 : vector<1x8x32xf32> to vector<8x32xf32>
    %159 = vector.shape_cast %156 : vector<8x32xf32> to vector<1x8x32xf32>
    tpu.vector_store %arg12[%c0_62, %c0_63, %c0_64], %159 {strides = array<i32>} : memref<1x8x32xf32, #tpu.memory_space<vmem>>, vector<1x8x32xf32>,
    return
  }
  func.func @transform_0(%arg0: i32) -> (i32, i32, i32) {
    %c0_i32 = arith.constant 0 : i32
    %c0_i32_0 = arith.constant 0 : i32
    %c0_i32_1 = arith.constant 0 : i32
    return %arg0, %c0_i32, %c0_i32_0 : i32, i32, i32
  }
  func.func @transform_1(%arg0: i32) -> (i32, i32, i32) {
    %c0_i32 = arith.constant 0 : i32
    %c0_i32_0 = arith.constant 0 : i32
    %c0_i32_1 = arith.constant 0 : i32
    return %arg0, %c0_i32, %c0_i32_0 : i32, i32, i32
  }
  func.func @transform_2(%arg0: i32) -> (i32, i32) {
    %c0_i32 = arith.constant 0 : i32
    %c0_i32_0 = arith.constant 0 : i32
    %c0_i32_1 = arith.constant 0 : i32
    return %c0_i32, %c0_i32_0 : i32, i32
  }
  func.func @transform_3(%arg0: i32) -> (i32, i32) {
    %c0_i32 = arith.constant 0 : i32
    %c0_i32_0 = arith.constant 0 : i32
    %c0_i32_1 = arith.constant 0 : i32
    return %c0_i32, %c0_i32_0 : i32, i32
  }
  func.func @transform_4(%arg0: i32) -> (i32, i32) {
    %c0_i32 = arith.constant 0 : i32
    %c0_i32_0 = arith.constant 0 : i32
    %c0_i32_1 = arith.constant 0 : i32
    return %c0_i32, %c0_i32_0 : i32, i32
  }
  func.func @transform_5(%arg0: i32) -> (i32, i32) {
    %c0_i32 = arith.constant 0 : i32
    %c0_i32_0 = arith.constant 0 : i32
    %c0_i32_1 = arith.constant 0 : i32
    return %c0_i32, %c0_i32_0 : i32, i32
  }
  func.func @transform_6(%arg0: i32) -> (i32, i32) {
    %c0_i32 = arith.constant 0 : i32
    %c0_i32_0 = arith.constant 0 : i32
    %c0_i32_1 = arith.constant 0 : i32
    return %c0_i32, %c0_i32_0 : i32, i32
  }
  func.func @transform_7(%arg0: i32) -> (i32, i32) {
    %c0_i32 = arith.constant 0 : i32
    %c0_i32_0 = arith.constant 0 : i32
    %c0_i32_1 = arith.constant 0 : i32
    return %c0_i32, %c0_i32_0 : i32, i32
  }
  func.func @transform_8(%arg0: i32) -> (i32, i32) {
    %c0_i32 = arith.constant 0 : i32
    %c0_i32_0 = arith.constant 0 : i32
    %c0_i32_1 = arith.constant 0 : i32
    return %c0_i32, %c0_i32_0 : i32, i32
  }
  func.func @transform_9(%arg0: i32) -> (i32, i32) {
    %c0_i32 = arith.constant 0 : i32
    %c0_i32_0 = arith.constant 0 : i32
    %c0_i32_1 = arith.constant 0 : i32
    return %c0_i32, %c0_i32_0 : i32, i32
  }
  func.func @transform_10(%arg0: i32) -> (i32, i32) {
    %c0_i32 = arith.constant 0 : i32
    %c0_i32_0 = arith.constant 0 : i32
    %c0_i32_1 = arith.constant 0 : i32
    return %c0_i32, %c0_i32_0 : i32, i32
  }
  func.func @transform_11(%arg0: i32) -> (i32, i32, i32) {
    %c0_i32 = arith.constant 0 : i32
    %c0_i32_0 = arith.constant 0 : i32
    %c0_i32_1 = arith.constant 0 : i32
    return %arg0, %c0_i32, %c0_i32_0 : i32, i32, i32
  }
}

module attributes {stable_mosaic.version = 11 : i64} {
  func.func @_decoder_layer_kernel(%arg0: i32, %arg1: memref<1x8x32xf32, #tpu.memory_space<vmem>>, %arg2: memref<1x8x32xf32, #tpu.memory_space<vmem>>, %arg3: memref<1x1x8xf32, #tpu.memory_space<vmem>>, %arg4: memref<1x1x8xf32, #tpu.memory_space<vmem>>, %arg5: memref<32x96xf32, #tpu.memory_space<vmem>>, %arg6: memref<1x96xf32, #tpu.memory_space<vmem>>, %arg7: memref<32x32xf32, #tpu.memory_space<vmem>>, %arg8: memref<1x32xf32, #tpu.memory_space<vmem>>, %arg9: memref<32x32xf32, #tpu.memory_space<vmem>>, %arg10: memref<1x32xf32, #tpu.memory_space<vmem>>, %arg11: memref<32x64xf32, #tpu.memory_space<vmem>>, %arg12: memref<1x64xf32, #tpu.memory_space<vmem>>, %arg13: memref<32x32xf32, #tpu.memory_space<vmem>>, %arg14: memref<1x32xf32, #tpu.memory_space<vmem>>, %arg15: memref<6x32xf32, #tpu.memory_space<vmem>>, %arg16: memref<32x64xf32, #tpu.memory_space<vmem>>, %arg17: memref<1x64xf32, #tpu.memory_space<vmem>>, %arg18: memref<64x32xf32, #tpu.memory_space<vmem>>, %arg19: memref<1x32xf32, #tpu.memory_space<vmem>>, %arg20: memref<1x8x32xf32, #tpu.memory_space<vmem>>) attributes {dimension_semantics = [#tpu.dimension_semantics<parallel>], iteration_bounds = array<i64: 2>, scalar_prefetch = 0 : i64, scratch_operands = 0 : i64, tpu.core_type = #tpu.core_type<tc>, window_params = [{transform_indices = @transform_0, window_bounds = array<i64: 1, 8, 32>}, {transform_indices = @transform_1, window_bounds = array<i64: 1, 8, 32>}, {transform_indices = @transform_2, window_bounds = array<i64: 1, 1, 8>}, {transform_indices = @transform_3, window_bounds = array<i64: 1, 1, 8>}, {pipeline_mode = #tpu.pipeline_mode<synchronous>, transform_indices = @transform_4, window_bounds = array<i64: 32, 96>}, {pipeline_mode = #tpu.pipeline_mode<synchronous>, transform_indices = @transform_5, window_bounds = array<i64: 1, 96>}, {pipeline_mode = #tpu.pipeline_mode<synchronous>, transform_indices = @transform_6, window_bounds = array<i64: 32, 32>}, {pipeline_mode = #tpu.pipeline_mode<synchronous>, transform_indices = @transform_7, window_bounds = array<i64: 1, 32>}, {pipeline_mode = #tpu.pipeline_mode<synchronous>, transform_indices = @transform_8, window_bounds = array<i64: 32, 32>}, {pipeline_mode = #tpu.pipeline_mode<synchronous>, transform_indices = @transform_9, window_bounds = array<i64: 1, 32>}, {pipeline_mode = #tpu.pipeline_mode<synchronous>, transform_indices = @transform_10, window_bounds = array<i64: 32, 64>}, {pipeline_mode = #tpu.pipeline_mode<synchronous>, transform_indices = @transform_11, window_bounds = array<i64: 1, 64>}, {pipeline_mode = #tpu.pipeline_mode<synchronous>, transform_indices = @transform_12, window_bounds = array<i64: 32, 32>}, {pipeline_mode = #tpu.pipeline_mode<synchronous>, transform_indices = @transform_13, window_bounds = array<i64: 1, 32>}, {pipeline_mode = #tpu.pipeline_mode<synchronous>, transform_indices = @transform_14, window_bounds = array<i64: 6, 32>}, {pipeline_mode = #tpu.pipeline_mode<synchronous>, transform_indices = @transform_15, window_bounds = array<i64: 32, 64>}, {pipeline_mode = #tpu.pipeline_mode<synchronous>, transform_indices = @transform_16, window_bounds = array<i64: 1, 64>}, {pipeline_mode = #tpu.pipeline_mode<synchronous>, transform_indices = @transform_17, window_bounds = array<i64: 64, 32>}, {pipeline_mode = #tpu.pipeline_mode<synchronous>, transform_indices = @transform_18, window_bounds = array<i64: 1, 32>}, {transform_indices = @transform_19, window_bounds = array<i64: 1, 8, 32>}]} {
    %c0 = arith.constant 0 : index
    %c0_0 = arith.constant 0 : index
    %c0_1 = arith.constant 0 : index
    %0 = vector.load %arg1[%c0, %c0_0, %c0_1] : memref<1x8x32xf32, #tpu.memory_space<vmem>>, vector<1x8x32xf32>
    %1 = vector.shape_cast %0 : vector<1x8x32xf32> to vector<8x32xf32>
    %c0_2 = arith.constant 0 : index
    %c0_3 = arith.constant 0 : index
    %c0_4 = arith.constant 0 : index
    %2 = vector.load %arg2[%c0_2, %c0_3, %c0_4] : memref<1x8x32xf32, #tpu.memory_space<vmem>>, vector<1x8x32xf32>
    %3 = vector.shape_cast %2 : vector<1x8x32xf32> to vector<8x32xf32>
    %c0_5 = arith.constant 0 : index
    %c0_6 = arith.constant 0 : index
    %c0_7 = arith.constant 0 : index
    %4 = vector.load %arg3[%c0_5, %c0_6, %c0_7] : memref<1x1x8xf32, #tpu.memory_space<vmem>>, vector<1x1x8xf32>
    %5 = vector.shape_cast %4 : vector<1x1x8xf32> to vector<1x8xf32>
    %c0_8 = arith.constant 0 : index
    %c0_9 = arith.constant 0 : index
    %c0_10 = arith.constant 0 : index
    %6 = vector.load %arg4[%c0_8, %c0_9, %c0_10] : memref<1x1x8xf32, #tpu.memory_space<vmem>>, vector<1x1x8xf32>
    %7 = vector.shape_cast %6 : vector<1x1x8xf32> to vector<1x8xf32>
    %c0_11 = arith.constant 0 : index
    %c0_12 = arith.constant 0 : index
    %8 = vector.load %arg15[%c0_11, %c0_12] : memref<6x32xf32, #tpu.memory_space<vmem>>, vector<6x32xf32>
    %c0_13 = arith.constant 0 : index
    %c0_14 = arith.constant 0 : index
    %9 = vector.load %arg5[%c0_13, %c0_14] : memref<32x96xf32, #tpu.memory_space<vmem>>, vector<32x96xf32>
    %cst = arith.constant dense<0.000000e+00> : vector<8x96xf32>
    %10 = tpu.matmul %1, %9, %cst {dimension_numbers = #tpu.dot_dimension_numbers<[1], [0], [0], [1], [0, 0, 1, 1], [], []>} : vector<8x32xf32>, vector<32x96xf32>, vector<8x96xf32> -> vector<8x96xf32>
    %c0_15 = arith.constant 0 : index
    %c0_16 = arith.constant 0 : index
    %11 = vector.load %arg6[%c0_15, %c0_16] : memref<1x96xf32, #tpu.memory_space<vmem>>, vector<1x96xf32>
    %12 = vector.broadcast %11 : vector<1x96xf32> to vector<8x96xf32>
    %13 = arith.addf %10, %12 : vector<8x96xf32>
    %14 = vector.extract_strided_slice %13 {offsets = [0, 0], sizes = [8, 32], strides = [1, 1]} : vector<8x96xf32> to vector<8x32xf32>
    %15 = vector.extract_strided_slice %13 {offsets = [0, 32], sizes = [8, 32], strides = [1, 1]} : vector<8x96xf32> to vector<8x32xf32>
    %16 = vector.extract_strided_slice %13 {offsets = [0, 64], sizes = [8, 32], strides = [1, 1]} : vector<8x96xf32> to vector<8x32xf32>
    %cst_17 = arith.constant 5.000000e-01 : f32
    %17 = vector.broadcast %cst_17 : f32 to vector<1x8xf32>
    %18 = arith.cmpf ogt, %5, %17 : vector<1x8xf32>
    %19 = tpu.iota {dimensions = array<i32: 0>} : vector<8x8xi32>
    %20 = tpu.iota {dimensions = array<i32: 1>} : vector<8x8xi32>
    %21 = arith.cmpi sle, %20, %19 : vector<8x8xi32>
    %22 = vector.broadcast %18 : vector<1x8xi1> to vector<8x8xi1>
    %23 = arith.andi %22, %21 : vector<8x8xi1>
    %24 = vector.extract_strided_slice %14 {offsets = [0, 0], sizes = [8, 8], strides = [1, 1]} : vector<8x32xf32> to vector<8x8xf32>
    %25 = vector.extract_strided_slice %15 {offsets = [0, 0], sizes = [8, 8], strides = [1, 1]} : vector<8x32xf32> to vector<8x8xf32>
    %cst_18 = arith.constant dense<0.000000e+00> : vector<8x8xf32>
    %26 = tpu.matmul %24, %25, %cst_18 {dimension_numbers = #tpu.dot_dimension_numbers<[1], [1], [0], [0], [0, 0, 1, 0], [], []>} : vector<8x8xf32>, vector<8x8xf32>, vector<8x8xf32> -> vector<8x8xf32>
    %cst_19 = arith.constant 0.353553385 : f32
    %27 = vector.broadcast %cst_19 : f32 to vector<8x8xf32>
    %28 = arith.mulf %26, %27 : vector<8x8xf32>
    %cst_20 = arith.constant -1.000000e+10 : f32
    %29 = vector.broadcast %cst_20 : f32 to vector<8x8xf32>
    %30 = arith.select %23, %28, %29 : vector<8x8xi1>, vector<8x8xf32>
    %cst_21 = arith.constant dense<0xFF800000> : vector<8xf32>
    %31 = vector.multi_reduction <maximumf>, %30, %cst_21 [1] : vector<8x8xf32> to vector<8xf32>
    %32 = vector.shape_cast %31 : vector<8xf32> to vector<8x1xf32>
    %33 = vector.broadcast %32 : vector<8x1xf32> to vector<8x8xf32>
    %34 = arith.subf %30, %33 : vector<8x8xf32>
    %35 = math.exp %34 : vector<8x8xf32>
    %cst_22 = arith.constant dense<0.000000e+00> : vector<8xf32>
    %36 = vector.multi_reduction <add>, %35, %cst_22 [1] : vector<8x8xf32> to vector<8xf32>
    %37 = vector.shape_cast %36 : vector<8xf32> to vector<8x1xf32>
    %38 = vector.broadcast %37 : vector<8x1xf32> to vector<8x8xf32>
    %39 = arith.divf %35, %38 : vector<8x8xf32>
    %40 = vector.extract_strided_slice %16 {offsets = [0, 0], sizes = [8, 8], strides = [1, 1]} : vector<8x32xf32> to vector<8x8xf32>
    %cst_23 = arith.constant dense<0.000000e+00> : vector<8x8xf32>
    %41 = tpu.matmul %39, %40, %cst_23 {dimension_numbers = #tpu.dot_dimension_numbers<[1], [0], [0], [1], [0, 0, 1, 1], [], []>} : vector<8x8xf32>, vector<8x8xf32>, vector<8x8xf32> -> vector<8x8xf32>
    %42 = vector.extract_strided_slice %14 {offsets = [0, 8], sizes = [8, 8], strides = [1, 1]} : vector<8x32xf32> to vector<8x8xf32>
    %43 = vector.extract_strided_slice %15 {offsets = [0, 8], sizes = [8, 8], strides = [1, 1]} : vector<8x32xf32> to vector<8x8xf32>
    %cst_24 = arith.constant dense<0.000000e+00> : vector<8x8xf32>
    %44 = tpu.matmul %42, %43, %cst_24 {dimension_numbers = #tpu.dot_dimension_numbers<[1], [1], [0], [0], [0, 0, 1, 0], [], []>} : vector<8x8xf32>, vector<8x8xf32>, vector<8x8xf32> -> vector<8x8xf32>
    %cst_25 = arith.constant 0.353553385 : f32
    %45 = vector.broadcast %cst_25 : f32 to vector<8x8xf32>
    %46 = arith.mulf %44, %45 : vector<8x8xf32>
    %cst_26 = arith.constant -1.000000e+10 : f32
    %47 = vector.broadcast %cst_26 : f32 to vector<8x8xf32>
    %48 = arith.select %23, %46, %47 : vector<8x8xi1>, vector<8x8xf32>
    %cst_27 = arith.constant dense<0xFF800000> : vector<8xf32>
    %49 = vector.multi_reduction <maximumf>, %48, %cst_27 [1] : vector<8x8xf32> to vector<8xf32>
    %50 = vector.shape_cast %49 : vector<8xf32> to vector<8x1xf32>
    %51 = vector.broadcast %50 : vector<8x1xf32> to vector<8x8xf32>
    %52 = arith.subf %48, %51 : vector<8x8xf32>
    %53 = math.exp %52 : vector<8x8xf32>
    %cst_28 = arith.constant dense<0.000000e+00> : vector<8xf32>
    %54 = vector.multi_reduction <add>, %53, %cst_28 [1] : vector<8x8xf32> to vector<8xf32>
    %55 = vector.shape_cast %54 : vector<8xf32> to vector<8x1xf32>
    %56 = vector.broadcast %55 : vector<8x1xf32> to vector<8x8xf32>
    %57 = arith.divf %53, %56 : vector<8x8xf32>
    %58 = vector.extract_strided_slice %16 {offsets = [0, 8], sizes = [8, 8], strides = [1, 1]} : vector<8x32xf32> to vector<8x8xf32>
    %cst_29 = arith.constant dense<0.000000e+00> : vector<8x8xf32>
    %59 = tpu.matmul %57, %58, %cst_29 {dimension_numbers = #tpu.dot_dimension_numbers<[1], [0], [0], [1], [0, 0, 1, 1], [], []>} : vector<8x8xf32>, vector<8x8xf32>, vector<8x8xf32> -> vector<8x8xf32>
    %60 = vector.extract_strided_slice %14 {offsets = [0, 16], sizes = [8, 8], strides = [1, 1]} : vector<8x32xf32> to vector<8x8xf32>
    %61 = vector.extract_strided_slice %15 {offsets = [0, 16], sizes = [8, 8], strides = [1, 1]} : vector<8x32xf32> to vector<8x8xf32>
    %cst_30 = arith.constant dense<0.000000e+00> : vector<8x8xf32>
    %62 = tpu.matmul %60, %61, %cst_30 {dimension_numbers = #tpu.dot_dimension_numbers<[1], [1], [0], [0], [0, 0, 1, 0], [], []>} : vector<8x8xf32>, vector<8x8xf32>, vector<8x8xf32> -> vector<8x8xf32>
    %cst_31 = arith.constant 0.353553385 : f32
    %63 = vector.broadcast %cst_31 : f32 to vector<8x8xf32>
    %64 = arith.mulf %62, %63 : vector<8x8xf32>
    %cst_32 = arith.constant -1.000000e+10 : f32
    %65 = vector.broadcast %cst_32 : f32 to vector<8x8xf32>
    %66 = arith.select %23, %64, %65 : vector<8x8xi1>, vector<8x8xf32>
    %cst_33 = arith.constant dense<0xFF800000> : vector<8xf32>
    %67 = vector.multi_reduction <maximumf>, %66, %cst_33 [1] : vector<8x8xf32> to vector<8xf32>
    %68 = vector.shape_cast %67 : vector<8xf32> to vector<8x1xf32>
    %69 = vector.broadcast %68 : vector<8x1xf32> to vector<8x8xf32>
    %70 = arith.subf %66, %69 : vector<8x8xf32>
    %71 = math.exp %70 : vector<8x8xf32>
    %cst_34 = arith.constant dense<0.000000e+00> : vector<8xf32>
    %72 = vector.multi_reduction <add>, %71, %cst_34 [1] : vector<8x8xf32> to vector<8xf32>
    %73 = vector.shape_cast %72 : vector<8xf32> to vector<8x1xf32>
    %74 = vector.broadcast %73 : vector<8x1xf32> to vector<8x8xf32>
    %75 = arith.divf %71, %74 : vector<8x8xf32>
    %76 = vector.extract_strided_slice %16 {offsets = [0, 16], sizes = [8, 8], strides = [1, 1]} : vector<8x32xf32> to vector<8x8xf32>
    %cst_35 = arith.constant dense<0.000000e+00> : vector<8x8xf32>
    %77 = tpu.matmul %75, %76, %cst_35 {dimension_numbers = #tpu.dot_dimension_numbers<[1], [0], [0], [1], [0, 0, 1, 1], [], []>} : vector<8x8xf32>, vector<8x8xf32>, vector<8x8xf32> -> vector<8x8xf32>
    %78 = vector.extract_strided_slice %14 {offsets = [0, 24], sizes = [8, 8], strides = [1, 1]} : vector<8x32xf32> to vector<8x8xf32>
    %79 = vector.extract_strided_slice %15 {offsets = [0, 24], sizes = [8, 8], strides = [1, 1]} : vector<8x32xf32> to vector<8x8xf32>
    %cst_36 = arith.constant dense<0.000000e+00> : vector<8x8xf32>
    %80 = tpu.matmul %78, %79, %cst_36 {dimension_numbers = #tpu.dot_dimension_numbers<[1], [1], [0], [0], [0, 0, 1, 0], [], []>} : vector<8x8xf32>, vector<8x8xf32>, vector<8x8xf32> -> vector<8x8xf32>
    %cst_37 = arith.constant 0.353553385 : f32
    %81 = vector.broadcast %cst_37 : f32 to vector<8x8xf32>
    %82 = arith.mulf %80, %81 : vector<8x8xf32>
    %cst_38 = arith.constant -1.000000e+10 : f32
    %83 = vector.broadcast %cst_38 : f32 to vector<8x8xf32>
    %84 = arith.select %23, %82, %83 : vector<8x8xi1>, vector<8x8xf32>
    %cst_39 = arith.constant dense<0xFF800000> : vector<8xf32>
    %85 = vector.multi_reduction <maximumf>, %84, %cst_39 [1] : vector<8x8xf32> to vector<8xf32>
    %86 = vector.shape_cast %85 : vector<8xf32> to vector<8x1xf32>
    %87 = vector.broadcast %86 : vector<8x1xf32> to vector<8x8xf32>
    %88 = arith.subf %84, %87 : vector<8x8xf32>
    %89 = math.exp %88 : vector<8x8xf32>
    %cst_40 = arith.constant dense<0.000000e+00> : vector<8xf32>
    %90 = vector.multi_reduction <add>, %89, %cst_40 [1] : vector<8x8xf32> to vector<8xf32>
    %91 = vector.shape_cast %90 : vector<8xf32> to vector<8x1xf32>
    %92 = vector.broadcast %91 : vector<8x1xf32> to vector<8x8xf32>
    %93 = arith.divf %89, %92 : vector<8x8xf32>
    %94 = vector.extract_strided_slice %16 {offsets = [0, 24], sizes = [8, 8], strides = [1, 1]} : vector<8x32xf32> to vector<8x8xf32>
    %cst_41 = arith.constant dense<0.000000e+00> : vector<8x8xf32>
    %95 = tpu.matmul %93, %94, %cst_41 {dimension_numbers = #tpu.dot_dimension_numbers<[1], [0], [0], [1], [0, 0, 1, 1], [], []>} : vector<8x8xf32>, vector<8x8xf32>, vector<8x8xf32> -> vector<8x8xf32>
    %96 = tpu.concatenate %41, %59, %77, %95 in 1 : vector<8x8xf32>, vector<8x8xf32>, vector<8x8xf32>, vector<8x8xf32> -> vector<8x32xf32>
    %c0_42 = arith.constant 0 : index
    %c0_43 = arith.constant 0 : index
    %97 = vector.load %arg7[%c0_42, %c0_43] : memref<32x32xf32, #tpu.memory_space<vmem>>, vector<32x32xf32>
    %cst_44 = arith.constant dense<0.000000e+00> : vector<8x32xf32>
    %98 = tpu.matmul %96, %97, %cst_44 {dimension_numbers = #tpu.dot_dimension_numbers<[1], [0], [0], [1], [0, 0, 1, 1], [], []>} : vector<8x32xf32>, vector<32x32xf32>, vector<8x32xf32> -> vector<8x32xf32>
    %c0_45 = arith.constant 0 : index
    %c0_46 = arith.constant 0 : index
    %99 = vector.load %arg8[%c0_45, %c0_46] : memref<1x32xf32, #tpu.memory_space<vmem>>, vector<1x32xf32>
    %100 = vector.broadcast %99 : vector<1x32xf32> to vector<8x32xf32>
    %101 = arith.addf %98, %100 : vector<8x32xf32>
    %102 = arith.addf %1, %101 : vector<8x32xf32>
    %103 = vector.extract_strided_slice %8 {offsets = [0, 0], sizes = [1, 32], strides = [1, 1]} : vector<6x32xf32> to vector<1x32xf32>
    %104 = vector.extract_strided_slice %8 {offsets = [1, 0], sizes = [1, 32], strides = [1, 1]} : vector<6x32xf32> to vector<1x32xf32>
    %cst_47 = arith.constant dense<0.000000e+00> : vector<8xf32>
    %105 = vector.multi_reduction <add>, %102, %cst_47 [1] : vector<8x32xf32> to vector<8xf32>
    %106 = vector.shape_cast %105 : vector<8xf32> to vector<8x1xf32>
    %cst_48 = arith.constant 3.200000e+01 : f32
    %107 = vector.broadcast %cst_48 : f32 to vector<8x1xf32>
    %108 = arith.divf %106, %107 : vector<8x1xf32>
    %109 = vector.broadcast %108 : vector<8x1xf32> to vector<8x32xf32>
    %110 = arith.subf %102, %109 : vector<8x32xf32>
    %111 = arith.mulf %110, %110 : vector<8x32xf32>
    %cst_49 = arith.constant dense<0.000000e+00> : vector<8xf32>
    %112 = vector.multi_reduction <add>, %111, %cst_49 [1] : vector<8x32xf32> to vector<8xf32>
    %113 = vector.shape_cast %112 : vector<8xf32> to vector<8x1xf32>
    %cst_50 = arith.constant 3.200000e+01 : f32
    %114 = vector.broadcast %cst_50 : f32 to vector<8x1xf32>
    %115 = arith.divf %113, %114 : vector<8x1xf32>
    %116 = vector.broadcast %108 : vector<8x1xf32> to vector<8x32xf32>
    %117 = arith.subf %102, %116 : vector<8x32xf32>
    %cst_51 = arith.constant 9.99999974E-6 : f32
    %118 = vector.broadcast %cst_51 : f32 to vector<8x1xf32>
    %119 = arith.addf %115, %118 : vector<8x1xf32>
    %120 = math.rsqrt %119 : vector<8x1xf32>
    %121 = vector.broadcast %120 : vector<8x1xf32> to vector<8x32xf32>
    %122 = arith.mulf %117, %121 : vector<8x32xf32>
    %123 = vector.broadcast %103 : vector<1x32xf32> to vector<8x32xf32>
    %124 = arith.mulf %122, %123 : vector<8x32xf32>
    %125 = vector.broadcast %104 : vector<1x32xf32> to vector<8x32xf32>
    %126 = arith.addf %124, %125 : vector<8x32xf32>
    %c0_52 = arith.constant 0 : index
    %c0_53 = arith.constant 0 : index
    %127 = vector.load %arg9[%c0_52, %c0_53] : memref<32x32xf32, #tpu.memory_space<vmem>>, vector<32x32xf32>
    %cst_54 = arith.constant dense<0.000000e+00> : vector<8x32xf32>
    %128 = tpu.matmul %126, %127, %cst_54 {dimension_numbers = #tpu.dot_dimension_numbers<[1], [0], [0], [1], [0, 0, 1, 1], [], []>} : vector<8x32xf32>, vector<32x32xf32>, vector<8x32xf32> -> vector<8x32xf32>
    %c0_55 = arith.constant 0 : index
    %c0_56 = arith.constant 0 : index
    %129 = vector.load %arg10[%c0_55, %c0_56] : memref<1x32xf32, #tpu.memory_space<vmem>>, vector<1x32xf32>
    %130 = vector.broadcast %129 : vector<1x32xf32> to vector<8x32xf32>
    %131 = arith.addf %128, %130 : vector<8x32xf32>
    %c0_57 = arith.constant 0 : index
    %c0_58 = arith.constant 0 : index
    %132 = vector.load %arg11[%c0_57, %c0_58] : memref<32x64xf32, #tpu.memory_space<vmem>>, vector<32x64xf32>
    %cst_59 = arith.constant dense<0.000000e+00> : vector<8x64xf32>
    %133 = tpu.matmul %3, %132, %cst_59 {dimension_numbers = #tpu.dot_dimension_numbers<[1], [0], [0], [1], [0, 0, 1, 1], [], []>} : vector<8x32xf32>, vector<32x64xf32>, vector<8x64xf32> -> vector<8x64xf32>
    %c0_60 = arith.constant 0 : index
    %c0_61 = arith.constant 0 : index
    %134 = vector.load %arg12[%c0_60, %c0_61] : memref<1x64xf32, #tpu.memory_space<vmem>>, vector<1x64xf32>
    %135 = vector.broadcast %134 : vector<1x64xf32> to vector<8x64xf32>
    %136 = arith.addf %133, %135 : vector<8x64xf32>
    %137 = vector.extract_strided_slice %136 {offsets = [0, 0], sizes = [8, 32], strides = [1, 1]} : vector<8x64xf32> to vector<8x32xf32>
    %138 = vector.extract_strided_slice %136 {offsets = [0, 32], sizes = [8, 32], strides = [1, 1]} : vector<8x64xf32> to vector<8x32xf32>
    %cst_62 = arith.constant 5.000000e-01 : f32
    %139 = vector.broadcast %cst_62 : f32 to vector<1x8xf32>
    %140 = arith.cmpf ogt, %7, %139 : vector<1x8xf32>
    %141 = vector.shape_cast %140 : vector<1x8xi1> to vector<1x8xi1>
    %142 = vector.broadcast %141 : vector<1x8xi1> to vector<8x8xi1>
    %143 = vector.extract_strided_slice %131 {offsets = [0, 0], sizes = [8, 8], strides = [1, 1]} : vector<8x32xf32> to vector<8x8xf32>
    %144 = vector.extract_strided_slice %137 {offsets = [0, 0], sizes = [8, 8], strides = [1, 1]} : vector<8x32xf32> to vector<8x8xf32>
    %cst_63 = arith.constant dense<0.000000e+00> : vector<8x8xf32>
    %145 = tpu.matmul %143, %144, %cst_63 {dimension_numbers = #tpu.dot_dimension_numbers<[1], [1], [0], [0], [0, 0, 1, 0], [], []>} : vector<8x8xf32>, vector<8x8xf32>, vector<8x8xf32> -> vector<8x8xf32>
    %cst_64 = arith.constant 0.353553385 : f32
    %146 = vector.broadcast %cst_64 : f32 to vector<8x8xf32>
    %147 = arith.mulf %145, %146 : vector<8x8xf32>
    %cst_65 = arith.constant -1.000000e+10 : f32
    %148 = vector.broadcast %cst_65 : f32 to vector<8x8xf32>
    %149 = arith.select %142, %147, %148 : vector<8x8xi1>, vector<8x8xf32>
    %cst_66 = arith.constant dense<0xFF800000> : vector<8xf32>
    %150 = vector.multi_reduction <maximumf>, %149, %cst_66 [1] : vector<8x8xf32> to vector<8xf32>
    %151 = vector.shape_cast %150 : vector<8xf32> to vector<8x1xf32>
    %152 = vector.broadcast %151 : vector<8x1xf32> to vector<8x8xf32>
    %153 = arith.subf %149, %152 : vector<8x8xf32>
    %154 = math.exp %153 : vector<8x8xf32>
    %cst_67 = arith.constant dense<0.000000e+00> : vector<8xf32>
    %155 = vector.multi_reduction <add>, %154, %cst_67 [1] : vector<8x8xf32> to vector<8xf32>
    %156 = vector.shape_cast %155 : vector<8xf32> to vector<8x1xf32>
    %157 = vector.broadcast %156 : vector<8x1xf32> to vector<8x8xf32>
    %158 = arith.divf %154, %157 : vector<8x8xf32>
    %159 = vector.extract_strided_slice %138 {offsets = [0, 0], sizes = [8, 8], strides = [1, 1]} : vector<8x32xf32> to vector<8x8xf32>
    %cst_68 = arith.constant dense<0.000000e+00> : vector<8x8xf32>
    %160 = tpu.matmul %158, %159, %cst_68 {dimension_numbers = #tpu.dot_dimension_numbers<[1], [0], [0], [1], [0, 0, 1, 1], [], []>} : vector<8x8xf32>, vector<8x8xf32>, vector<8x8xf32> -> vector<8x8xf32>
    %161 = vector.extract_strided_slice %131 {offsets = [0, 8], sizes = [8, 8], strides = [1, 1]} : vector<8x32xf32> to vector<8x8xf32>
    %162 = vector.extract_strided_slice %137 {offsets = [0, 8], sizes = [8, 8], strides = [1, 1]} : vector<8x32xf32> to vector<8x8xf32>
    %cst_69 = arith.constant dense<0.000000e+00> : vector<8x8xf32>
    %163 = tpu.matmul %161, %162, %cst_69 {dimension_numbers = #tpu.dot_dimension_numbers<[1], [1], [0], [0], [0, 0, 1, 0], [], []>} : vector<8x8xf32>, vector<8x8xf32>, vector<8x8xf32> -> vector<8x8xf32>
    %cst_70 = arith.constant 0.353553385 : f32
    %164 = vector.broadcast %cst_70 : f32 to vector<8x8xf32>
    %165 = arith.mulf %163, %164 : vector<8x8xf32>
    %cst_71 = arith.constant -1.000000e+10 : f32
    %166 = vector.broadcast %cst_71 : f32 to vector<8x8xf32>
    %167 = arith.select %142, %165, %166 : vector<8x8xi1>, vector<8x8xf32>
    %cst_72 = arith.constant dense<0xFF800000> : vector<8xf32>
    %168 = vector.multi_reduction <maximumf>, %167, %cst_72 [1] : vector<8x8xf32> to vector<8xf32>
    %169 = vector.shape_cast %168 : vector<8xf32> to vector<8x1xf32>
    %170 = vector.broadcast %169 : vector<8x1xf32> to vector<8x8xf32>
    %171 = arith.subf %167, %170 : vector<8x8xf32>
    %172 = math.exp %171 : vector<8x8xf32>
    %cst_73 = arith.constant dense<0.000000e+00> : vector<8xf32>
    %173 = vector.multi_reduction <add>, %172, %cst_73 [1] : vector<8x8xf32> to vector<8xf32>
    %174 = vector.shape_cast %173 : vector<8xf32> to vector<8x1xf32>
    %175 = vector.broadcast %174 : vector<8x1xf32> to vector<8x8xf32>
    %176 = arith.divf %172, %175 : vector<8x8xf32>
    %177 = vector.extract_strided_slice %138 {offsets = [0, 8], sizes = [8, 8], strides = [1, 1]} : vector<8x32xf32> to vector<8x8xf32>
    %cst_74 = arith.constant dense<0.000000e+00> : vector<8x8xf32>
    %178 = tpu.matmul %176, %177, %cst_74 {dimension_numbers = #tpu.dot_dimension_numbers<[1], [0], [0], [1], [0, 0, 1, 1], [], []>} : vector<8x8xf32>, vector<8x8xf32>, vector<8x8xf32> -> vector<8x8xf32>
    %179 = vector.extract_strided_slice %131 {offsets = [0, 16], sizes = [8, 8], strides = [1, 1]} : vector<8x32xf32> to vector<8x8xf32>
    %180 = vector.extract_strided_slice %137 {offsets = [0, 16], sizes = [8, 8], strides = [1, 1]} : vector<8x32xf32> to vector<8x8xf32>
    %cst_75 = arith.constant dense<0.000000e+00> : vector<8x8xf32>
    %181 = tpu.matmul %179, %180, %cst_75 {dimension_numbers = #tpu.dot_dimension_numbers<[1], [1], [0], [0], [0, 0, 1, 0], [], []>} : vector<8x8xf32>, vector<8x8xf32>, vector<8x8xf32> -> vector<8x8xf32>
    %cst_76 = arith.constant 0.353553385 : f32
    %182 = vector.broadcast %cst_76 : f32 to vector<8x8xf32>
    %183 = arith.mulf %181, %182 : vector<8x8xf32>
    %cst_77 = arith.constant -1.000000e+10 : f32
    %184 = vector.broadcast %cst_77 : f32 to vector<8x8xf32>
    %185 = arith.select %142, %183, %184 : vector<8x8xi1>, vector<8x8xf32>
    %cst_78 = arith.constant dense<0xFF800000> : vector<8xf32>
    %186 = vector.multi_reduction <maximumf>, %185, %cst_78 [1] : vector<8x8xf32> to vector<8xf32>
    %187 = vector.shape_cast %186 : vector<8xf32> to vector<8x1xf32>
    %188 = vector.broadcast %187 : vector<8x1xf32> to vector<8x8xf32>
    %189 = arith.subf %185, %188 : vector<8x8xf32>
    %190 = math.exp %189 : vector<8x8xf32>
    %cst_79 = arith.constant dense<0.000000e+00> : vector<8xf32>
    %191 = vector.multi_reduction <add>, %190, %cst_79 [1] : vector<8x8xf32> to vector<8xf32>
    %192 = vector.shape_cast %191 : vector<8xf32> to vector<8x1xf32>
    %193 = vector.broadcast %192 : vector<8x1xf32> to vector<8x8xf32>
    %194 = arith.divf %190, %193 : vector<8x8xf32>
    %195 = vector.extract_strided_slice %138 {offsets = [0, 16], sizes = [8, 8], strides = [1, 1]} : vector<8x32xf32> to vector<8x8xf32>
    %cst_80 = arith.constant dense<0.000000e+00> : vector<8x8xf32>
    %196 = tpu.matmul %194, %195, %cst_80 {dimension_numbers = #tpu.dot_dimension_numbers<[1], [0], [0], [1], [0, 0, 1, 1], [], []>} : vector<8x8xf32>, vector<8x8xf32>, vector<8x8xf32> -> vector<8x8xf32>
    %197 = vector.extract_strided_slice %131 {offsets = [0, 24], sizes = [8, 8], strides = [1, 1]} : vector<8x32xf32> to vector<8x8xf32>
    %198 = vector.extract_strided_slice %137 {offsets = [0, 24], sizes = [8, 8], strides = [1, 1]} : vector<8x32xf32> to vector<8x8xf32>
    %cst_81 = arith.constant dense<0.000000e+00> : vector<8x8xf32>
    %199 = tpu.matmul %197, %198, %cst_81 {dimension_numbers = #tpu.dot_dimension_numbers<[1], [1], [0], [0], [0, 0, 1, 0], [], []>} : vector<8x8xf32>, vector<8x8xf32>, vector<8x8xf32> -> vector<8x8xf32>
    %cst_82 = arith.constant 0.353553385 : f32
    %200 = vector.broadcast %cst_82 : f32 to vector<8x8xf32>
    %201 = arith.mulf %199, %200 : vector<8x8xf32>
    %cst_83 = arith.constant -1.000000e+10 : f32
    %202 = vector.broadcast %cst_83 : f32 to vector<8x8xf32>
    %203 = arith.select %142, %201, %202 : vector<8x8xi1>, vector<8x8xf32>
    %cst_84 = arith.constant dense<0xFF800000> : vector<8xf32>
    %204 = vector.multi_reduction <maximumf>, %203, %cst_84 [1] : vector<8x8xf32> to vector<8xf32>
    %205 = vector.shape_cast %204 : vector<8xf32> to vector<8x1xf32>
    %206 = vector.broadcast %205 : vector<8x1xf32> to vector<8x8xf32>
    %207 = arith.subf %203, %206 : vector<8x8xf32>
    %208 = math.exp %207 : vector<8x8xf32>
    %cst_85 = arith.constant dense<0.000000e+00> : vector<8xf32>
    %209 = vector.multi_reduction <add>, %208, %cst_85 [1] : vector<8x8xf32> to vector<8xf32>
    %210 = vector.shape_cast %209 : vector<8xf32> to vector<8x1xf32>
    %211 = vector.broadcast %210 : vector<8x1xf32> to vector<8x8xf32>
    %212 = arith.divf %208, %211 : vector<8x8xf32>
    %213 = vector.extract_strided_slice %138 {offsets = [0, 24], sizes = [8, 8], strides = [1, 1]} : vector<8x32xf32> to vector<8x8xf32>
    %cst_86 = arith.constant dense<0.000000e+00> : vector<8x8xf32>
    %214 = tpu.matmul %212, %213, %cst_86 {dimension_numbers = #tpu.dot_dimension_numbers<[1], [0], [0], [1], [0, 0, 1, 1], [], []>} : vector<8x8xf32>, vector<8x8xf32>, vector<8x8xf32> -> vector<8x8xf32>
    %215 = tpu.concatenate %160, %178, %196, %214 in 1 : vector<8x8xf32>, vector<8x8xf32>, vector<8x8xf32>, vector<8x8xf32> -> vector<8x32xf32>
    %c0_87 = arith.constant 0 : index
    %c0_88 = arith.constant 0 : index
    %216 = vector.load %arg13[%c0_87, %c0_88] : memref<32x32xf32, #tpu.memory_space<vmem>>, vector<32x32xf32>
    %cst_89 = arith.constant dense<0.000000e+00> : vector<8x32xf32>
    %217 = tpu.matmul %215, %216, %cst_89 {dimension_numbers = #tpu.dot_dimension_numbers<[1], [0], [0], [1], [0, 0, 1, 1], [], []>} : vector<8x32xf32>, vector<32x32xf32>, vector<8x32xf32> -> vector<8x32xf32>
    %c0_90 = arith.constant 0 : index
    %c0_91 = arith.constant 0 : index
    %218 = vector.load %arg14[%c0_90, %c0_91] : memref<1x32xf32, #tpu.memory_space<vmem>>, vector<1x32xf32>
    %219 = vector.broadcast %218 : vector<1x32xf32> to vector<8x32xf32>
    %220 = arith.addf %217, %219 : vector<8x32xf32>
    %221 = arith.addf %126, %220 : vector<8x32xf32>
    %222 = vector.extract_strided_slice %8 {offsets = [2, 0], sizes = [1, 32], strides = [1, 1]} : vector<6x32xf32> to vector<1x32xf32>
    %223 = vector.extract_strided_slice %8 {offsets = [3, 0], sizes = [1, 32], strides = [1, 1]} : vector<6x32xf32> to vector<1x32xf32>
    %cst_92 = arith.constant dense<0.000000e+00> : vector<8xf32>
    %224 = vector.multi_reduction <add>, %221, %cst_92 [1] : vector<8x32xf32> to vector<8xf32>
    %225 = vector.shape_cast %224 : vector<8xf32> to vector<8x1xf32>
    %cst_93 = arith.constant 3.200000e+01 : f32
    %226 = vector.broadcast %cst_93 : f32 to vector<8x1xf32>
    %227 = arith.divf %225, %226 : vector<8x1xf32>
    %228 = vector.broadcast %227 : vector<8x1xf32> to vector<8x32xf32>
    %229 = arith.subf %221, %228 : vector<8x32xf32>
    %230 = arith.mulf %229, %229 : vector<8x32xf32>
    %cst_94 = arith.constant dense<0.000000e+00> : vector<8xf32>
    %231 = vector.multi_reduction <add>, %230, %cst_94 [1] : vector<8x32xf32> to vector<8xf32>
    %232 = vector.shape_cast %231 : vector<8xf32> to vector<8x1xf32>
    %cst_95 = arith.constant 3.200000e+01 : f32
    %233 = vector.broadcast %cst_95 : f32 to vector<8x1xf32>
    %234 = arith.divf %232, %233 : vector<8x1xf32>
    %235 = vector.broadcast %227 : vector<8x1xf32> to vector<8x32xf32>
    %236 = arith.subf %221, %235 : vector<8x32xf32>
    %cst_96 = arith.constant 9.99999974E-6 : f32
    %237 = vector.broadcast %cst_96 : f32 to vector<8x1xf32>
    %238 = arith.addf %234, %237 : vector<8x1xf32>
    %239 = math.rsqrt %238 : vector<8x1xf32>
    %240 = vector.broadcast %239 : vector<8x1xf32> to vector<8x32xf32>
    %241 = arith.mulf %236, %240 : vector<8x32xf32>
    %242 = vector.broadcast %222 : vector<1x32xf32> to vector<8x32xf32>
    %243 = arith.mulf %241, %242 : vector<8x32xf32>
    %244 = vector.broadcast %223 : vector<1x32xf32> to vector<8x32xf32>
    %245 = arith.addf %243, %244 : vector<8x32xf32>
    %c0_97 = arith.constant 0 : index
    %c0_98 = arith.constant 0 : index
    %246 = vector.load %arg16[%c0_97, %c0_98] : memref<32x64xf32, #tpu.memory_space<vmem>>, vector<32x64xf32>
    %cst_99 = arith.constant dense<0.000000e+00> : vector<8x64xf32>
    %247 = tpu.matmul %245, %246, %cst_99 {dimension_numbers = #tpu.dot_dimension_numbers<[1], [0], [0], [1], [0, 0, 1, 1], [], []>} : vector<8x32xf32>, vector<32x64xf32>, vector<8x64xf32> -> vector<8x64xf32>
    %c0_100 = arith.constant 0 : index
    %c0_101 = arith.constant 0 : index
    %248 = vector.load %arg17[%c0_100, %c0_101] : memref<1x64xf32, #tpu.memory_space<vmem>>, vector<1x64xf32>
    %249 = vector.broadcast %248 : vector<1x64xf32> to vector<8x64xf32>
    %250 = arith.addf %247, %249 : vector<8x64xf32>
    %cst_102 = arith.constant 0.000000e+00 : f32
    %251 = vector.broadcast %cst_102 : f32 to vector<8x64xf32>
    %252 = arith.maximumf %250, %251 : vector<8x64xf32>
    %c0_103 = arith.constant 0 : index
    %c0_104 = arith.constant 0 : index
    %253 = vector.load %arg18[%c0_103, %c0_104] : memref<64x32xf32, #tpu.memory_space<vmem>>, vector<64x32xf32>
    %cst_105 = arith.constant dense<0.000000e+00> : vector<8x32xf32>
    %254 = tpu.matmul %252, %253, %cst_105 {dimension_numbers = #tpu.dot_dimension_numbers<[1], [0], [0], [1], [0, 0, 1, 1], [], []>} : vector<8x64xf32>, vector<64x32xf32>, vector<8x32xf32> -> vector<8x32xf32>
    %c0_106 = arith.constant 0 : index
    %c0_107 = arith.constant 0 : index
    %255 = vector.load %arg19[%c0_106, %c0_107] : memref<1x32xf32, #tpu.memory_space<vmem>>, vector<1x32xf32>
    %256 = vector.broadcast %255 : vector<1x32xf32> to vector<8x32xf32>
    %257 = arith.addf %254, %256 : vector<8x32xf32>
    %258 = arith.addf %245, %257 : vector<8x32xf32>
    %259 = vector.extract_strided_slice %8 {offsets = [4, 0], sizes = [1, 32], strides = [1, 1]} : vector<6x32xf32> to vector<1x32xf32>
    %260 = vector.extract_strided_slice %8 {offsets = [5, 0], sizes = [1, 32], strides = [1, 1]} : vector<6x32xf32> to vector<1x32xf32>
    %cst_108 = arith.constant dense<0.000000e+00> : vector<8xf32>
    %261 = vector.multi_reduction <add>, %258, %cst_108 [1] : vector<8x32xf32> to vector<8xf32>
    %262 = vector.shape_cast %261 : vector<8xf32> to vector<8x1xf32>
    %cst_109 = arith.constant 3.200000e+01 : f32
    %263 = vector.broadcast %cst_109 : f32 to vector<8x1xf32>
    %264 = arith.divf %262, %263 : vector<8x1xf32>
    %265 = vector.broadcast %264 : vector<8x1xf32> to vector<8x32xf32>
    %266 = arith.subf %258, %265 : vector<8x32xf32>
    %267 = arith.mulf %266, %266 : vector<8x32xf32>
    %cst_110 = arith.constant dense<0.000000e+00> : vector<8xf32>
    %268 = vector.multi_reduction <add>, %267, %cst_110 [1] : vector<8x32xf32> to vector<8xf32>
    %269 = vector.shape_cast %268 : vector<8xf32> to vector<8x1xf32>
    %cst_111 = arith.constant 3.200000e+01 : f32
    %270 = vector.broadcast %cst_111 : f32 to vector<8x1xf32>
    %271 = arith.divf %269, %270 : vector<8x1xf32>
    %272 = vector.broadcast %264 : vector<8x1xf32> to vector<8x32xf32>
    %273 = arith.subf %258, %272 : vector<8x32xf32>
    %cst_112 = arith.constant 9.99999974E-6 : f32
    %274 = vector.broadcast %cst_112 : f32 to vector<8x1xf32>
    %275 = arith.addf %271, %274 : vector<8x1xf32>
    %276 = math.rsqrt %275 : vector<8x1xf32>
    %277 = vector.broadcast %276 : vector<8x1xf32> to vector<8x32xf32>
    %278 = arith.mulf %273, %277 : vector<8x32xf32>
    %279 = vector.broadcast %259 : vector<1x32xf32> to vector<8x32xf32>
    %280 = arith.mulf %278, %279 : vector<8x32xf32>
    %281 = vector.broadcast %260 : vector<1x32xf32> to vector<8x32xf32>
    %282 = arith.addf %280, %281 : vector<8x32xf32>
    %c0_113 = arith.constant 0 : index
    %c0_114 = arith.constant 0 : index
    %c0_115 = arith.constant 0 : index
    %283 = vector.load %arg20[%c0_113, %c0_114, %c0_115] : memref<1x8x32xf32, #tpu.memory_space<vmem>>, vector<1x8x32xf32>
    %284 = vector.shape_cast %283 : vector<1x8x32xf32> to vector<8x32xf32>
    %285 = vector.shape_cast %282 : vector<8x32xf32> to vector<1x8x32xf32>
    tpu.vector_store %arg20[%c0_113, %c0_114, %c0_115], %285 {strides = array<i32>} : memref<1x8x32xf32, #tpu.memory_space<vmem>>, vector<1x8x32xf32>,
    return
  }
  func.func @transform_0(%arg0: i32) -> (i32, i32, i32) {
    %c0_i32 = arith.constant 0 : i32
    %c0_i32_0 = arith.constant 0 : i32
    %c0_i32_1 = arith.constant 0 : i32
    return %arg0, %c0_i32, %c0_i32_0 : i32, i32, i32
  }
  func.func @transform_1(%arg0: i32) -> (i32, i32, i32) {
    %c0_i32 = arith.constant 0 : i32
    %c0_i32_0 = arith.constant 0 : i32
    %c0_i32_1 = arith.constant 0 : i32
    return %arg0, %c0_i32, %c0_i32_0 : i32, i32, i32
  }
  func.func @transform_2(%arg0: i32) -> (i32, i32, i32) {
    %c0_i32 = arith.constant 0 : i32
    %c0_i32_0 = arith.constant 0 : i32
    %c0_i32_1 = arith.constant 0 : i32
    return %arg0, %c0_i32, %c0_i32_0 : i32, i32, i32
  }
  func.func @transform_3(%arg0: i32) -> (i32, i32, i32) {
    %c0_i32 = arith.constant 0 : i32
    %c0_i32_0 = arith.constant 0 : i32
    %c0_i32_1 = arith.constant 0 : i32
    return %arg0, %c0_i32, %c0_i32_0 : i32, i32, i32
  }
  func.func @transform_4(%arg0: i32) -> (i32, i32) {
    %c0_i32 = arith.constant 0 : i32
    %c0_i32_0 = arith.constant 0 : i32
    %c0_i32_1 = arith.constant 0 : i32
    return %c0_i32, %c0_i32_0 : i32, i32
  }
  func.func @transform_5(%arg0: i32) -> (i32, i32) {
    %c0_i32 = arith.constant 0 : i32
    %c0_i32_0 = arith.constant 0 : i32
    %c0_i32_1 = arith.constant 0 : i32
    return %c0_i32, %c0_i32_0 : i32, i32
  }
  func.func @transform_6(%arg0: i32) -> (i32, i32) {
    %c0_i32 = arith.constant 0 : i32
    %c0_i32_0 = arith.constant 0 : i32
    %c0_i32_1 = arith.constant 0 : i32
    return %c0_i32, %c0_i32_0 : i32, i32
  }
  func.func @transform_7(%arg0: i32) -> (i32, i32) {
    %c0_i32 = arith.constant 0 : i32
    %c0_i32_0 = arith.constant 0 : i32
    %c0_i32_1 = arith.constant 0 : i32
    return %c0_i32, %c0_i32_0 : i32, i32
  }
  func.func @transform_8(%arg0: i32) -> (i32, i32) {
    %c0_i32 = arith.constant 0 : i32
    %c0_i32_0 = arith.constant 0 : i32
    %c0_i32_1 = arith.constant 0 : i32
    return %c0_i32, %c0_i32_0 : i32, i32
  }
  func.func @transform_9(%arg0: i32) -> (i32, i32) {
    %c0_i32 = arith.constant 0 : i32
    %c0_i32_0 = arith.constant 0 : i32
    %c0_i32_1 = arith.constant 0 : i32
    return %c0_i32, %c0_i32_0 : i32, i32
  }
  func.func @transform_10(%arg0: i32) -> (i32, i32) {
    %c0_i32 = arith.constant 0 : i32
    %c0_i32_0 = arith.constant 0 : i32
    %c0_i32_1 = arith.constant 0 : i32
    return %c0_i32, %c0_i32_0 : i32, i32
  }
  func.func @transform_11(%arg0: i32) -> (i32, i32) {
    %c0_i32 = arith.constant 0 : i32
    %c0_i32_0 = arith.constant 0 : i32
    %c0_i32_1 = arith.constant 0 : i32
    return %c0_i32, %c0_i32_0 : i32, i32
  }
  func.func @transform_12(%arg0: i32) -> (i32, i32) {
    %c0_i32 = arith.constant 0 : i32
    %c0_i32_0 = arith.constant 0 : i32
    %c0_i32_1 = arith.constant 0 : i32
    return %c0_i32, %c0_i32_0 : i32, i32
  }
  func.func @transform_13(%arg0: i32) -> (i32, i32) {
    %c0_i32 = arith.constant 0 : i32
    %c0_i32_0 = arith.constant 0 : i32
    %c0_i32_1 = arith.constant 0 : i32
    return %c0_i32, %c0_i32_0 : i32, i32
  }
  func.func @transform_14(%arg0: i32) -> (i32, i32) {
    %c0_i32 = arith.constant 0 : i32
    %c0_i32_0 = arith.constant 0 : i32
    %c0_i32_1 = arith.constant 0 : i32
    return %c0_i32, %c0_i32_0 : i32, i32
  }
  func.func @transform_15(%arg0: i32) -> (i32, i32) {
    %c0_i32 = arith.constant 0 : i32
    %c0_i32_0 = arith.constant 0 : i32
    %c0_i32_1 = arith.constant 0 : i32
    return %c0_i32, %c0_i32_0 : i32, i32
  }
  func.func @transform_16(%arg0: i32) -> (i32, i32) {
    %c0_i32 = arith.constant 0 : i32
    %c0_i32_0 = arith.constant 0 : i32
    %c0_i32_1 = arith.constant 0 : i32
    return %c0_i32, %c0_i32_0 : i32, i32
  }
  func.func @transform_17(%arg0: i32) -> (i32, i32) {
    %c0_i32 = arith.constant 0 : i32
    %c0_i32_0 = arith.constant 0 : i32
    %c0_i32_1 = arith.constant 0 : i32
    return %c0_i32, %c0_i32_0 : i32, i32
  }
  func.func @transform_18(%arg0: i32) -> (i32, i32) {
    %c0_i32 = arith.constant 0 : i32
    %c0_i32_0 = arith.constant 0 : i32
    %c0_i32_1 = arith.constant 0 : i32
    return %c0_i32, %c0_i32_0 : i32, i32
  }
  func.func @transform_19(%arg0: i32) -> (i32, i32, i32) {
    %c0_i32 = arith.constant 0 : i32
    %c0_i32_0 = arith.constant 0 : i32
    %c0_i32_1 = arith.constant 0 : i32
    return %arg0, %c0_i32, %c0_i32_0 : i32, i32, i32
  }
}

module attributes {stable_mosaic.version = 11 : i64} {
  func.func @_decoder_layer_kernel(%arg0: i32, %arg1: memref<1x8x32xf32, #tpu.memory_space<vmem>>, %arg2: memref<1x8x32xf32, #tpu.memory_space<vmem>>, %arg3: memref<1x1x8xf32, #tpu.memory_space<vmem>>, %arg4: memref<1x1x8xf32, #tpu.memory_space<vmem>>, %arg5: memref<32x96xf32, #tpu.memory_space<vmem>>, %arg6: memref<1x96xf32, #tpu.memory_space<vmem>>, %arg7: memref<32x32xf32, #tpu.memory_space<vmem>>, %arg8: memref<1x32xf32, #tpu.memory_space<vmem>>, %arg9: memref<32x32xf32, #tpu.memory_space<vmem>>, %arg10: memref<1x32xf32, #tpu.memory_space<vmem>>, %arg11: memref<32x64xf32, #tpu.memory_space<vmem>>, %arg12: memref<1x64xf32, #tpu.memory_space<vmem>>, %arg13: memref<32x32xf32, #tpu.memory_space<vmem>>, %arg14: memref<1x32xf32, #tpu.memory_space<vmem>>, %arg15: memref<6x32xf32, #tpu.memory_space<vmem>>, %arg16: memref<32x64xf32, #tpu.memory_space<vmem>>, %arg17: memref<1x64xf32, #tpu.memory_space<vmem>>, %arg18: memref<64x32xf32, #tpu.memory_space<vmem>>, %arg19: memref<1x32xf32, #tpu.memory_space<vmem>>, %arg20: memref<32x16xf32, #tpu.memory_space<vmem>>, %arg21: memref<1x16xf32, #tpu.memory_space<vmem>>, %arg22: memref<1x8x16xf32, #tpu.memory_space<vmem>>, %arg23: memref<1x4x8x8xf32, #tpu.memory_space<vmem>>) attributes {dimension_semantics = [#tpu.dimension_semantics<parallel>], iteration_bounds = array<i64: 2>, scalar_prefetch = 0 : i64, scratch_operands = 0 : i64, tpu.core_type = #tpu.core_type<tc>, window_params = [{transform_indices = @transform_0, window_bounds = array<i64: 1, 8, 32>}, {transform_indices = @transform_1, window_bounds = array<i64: 1, 8, 32>}, {transform_indices = @transform_2, window_bounds = array<i64: 1, 1, 8>}, {transform_indices = @transform_3, window_bounds = array<i64: 1, 1, 8>}, {pipeline_mode = #tpu.pipeline_mode<synchronous>, transform_indices = @transform_4, window_bounds = array<i64: 32, 96>}, {pipeline_mode = #tpu.pipeline_mode<synchronous>, transform_indices = @transform_5, window_bounds = array<i64: 1, 96>}, {pipeline_mode = #tpu.pipeline_mode<synchronous>, transform_indices = @transform_6, window_bounds = array<i64: 32, 32>}, {pipeline_mode = #tpu.pipeline_mode<synchronous>, transform_indices = @transform_7, window_bounds = array<i64: 1, 32>}, {pipeline_mode = #tpu.pipeline_mode<synchronous>, transform_indices = @transform_8, window_bounds = array<i64: 32, 32>}, {pipeline_mode = #tpu.pipeline_mode<synchronous>, transform_indices = @transform_9, window_bounds = array<i64: 1, 32>}, {pipeline_mode = #tpu.pipeline_mode<synchronous>, transform_indices = @transform_10, window_bounds = array<i64: 32, 64>}, {pipeline_mode = #tpu.pipeline_mode<synchronous>, transform_indices = @transform_11, window_bounds = array<i64: 1, 64>}, {pipeline_mode = #tpu.pipeline_mode<synchronous>, transform_indices = @transform_12, window_bounds = array<i64: 32, 32>}, {pipeline_mode = #tpu.pipeline_mode<synchronous>, transform_indices = @transform_13, window_bounds = array<i64: 1, 32>}, {pipeline_mode = #tpu.pipeline_mode<synchronous>, transform_indices = @transform_14, window_bounds = array<i64: 6, 32>}, {pipeline_mode = #tpu.pipeline_mode<synchronous>, transform_indices = @transform_15, window_bounds = array<i64: 32, 64>}, {pipeline_mode = #tpu.pipeline_mode<synchronous>, transform_indices = @transform_16, window_bounds = array<i64: 1, 64>}, {pipeline_mode = #tpu.pipeline_mode<synchronous>, transform_indices = @transform_17, window_bounds = array<i64: 64, 32>}, {pipeline_mode = #tpu.pipeline_mode<synchronous>, transform_indices = @transform_18, window_bounds = array<i64: 1, 32>}, {pipeline_mode = #tpu.pipeline_mode<synchronous>, transform_indices = @transform_19, window_bounds = array<i64: 32, 16>}, {pipeline_mode = #tpu.pipeline_mode<synchronous>, transform_indices = @transform_20, window_bounds = array<i64: 1, 16>}, {transform_indices = @transform_21, window_bounds = array<i64: 1, 8, 16>}, {transform_indices = @transform_22, window_bounds = array<i64: 1, 4, 8, 8>}]} {
    %c0 = arith.constant 0 : index
    %c0_0 = arith.constant 0 : index
    %c0_1 = arith.constant 0 : index
    %0 = vector.load %arg1[%c0, %c0_0, %c0_1] : memref<1x8x32xf32, #tpu.memory_space<vmem>>, vector<1x8x32xf32>
    %1 = vector.shape_cast %0 : vector<1x8x32xf32> to vector<8x32xf32>
    %c0_2 = arith.constant 0 : index
    %c0_3 = arith.constant 0 : index
    %c0_4 = arith.constant 0 : index
    %2 = vector.load %arg2[%c0_2, %c0_3, %c0_4] : memref<1x8x32xf32, #tpu.memory_space<vmem>>, vector<1x8x32xf32>
    %3 = vector.shape_cast %2 : vector<1x8x32xf32> to vector<8x32xf32>
    %c0_5 = arith.constant 0 : index
    %c0_6 = arith.constant 0 : index
    %c0_7 = arith.constant 0 : index
    %4 = vector.load %arg3[%c0_5, %c0_6, %c0_7] : memref<1x1x8xf32, #tpu.memory_space<vmem>>, vector<1x1x8xf32>
    %5 = vector.shape_cast %4 : vector<1x1x8xf32> to vector<1x8xf32>
    %c0_8 = arith.constant 0 : index
    %c0_9 = arith.constant 0 : index
    %c0_10 = arith.constant 0 : index
    %6 = vector.load %arg4[%c0_8, %c0_9, %c0_10] : memref<1x1x8xf32, #tpu.memory_space<vmem>>, vector<1x1x8xf32>
    %7 = vector.shape_cast %6 : vector<1x1x8xf32> to vector<1x8xf32>
    %c0_11 = arith.constant 0 : index
    %c0_12 = arith.constant 0 : index
    %8 = vector.load %arg15[%c0_11, %c0_12] : memref<6x32xf32, #tpu.memory_space<vmem>>, vector<6x32xf32>
    %c0_13 = arith.constant 0 : index
    %c0_14 = arith.constant 0 : index
    %9 = vector.load %arg5[%c0_13, %c0_14] : memref<32x96xf32, #tpu.memory_space<vmem>>, vector<32x96xf32>
    %cst = arith.constant dense<0.000000e+00> : vector<8x96xf32>
    %10 = tpu.matmul %1, %9, %cst {dimension_numbers = #tpu.dot_dimension_numbers<[1], [0], [0], [1], [0, 0, 1, 1], [], []>} : vector<8x32xf32>, vector<32x96xf32>, vector<8x96xf32> -> vector<8x96xf32>
    %c0_15 = arith.constant 0 : index
    %c0_16 = arith.constant 0 : index
    %11 = vector.load %arg6[%c0_15, %c0_16] : memref<1x96xf32, #tpu.memory_space<vmem>>, vector<1x96xf32>
    %12 = vector.broadcast %11 : vector<1x96xf32> to vector<8x96xf32>
    %13 = arith.addf %10, %12 : vector<8x96xf32>
    %14 = vector.extract_strided_slice %13 {offsets = [0, 0], sizes = [8, 32], strides = [1, 1]} : vector<8x96xf32> to vector<8x32xf32>
    %15 = vector.extract_strided_slice %13 {offsets = [0, 32], sizes = [8, 32], strides = [1, 1]} : vector<8x96xf32> to vector<8x32xf32>
    %16 = vector.extract_strided_slice %13 {offsets = [0, 64], sizes = [8, 32], strides = [1, 1]} : vector<8x96xf32> to vector<8x32xf32>
    %cst_17 = arith.constant 5.000000e-01 : f32
    %17 = vector.broadcast %cst_17 : f32 to vector<1x8xf32>
    %18 = arith.cmpf ogt, %5, %17 : vector<1x8xf32>
    %19 = tpu.iota {dimensions = array<i32: 0>} : vector<8x8xi32>
    %20 = tpu.iota {dimensions = array<i32: 1>} : vector<8x8xi32>
    %21 = arith.cmpi sle, %20, %19 : vector<8x8xi32>
    %22 = vector.broadcast %18 : vector<1x8xi1> to vector<8x8xi1>
    %23 = arith.andi %22, %21 : vector<8x8xi1>
    %24 = vector.extract_strided_slice %14 {offsets = [0, 0], sizes = [8, 8], strides = [1, 1]} : vector<8x32xf32> to vector<8x8xf32>
    %25 = vector.extract_strided_slice %15 {offsets = [0, 0], sizes = [8, 8], strides = [1, 1]} : vector<8x32xf32> to vector<8x8xf32>
    %cst_18 = arith.constant dense<0.000000e+00> : vector<8x8xf32>
    %26 = tpu.matmul %24, %25, %cst_18 {dimension_numbers = #tpu.dot_dimension_numbers<[1], [1], [0], [0], [0, 0, 1, 0], [], []>} : vector<8x8xf32>, vector<8x8xf32>, vector<8x8xf32> -> vector<8x8xf32>
    %cst_19 = arith.constant 0.353553385 : f32
    %27 = vector.broadcast %cst_19 : f32 to vector<8x8xf32>
    %28 = arith.mulf %26, %27 : vector<8x8xf32>
    %cst_20 = arith.constant -1.000000e+10 : f32
    %29 = vector.broadcast %cst_20 : f32 to vector<8x8xf32>
    %30 = arith.select %23, %28, %29 : vector<8x8xi1>, vector<8x8xf32>
    %cst_21 = arith.constant dense<0xFF800000> : vector<8xf32>
    %31 = vector.multi_reduction <maximumf>, %30, %cst_21 [1] : vector<8x8xf32> to vector<8xf32>
    %32 = vector.shape_cast %31 : vector<8xf32> to vector<8x1xf32>
    %33 = vector.broadcast %32 : vector<8x1xf32> to vector<8x8xf32>
    %34 = arith.subf %30, %33 : vector<8x8xf32>
    %35 = math.exp %34 : vector<8x8xf32>
    %cst_22 = arith.constant dense<0.000000e+00> : vector<8xf32>
    %36 = vector.multi_reduction <add>, %35, %cst_22 [1] : vector<8x8xf32> to vector<8xf32>
    %37 = vector.shape_cast %36 : vector<8xf32> to vector<8x1xf32>
    %38 = vector.broadcast %37 : vector<8x1xf32> to vector<8x8xf32>
    %39 = arith.divf %35, %38 : vector<8x8xf32>
    %40 = vector.extract_strided_slice %16 {offsets = [0, 0], sizes = [8, 8], strides = [1, 1]} : vector<8x32xf32> to vector<8x8xf32>
    %cst_23 = arith.constant dense<0.000000e+00> : vector<8x8xf32>
    %41 = tpu.matmul %39, %40, %cst_23 {dimension_numbers = #tpu.dot_dimension_numbers<[1], [0], [0], [1], [0, 0, 1, 1], [], []>} : vector<8x8xf32>, vector<8x8xf32>, vector<8x8xf32> -> vector<8x8xf32>
    %42 = vector.extract_strided_slice %14 {offsets = [0, 8], sizes = [8, 8], strides = [1, 1]} : vector<8x32xf32> to vector<8x8xf32>
    %43 = vector.extract_strided_slice %15 {offsets = [0, 8], sizes = [8, 8], strides = [1, 1]} : vector<8x32xf32> to vector<8x8xf32>
    %cst_24 = arith.constant dense<0.000000e+00> : vector<8x8xf32>
    %44 = tpu.matmul %42, %43, %cst_24 {dimension_numbers = #tpu.dot_dimension_numbers<[1], [1], [0], [0], [0, 0, 1, 0], [], []>} : vector<8x8xf32>, vector<8x8xf32>, vector<8x8xf32> -> vector<8x8xf32>
    %cst_25 = arith.constant 0.353553385 : f32
    %45 = vector.broadcast %cst_25 : f32 to vector<8x8xf32>
    %46 = arith.mulf %44, %45 : vector<8x8xf32>
    %cst_26 = arith.constant -1.000000e+10 : f32
    %47 = vector.broadcast %cst_26 : f32 to vector<8x8xf32>
    %48 = arith.select %23, %46, %47 : vector<8x8xi1>, vector<8x8xf32>
    %cst_27 = arith.constant dense<0xFF800000> : vector<8xf32>
    %49 = vector.multi_reduction <maximumf>, %48, %cst_27 [1] : vector<8x8xf32> to vector<8xf32>
    %50 = vector.shape_cast %49 : vector<8xf32> to vector<8x1xf32>
    %51 = vector.broadcast %50 : vector<8x1xf32> to vector<8x8xf32>
    %52 = arith.subf %48, %51 : vector<8x8xf32>
    %53 = math.exp %52 : vector<8x8xf32>
    %cst_28 = arith.constant dense<0.000000e+00> : vector<8xf32>
    %54 = vector.multi_reduction <add>, %53, %cst_28 [1] : vector<8x8xf32> to vector<8xf32>
    %55 = vector.shape_cast %54 : vector<8xf32> to vector<8x1xf32>
    %56 = vector.broadcast %55 : vector<8x1xf32> to vector<8x8xf32>
    %57 = arith.divf %53, %56 : vector<8x8xf32>
    %58 = vector.extract_strided_slice %16 {offsets = [0, 8], sizes = [8, 8], strides = [1, 1]} : vector<8x32xf32> to vector<8x8xf32>
    %cst_29 = arith.constant dense<0.000000e+00> : vector<8x8xf32>
    %59 = tpu.matmul %57, %58, %cst_29 {dimension_numbers = #tpu.dot_dimension_numbers<[1], [0], [0], [1], [0, 0, 1, 1], [], []>} : vector<8x8xf32>, vector<8x8xf32>, vector<8x8xf32> -> vector<8x8xf32>
    %60 = vector.extract_strided_slice %14 {offsets = [0, 16], sizes = [8, 8], strides = [1, 1]} : vector<8x32xf32> to vector<8x8xf32>
    %61 = vector.extract_strided_slice %15 {offsets = [0, 16], sizes = [8, 8], strides = [1, 1]} : vector<8x32xf32> to vector<8x8xf32>
    %cst_30 = arith.constant dense<0.000000e+00> : vector<8x8xf32>
    %62 = tpu.matmul %60, %61, %cst_30 {dimension_numbers = #tpu.dot_dimension_numbers<[1], [1], [0], [0], [0, 0, 1, 0], [], []>} : vector<8x8xf32>, vector<8x8xf32>, vector<8x8xf32> -> vector<8x8xf32>
    %cst_31 = arith.constant 0.353553385 : f32
    %63 = vector.broadcast %cst_31 : f32 to vector<8x8xf32>
    %64 = arith.mulf %62, %63 : vector<8x8xf32>
    %cst_32 = arith.constant -1.000000e+10 : f32
    %65 = vector.broadcast %cst_32 : f32 to vector<8x8xf32>
    %66 = arith.select %23, %64, %65 : vector<8x8xi1>, vector<8x8xf32>
    %cst_33 = arith.constant dense<0xFF800000> : vector<8xf32>
    %67 = vector.multi_reduction <maximumf>, %66, %cst_33 [1] : vector<8x8xf32> to vector<8xf32>
    %68 = vector.shape_cast %67 : vector<8xf32> to vector<8x1xf32>
    %69 = vector.broadcast %68 : vector<8x1xf32> to vector<8x8xf32>
    %70 = arith.subf %66, %69 : vector<8x8xf32>
    %71 = math.exp %70 : vector<8x8xf32>
    %cst_34 = arith.constant dense<0.000000e+00> : vector<8xf32>
    %72 = vector.multi_reduction <add>, %71, %cst_34 [1] : vector<8x8xf32> to vector<8xf32>
    %73 = vector.shape_cast %72 : vector<8xf32> to vector<8x1xf32>
    %74 = vector.broadcast %73 : vector<8x1xf32> to vector<8x8xf32>
    %75 = arith.divf %71, %74 : vector<8x8xf32>
    %76 = vector.extract_strided_slice %16 {offsets = [0, 16], sizes = [8, 8], strides = [1, 1]} : vector<8x32xf32> to vector<8x8xf32>
    %cst_35 = arith.constant dense<0.000000e+00> : vector<8x8xf32>
    %77 = tpu.matmul %75, %76, %cst_35 {dimension_numbers = #tpu.dot_dimension_numbers<[1], [0], [0], [1], [0, 0, 1, 1], [], []>} : vector<8x8xf32>, vector<8x8xf32>, vector<8x8xf32> -> vector<8x8xf32>
    %78 = vector.extract_strided_slice %14 {offsets = [0, 24], sizes = [8, 8], strides = [1, 1]} : vector<8x32xf32> to vector<8x8xf32>
    %79 = vector.extract_strided_slice %15 {offsets = [0, 24], sizes = [8, 8], strides = [1, 1]} : vector<8x32xf32> to vector<8x8xf32>
    %cst_36 = arith.constant dense<0.000000e+00> : vector<8x8xf32>
    %80 = tpu.matmul %78, %79, %cst_36 {dimension_numbers = #tpu.dot_dimension_numbers<[1], [1], [0], [0], [0, 0, 1, 0], [], []>} : vector<8x8xf32>, vector<8x8xf32>, vector<8x8xf32> -> vector<8x8xf32>
    %cst_37 = arith.constant 0.353553385 : f32
    %81 = vector.broadcast %cst_37 : f32 to vector<8x8xf32>
    %82 = arith.mulf %80, %81 : vector<8x8xf32>
    %cst_38 = arith.constant -1.000000e+10 : f32
    %83 = vector.broadcast %cst_38 : f32 to vector<8x8xf32>
    %84 = arith.select %23, %82, %83 : vector<8x8xi1>, vector<8x8xf32>
    %cst_39 = arith.constant dense<0xFF800000> : vector<8xf32>
    %85 = vector.multi_reduction <maximumf>, %84, %cst_39 [1] : vector<8x8xf32> to vector<8xf32>
    %86 = vector.shape_cast %85 : vector<8xf32> to vector<8x1xf32>
    %87 = vector.broadcast %86 : vector<8x1xf32> to vector<8x8xf32>
    %88 = arith.subf %84, %87 : vector<8x8xf32>
    %89 = math.exp %88 : vector<8x8xf32>
    %cst_40 = arith.constant dense<0.000000e+00> : vector<8xf32>
    %90 = vector.multi_reduction <add>, %89, %cst_40 [1] : vector<8x8xf32> to vector<8xf32>
    %91 = vector.shape_cast %90 : vector<8xf32> to vector<8x1xf32>
    %92 = vector.broadcast %91 : vector<8x1xf32> to vector<8x8xf32>
    %93 = arith.divf %89, %92 : vector<8x8xf32>
    %94 = vector.extract_strided_slice %16 {offsets = [0, 24], sizes = [8, 8], strides = [1, 1]} : vector<8x32xf32> to vector<8x8xf32>
    %cst_41 = arith.constant dense<0.000000e+00> : vector<8x8xf32>
    %95 = tpu.matmul %93, %94, %cst_41 {dimension_numbers = #tpu.dot_dimension_numbers<[1], [0], [0], [1], [0, 0, 1, 1], [], []>} : vector<8x8xf32>, vector<8x8xf32>, vector<8x8xf32> -> vector<8x8xf32>
    %96 = tpu.concatenate %41, %59, %77, %95 in 1 : vector<8x8xf32>, vector<8x8xf32>, vector<8x8xf32>, vector<8x8xf32> -> vector<8x32xf32>
    %c0_42 = arith.constant 0 : index
    %c0_43 = arith.constant 0 : index
    %97 = vector.load %arg7[%c0_42, %c0_43] : memref<32x32xf32, #tpu.memory_space<vmem>>, vector<32x32xf32>
    %cst_44 = arith.constant dense<0.000000e+00> : vector<8x32xf32>
    %98 = tpu.matmul %96, %97, %cst_44 {dimension_numbers = #tpu.dot_dimension_numbers<[1], [0], [0], [1], [0, 0, 1, 1], [], []>} : vector<8x32xf32>, vector<32x32xf32>, vector<8x32xf32> -> vector<8x32xf32>
    %c0_45 = arith.constant 0 : index
    %c0_46 = arith.constant 0 : index
    %99 = vector.load %arg8[%c0_45, %c0_46] : memref<1x32xf32, #tpu.memory_space<vmem>>, vector<1x32xf32>
    %100 = vector.broadcast %99 : vector<1x32xf32> to vector<8x32xf32>
    %101 = arith.addf %98, %100 : vector<8x32xf32>
    %102 = arith.addf %1, %101 : vector<8x32xf32>
    %103 = vector.extract_strided_slice %8 {offsets = [0, 0], sizes = [1, 32], strides = [1, 1]} : vector<6x32xf32> to vector<1x32xf32>
    %104 = vector.extract_strided_slice %8 {offsets = [1, 0], sizes = [1, 32], strides = [1, 1]} : vector<6x32xf32> to vector<1x32xf32>
    %cst_47 = arith.constant dense<0.000000e+00> : vector<8xf32>
    %105 = vector.multi_reduction <add>, %102, %cst_47 [1] : vector<8x32xf32> to vector<8xf32>
    %106 = vector.shape_cast %105 : vector<8xf32> to vector<8x1xf32>
    %cst_48 = arith.constant 3.200000e+01 : f32
    %107 = vector.broadcast %cst_48 : f32 to vector<8x1xf32>
    %108 = arith.divf %106, %107 : vector<8x1xf32>
    %109 = vector.broadcast %108 : vector<8x1xf32> to vector<8x32xf32>
    %110 = arith.subf %102, %109 : vector<8x32xf32>
    %111 = arith.mulf %110, %110 : vector<8x32xf32>
    %cst_49 = arith.constant dense<0.000000e+00> : vector<8xf32>
    %112 = vector.multi_reduction <add>, %111, %cst_49 [1] : vector<8x32xf32> to vector<8xf32>
    %113 = vector.shape_cast %112 : vector<8xf32> to vector<8x1xf32>
    %cst_50 = arith.constant 3.200000e+01 : f32
    %114 = vector.broadcast %cst_50 : f32 to vector<8x1xf32>
    %115 = arith.divf %113, %114 : vector<8x1xf32>
    %116 = vector.broadcast %108 : vector<8x1xf32> to vector<8x32xf32>
    %117 = arith.subf %102, %116 : vector<8x32xf32>
    %cst_51 = arith.constant 9.99999974E-6 : f32
    %118 = vector.broadcast %cst_51 : f32 to vector<8x1xf32>
    %119 = arith.addf %115, %118 : vector<8x1xf32>
    %120 = math.rsqrt %119 : vector<8x1xf32>
    %121 = vector.broadcast %120 : vector<8x1xf32> to vector<8x32xf32>
    %122 = arith.mulf %117, %121 : vector<8x32xf32>
    %123 = vector.broadcast %103 : vector<1x32xf32> to vector<8x32xf32>
    %124 = arith.mulf %122, %123 : vector<8x32xf32>
    %125 = vector.broadcast %104 : vector<1x32xf32> to vector<8x32xf32>
    %126 = arith.addf %124, %125 : vector<8x32xf32>
    %c0_52 = arith.constant 0 : index
    %c0_53 = arith.constant 0 : index
    %127 = vector.load %arg9[%c0_52, %c0_53] : memref<32x32xf32, #tpu.memory_space<vmem>>, vector<32x32xf32>
    %cst_54 = arith.constant dense<0.000000e+00> : vector<8x32xf32>
    %128 = tpu.matmul %126, %127, %cst_54 {dimension_numbers = #tpu.dot_dimension_numbers<[1], [0], [0], [1], [0, 0, 1, 1], [], []>} : vector<8x32xf32>, vector<32x32xf32>, vector<8x32xf32> -> vector<8x32xf32>
    %c0_55 = arith.constant 0 : index
    %c0_56 = arith.constant 0 : index
    %129 = vector.load %arg10[%c0_55, %c0_56] : memref<1x32xf32, #tpu.memory_space<vmem>>, vector<1x32xf32>
    %130 = vector.broadcast %129 : vector<1x32xf32> to vector<8x32xf32>
    %131 = arith.addf %128, %130 : vector<8x32xf32>
    %c0_57 = arith.constant 0 : index
    %c0_58 = arith.constant 0 : index
    %132 = vector.load %arg11[%c0_57, %c0_58] : memref<32x64xf32, #tpu.memory_space<vmem>>, vector<32x64xf32>
    %cst_59 = arith.constant dense<0.000000e+00> : vector<8x64xf32>
    %133 = tpu.matmul %3, %132, %cst_59 {dimension_numbers = #tpu.dot_dimension_numbers<[1], [0], [0], [1], [0, 0, 1, 1], [], []>} : vector<8x32xf32>, vector<32x64xf32>, vector<8x64xf32> -> vector<8x64xf32>
    %c0_60 = arith.constant 0 : index
    %c0_61 = arith.constant 0 : index
    %134 = vector.load %arg12[%c0_60, %c0_61] : memref<1x64xf32, #tpu.memory_space<vmem>>, vector<1x64xf32>
    %135 = vector.broadcast %134 : vector<1x64xf32> to vector<8x64xf32>
    %136 = arith.addf %133, %135 : vector<8x64xf32>
    %137 = vector.extract_strided_slice %136 {offsets = [0, 0], sizes = [8, 32], strides = [1, 1]} : vector<8x64xf32> to vector<8x32xf32>
    %138 = vector.extract_strided_slice %136 {offsets = [0, 32], sizes = [8, 32], strides = [1, 1]} : vector<8x64xf32> to vector<8x32xf32>
    %cst_62 = arith.constant 5.000000e-01 : f32
    %139 = vector.broadcast %cst_62 : f32 to vector<1x8xf32>
    %140 = arith.cmpf ogt, %7, %139 : vector<1x8xf32>
    %141 = vector.shape_cast %140 : vector<1x8xi1> to vector<1x8xi1>
    %142 = vector.broadcast %141 : vector<1x8xi1> to vector<8x8xi1>
    %143 = vector.extract_strided_slice %131 {offsets = [0, 0], sizes = [8, 8], strides = [1, 1]} : vector<8x32xf32> to vector<8x8xf32>
    %144 = vector.extract_strided_slice %137 {offsets = [0, 0], sizes = [8, 8], strides = [1, 1]} : vector<8x32xf32> to vector<8x8xf32>
    %cst_63 = arith.constant dense<0.000000e+00> : vector<8x8xf32>
    %145 = tpu.matmul %143, %144, %cst_63 {dimension_numbers = #tpu.dot_dimension_numbers<[1], [1], [0], [0], [0, 0, 1, 0], [], []>} : vector<8x8xf32>, vector<8x8xf32>, vector<8x8xf32> -> vector<8x8xf32>
    %cst_64 = arith.constant 0.353553385 : f32
    %146 = vector.broadcast %cst_64 : f32 to vector<8x8xf32>
    %147 = arith.mulf %145, %146 : vector<8x8xf32>
    %cst_65 = arith.constant -1.000000e+10 : f32
    %148 = vector.broadcast %cst_65 : f32 to vector<8x8xf32>
    %149 = arith.select %142, %147, %148 : vector<8x8xi1>, vector<8x8xf32>
    %cst_66 = arith.constant dense<0xFF800000> : vector<8xf32>
    %150 = vector.multi_reduction <maximumf>, %149, %cst_66 [1] : vector<8x8xf32> to vector<8xf32>
    %151 = vector.shape_cast %150 : vector<8xf32> to vector<8x1xf32>
    %152 = vector.broadcast %151 : vector<8x1xf32> to vector<8x8xf32>
    %153 = arith.subf %149, %152 : vector<8x8xf32>
    %154 = math.exp %153 : vector<8x8xf32>
    %cst_67 = arith.constant dense<0.000000e+00> : vector<8xf32>
    %155 = vector.multi_reduction <add>, %154, %cst_67 [1] : vector<8x8xf32> to vector<8xf32>
    %156 = vector.shape_cast %155 : vector<8xf32> to vector<8x1xf32>
    %157 = vector.broadcast %156 : vector<8x1xf32> to vector<8x8xf32>
    %158 = arith.divf %154, %157 : vector<8x8xf32>
    %159 = vector.extract_strided_slice %138 {offsets = [0, 0], sizes = [8, 8], strides = [1, 1]} : vector<8x32xf32> to vector<8x8xf32>
    %cst_68 = arith.constant dense<0.000000e+00> : vector<8x8xf32>
    %160 = tpu.matmul %158, %159, %cst_68 {dimension_numbers = #tpu.dot_dimension_numbers<[1], [0], [0], [1], [0, 0, 1, 1], [], []>} : vector<8x8xf32>, vector<8x8xf32>, vector<8x8xf32> -> vector<8x8xf32>
    %161 = vector.extract_strided_slice %131 {offsets = [0, 8], sizes = [8, 8], strides = [1, 1]} : vector<8x32xf32> to vector<8x8xf32>
    %162 = vector.extract_strided_slice %137 {offsets = [0, 8], sizes = [8, 8], strides = [1, 1]} : vector<8x32xf32> to vector<8x8xf32>
    %cst_69 = arith.constant dense<0.000000e+00> : vector<8x8xf32>
    %163 = tpu.matmul %161, %162, %cst_69 {dimension_numbers = #tpu.dot_dimension_numbers<[1], [1], [0], [0], [0, 0, 1, 0], [], []>} : vector<8x8xf32>, vector<8x8xf32>, vector<8x8xf32> -> vector<8x8xf32>
    %cst_70 = arith.constant 0.353553385 : f32
    %164 = vector.broadcast %cst_70 : f32 to vector<8x8xf32>
    %165 = arith.mulf %163, %164 : vector<8x8xf32>
    %cst_71 = arith.constant -1.000000e+10 : f32
    %166 = vector.broadcast %cst_71 : f32 to vector<8x8xf32>
    %167 = arith.select %142, %165, %166 : vector<8x8xi1>, vector<8x8xf32>
    %cst_72 = arith.constant dense<0xFF800000> : vector<8xf32>
    %168 = vector.multi_reduction <maximumf>, %167, %cst_72 [1] : vector<8x8xf32> to vector<8xf32>
    %169 = vector.shape_cast %168 : vector<8xf32> to vector<8x1xf32>
    %170 = vector.broadcast %169 : vector<8x1xf32> to vector<8x8xf32>
    %171 = arith.subf %167, %170 : vector<8x8xf32>
    %172 = math.exp %171 : vector<8x8xf32>
    %cst_73 = arith.constant dense<0.000000e+00> : vector<8xf32>
    %173 = vector.multi_reduction <add>, %172, %cst_73 [1] : vector<8x8xf32> to vector<8xf32>
    %174 = vector.shape_cast %173 : vector<8xf32> to vector<8x1xf32>
    %175 = vector.broadcast %174 : vector<8x1xf32> to vector<8x8xf32>
    %176 = arith.divf %172, %175 : vector<8x8xf32>
    %177 = vector.extract_strided_slice %138 {offsets = [0, 8], sizes = [8, 8], strides = [1, 1]} : vector<8x32xf32> to vector<8x8xf32>
    %cst_74 = arith.constant dense<0.000000e+00> : vector<8x8xf32>
    %178 = tpu.matmul %176, %177, %cst_74 {dimension_numbers = #tpu.dot_dimension_numbers<[1], [0], [0], [1], [0, 0, 1, 1], [], []>} : vector<8x8xf32>, vector<8x8xf32>, vector<8x8xf32> -> vector<8x8xf32>
    %179 = vector.extract_strided_slice %131 {offsets = [0, 16], sizes = [8, 8], strides = [1, 1]} : vector<8x32xf32> to vector<8x8xf32>
    %180 = vector.extract_strided_slice %137 {offsets = [0, 16], sizes = [8, 8], strides = [1, 1]} : vector<8x32xf32> to vector<8x8xf32>
    %cst_75 = arith.constant dense<0.000000e+00> : vector<8x8xf32>
    %181 = tpu.matmul %179, %180, %cst_75 {dimension_numbers = #tpu.dot_dimension_numbers<[1], [1], [0], [0], [0, 0, 1, 0], [], []>} : vector<8x8xf32>, vector<8x8xf32>, vector<8x8xf32> -> vector<8x8xf32>
    %cst_76 = arith.constant 0.353553385 : f32
    %182 = vector.broadcast %cst_76 : f32 to vector<8x8xf32>
    %183 = arith.mulf %181, %182 : vector<8x8xf32>
    %cst_77 = arith.constant -1.000000e+10 : f32
    %184 = vector.broadcast %cst_77 : f32 to vector<8x8xf32>
    %185 = arith.select %142, %183, %184 : vector<8x8xi1>, vector<8x8xf32>
    %cst_78 = arith.constant dense<0xFF800000> : vector<8xf32>
    %186 = vector.multi_reduction <maximumf>, %185, %cst_78 [1] : vector<8x8xf32> to vector<8xf32>
    %187 = vector.shape_cast %186 : vector<8xf32> to vector<8x1xf32>
    %188 = vector.broadcast %187 : vector<8x1xf32> to vector<8x8xf32>
    %189 = arith.subf %185, %188 : vector<8x8xf32>
    %190 = math.exp %189 : vector<8x8xf32>
    %cst_79 = arith.constant dense<0.000000e+00> : vector<8xf32>
    %191 = vector.multi_reduction <add>, %190, %cst_79 [1] : vector<8x8xf32> to vector<8xf32>
    %192 = vector.shape_cast %191 : vector<8xf32> to vector<8x1xf32>
    %193 = vector.broadcast %192 : vector<8x1xf32> to vector<8x8xf32>
    %194 = arith.divf %190, %193 : vector<8x8xf32>
    %195 = vector.extract_strided_slice %138 {offsets = [0, 16], sizes = [8, 8], strides = [1, 1]} : vector<8x32xf32> to vector<8x8xf32>
    %cst_80 = arith.constant dense<0.000000e+00> : vector<8x8xf32>
    %196 = tpu.matmul %194, %195, %cst_80 {dimension_numbers = #tpu.dot_dimension_numbers<[1], [0], [0], [1], [0, 0, 1, 1], [], []>} : vector<8x8xf32>, vector<8x8xf32>, vector<8x8xf32> -> vector<8x8xf32>
    %197 = vector.extract_strided_slice %131 {offsets = [0, 24], sizes = [8, 8], strides = [1, 1]} : vector<8x32xf32> to vector<8x8xf32>
    %198 = vector.extract_strided_slice %137 {offsets = [0, 24], sizes = [8, 8], strides = [1, 1]} : vector<8x32xf32> to vector<8x8xf32>
    %cst_81 = arith.constant dense<0.000000e+00> : vector<8x8xf32>
    %199 = tpu.matmul %197, %198, %cst_81 {dimension_numbers = #tpu.dot_dimension_numbers<[1], [1], [0], [0], [0, 0, 1, 0], [], []>} : vector<8x8xf32>, vector<8x8xf32>, vector<8x8xf32> -> vector<8x8xf32>
    %cst_82 = arith.constant 0.353553385 : f32
    %200 = vector.broadcast %cst_82 : f32 to vector<8x8xf32>
    %201 = arith.mulf %199, %200 : vector<8x8xf32>
    %cst_83 = arith.constant -1.000000e+10 : f32
    %202 = vector.broadcast %cst_83 : f32 to vector<8x8xf32>
    %203 = arith.select %142, %201, %202 : vector<8x8xi1>, vector<8x8xf32>
    %cst_84 = arith.constant dense<0xFF800000> : vector<8xf32>
    %204 = vector.multi_reduction <maximumf>, %203, %cst_84 [1] : vector<8x8xf32> to vector<8xf32>
    %205 = vector.shape_cast %204 : vector<8xf32> to vector<8x1xf32>
    %206 = vector.broadcast %205 : vector<8x1xf32> to vector<8x8xf32>
    %207 = arith.subf %203, %206 : vector<8x8xf32>
    %208 = math.exp %207 : vector<8x8xf32>
    %cst_85 = arith.constant dense<0.000000e+00> : vector<8xf32>
    %209 = vector.multi_reduction <add>, %208, %cst_85 [1] : vector<8x8xf32> to vector<8xf32>
    %210 = vector.shape_cast %209 : vector<8xf32> to vector<8x1xf32>
    %211 = vector.broadcast %210 : vector<8x1xf32> to vector<8x8xf32>
    %212 = arith.divf %208, %211 : vector<8x8xf32>
    %213 = vector.extract_strided_slice %138 {offsets = [0, 24], sizes = [8, 8], strides = [1, 1]} : vector<8x32xf32> to vector<8x8xf32>
    %cst_86 = arith.constant dense<0.000000e+00> : vector<8x8xf32>
    %214 = tpu.matmul %212, %213, %cst_86 {dimension_numbers = #tpu.dot_dimension_numbers<[1], [0], [0], [1], [0, 0, 1, 1], [], []>} : vector<8x8xf32>, vector<8x8xf32>, vector<8x8xf32> -> vector<8x8xf32>
    %215 = tpu.concatenate %160, %178, %196, %214 in 1 : vector<8x8xf32>, vector<8x8xf32>, vector<8x8xf32>, vector<8x8xf32> -> vector<8x32xf32>
    %c0_87 = arith.constant 0 : index
    %c0_88 = arith.constant 0 : index
    %216 = vector.load %arg13[%c0_87, %c0_88] : memref<32x32xf32, #tpu.memory_space<vmem>>, vector<32x32xf32>
    %cst_89 = arith.constant dense<0.000000e+00> : vector<8x32xf32>
    %217 = tpu.matmul %215, %216, %cst_89 {dimension_numbers = #tpu.dot_dimension_numbers<[1], [0], [0], [1], [0, 0, 1, 1], [], []>} : vector<8x32xf32>, vector<32x32xf32>, vector<8x32xf32> -> vector<8x32xf32>
    %c0_90 = arith.constant 0 : index
    %c0_91 = arith.constant 0 : index
    %218 = vector.load %arg14[%c0_90, %c0_91] : memref<1x32xf32, #tpu.memory_space<vmem>>, vector<1x32xf32>
    %219 = vector.broadcast %218 : vector<1x32xf32> to vector<8x32xf32>
    %220 = arith.addf %217, %219 : vector<8x32xf32>
    %221 = arith.addf %126, %220 : vector<8x32xf32>
    %222 = vector.extract_strided_slice %8 {offsets = [2, 0], sizes = [1, 32], strides = [1, 1]} : vector<6x32xf32> to vector<1x32xf32>
    %223 = vector.extract_strided_slice %8 {offsets = [3, 0], sizes = [1, 32], strides = [1, 1]} : vector<6x32xf32> to vector<1x32xf32>
    %cst_92 = arith.constant dense<0.000000e+00> : vector<8xf32>
    %224 = vector.multi_reduction <add>, %221, %cst_92 [1] : vector<8x32xf32> to vector<8xf32>
    %225 = vector.shape_cast %224 : vector<8xf32> to vector<8x1xf32>
    %cst_93 = arith.constant 3.200000e+01 : f32
    %226 = vector.broadcast %cst_93 : f32 to vector<8x1xf32>
    %227 = arith.divf %225, %226 : vector<8x1xf32>
    %228 = vector.broadcast %227 : vector<8x1xf32> to vector<8x32xf32>
    %229 = arith.subf %221, %228 : vector<8x32xf32>
    %230 = arith.mulf %229, %229 : vector<8x32xf32>
    %cst_94 = arith.constant dense<0.000000e+00> : vector<8xf32>
    %231 = vector.multi_reduction <add>, %230, %cst_94 [1] : vector<8x32xf32> to vector<8xf32>
    %232 = vector.shape_cast %231 : vector<8xf32> to vector<8x1xf32>
    %cst_95 = arith.constant 3.200000e+01 : f32
    %233 = vector.broadcast %cst_95 : f32 to vector<8x1xf32>
    %234 = arith.divf %232, %233 : vector<8x1xf32>
    %235 = vector.broadcast %227 : vector<8x1xf32> to vector<8x32xf32>
    %236 = arith.subf %221, %235 : vector<8x32xf32>
    %cst_96 = arith.constant 9.99999974E-6 : f32
    %237 = vector.broadcast %cst_96 : f32 to vector<8x1xf32>
    %238 = arith.addf %234, %237 : vector<8x1xf32>
    %239 = math.rsqrt %238 : vector<8x1xf32>
    %240 = vector.broadcast %239 : vector<8x1xf32> to vector<8x32xf32>
    %241 = arith.mulf %236, %240 : vector<8x32xf32>
    %242 = vector.broadcast %222 : vector<1x32xf32> to vector<8x32xf32>
    %243 = arith.mulf %241, %242 : vector<8x32xf32>
    %244 = vector.broadcast %223 : vector<1x32xf32> to vector<8x32xf32>
    %245 = arith.addf %243, %244 : vector<8x32xf32>
    %c0_97 = arith.constant 0 : index
    %c0_98 = arith.constant 0 : index
    %246 = vector.load %arg16[%c0_97, %c0_98] : memref<32x64xf32, #tpu.memory_space<vmem>>, vector<32x64xf32>
    %cst_99 = arith.constant dense<0.000000e+00> : vector<8x64xf32>
    %247 = tpu.matmul %245, %246, %cst_99 {dimension_numbers = #tpu.dot_dimension_numbers<[1], [0], [0], [1], [0, 0, 1, 1], [], []>} : vector<8x32xf32>, vector<32x64xf32>, vector<8x64xf32> -> vector<8x64xf32>
    %c0_100 = arith.constant 0 : index
    %c0_101 = arith.constant 0 : index
    %248 = vector.load %arg17[%c0_100, %c0_101] : memref<1x64xf32, #tpu.memory_space<vmem>>, vector<1x64xf32>
    %249 = vector.broadcast %248 : vector<1x64xf32> to vector<8x64xf32>
    %250 = arith.addf %247, %249 : vector<8x64xf32>
    %cst_102 = arith.constant 0.000000e+00 : f32
    %251 = vector.broadcast %cst_102 : f32 to vector<8x64xf32>
    %252 = arith.maximumf %250, %251 : vector<8x64xf32>
    %c0_103 = arith.constant 0 : index
    %c0_104 = arith.constant 0 : index
    %253 = vector.load %arg18[%c0_103, %c0_104] : memref<64x32xf32, #tpu.memory_space<vmem>>, vector<64x32xf32>
    %cst_105 = arith.constant dense<0.000000e+00> : vector<8x32xf32>
    %254 = tpu.matmul %252, %253, %cst_105 {dimension_numbers = #tpu.dot_dimension_numbers<[1], [0], [0], [1], [0, 0, 1, 1], [], []>} : vector<8x64xf32>, vector<64x32xf32>, vector<8x32xf32> -> vector<8x32xf32>
    %c0_106 = arith.constant 0 : index
    %c0_107 = arith.constant 0 : index
    %255 = vector.load %arg19[%c0_106, %c0_107] : memref<1x32xf32, #tpu.memory_space<vmem>>, vector<1x32xf32>
    %256 = vector.broadcast %255 : vector<1x32xf32> to vector<8x32xf32>
    %257 = arith.addf %254, %256 : vector<8x32xf32>
    %258 = arith.addf %245, %257 : vector<8x32xf32>
    %259 = vector.extract_strided_slice %8 {offsets = [4, 0], sizes = [1, 32], strides = [1, 1]} : vector<6x32xf32> to vector<1x32xf32>
    %260 = vector.extract_strided_slice %8 {offsets = [5, 0], sizes = [1, 32], strides = [1, 1]} : vector<6x32xf32> to vector<1x32xf32>
    %cst_108 = arith.constant dense<0.000000e+00> : vector<8xf32>
    %261 = vector.multi_reduction <add>, %258, %cst_108 [1] : vector<8x32xf32> to vector<8xf32>
    %262 = vector.shape_cast %261 : vector<8xf32> to vector<8x1xf32>
    %cst_109 = arith.constant 3.200000e+01 : f32
    %263 = vector.broadcast %cst_109 : f32 to vector<8x1xf32>
    %264 = arith.divf %262, %263 : vector<8x1xf32>
    %265 = vector.broadcast %264 : vector<8x1xf32> to vector<8x32xf32>
    %266 = arith.subf %258, %265 : vector<8x32xf32>
    %267 = arith.mulf %266, %266 : vector<8x32xf32>
    %cst_110 = arith.constant dense<0.000000e+00> : vector<8xf32>
    %268 = vector.multi_reduction <add>, %267, %cst_110 [1] : vector<8x32xf32> to vector<8xf32>
    %269 = vector.shape_cast %268 : vector<8xf32> to vector<8x1xf32>
    %cst_111 = arith.constant 3.200000e+01 : f32
    %270 = vector.broadcast %cst_111 : f32 to vector<8x1xf32>
    %271 = arith.divf %269, %270 : vector<8x1xf32>
    %272 = vector.broadcast %264 : vector<8x1xf32> to vector<8x32xf32>
    %273 = arith.subf %258, %272 : vector<8x32xf32>
    %cst_112 = arith.constant 9.99999974E-6 : f32
    %274 = vector.broadcast %cst_112 : f32 to vector<8x1xf32>
    %275 = arith.addf %271, %274 : vector<8x1xf32>
    %276 = math.rsqrt %275 : vector<8x1xf32>
    %277 = vector.broadcast %276 : vector<8x1xf32> to vector<8x32xf32>
    %278 = arith.mulf %273, %277 : vector<8x32xf32>
    %279 = vector.broadcast %259 : vector<1x32xf32> to vector<8x32xf32>
    %280 = arith.mulf %278, %279 : vector<8x32xf32>
    %281 = vector.broadcast %260 : vector<1x32xf32> to vector<8x32xf32>
    %282 = arith.addf %280, %281 : vector<8x32xf32>
    %c0_113 = arith.constant 0 : index
    %c0_114 = arith.constant 0 : index
    %283 = vector.load %arg20[%c0_113, %c0_114] : memref<32x16xf32, #tpu.memory_space<vmem>>, vector<32x16xf32>
    %cst_115 = arith.constant dense<0.000000e+00> : vector<8x16xf32>
    %284 = tpu.matmul %282, %283, %cst_115 {dimension_numbers = #tpu.dot_dimension_numbers<[1], [0], [0], [1], [0, 0, 1, 1], [], []>} : vector<8x32xf32>, vector<32x16xf32>, vector<8x16xf32> -> vector<8x16xf32>
    %c0_116 = arith.constant 0 : index
    %c0_117 = arith.constant 0 : index
    %285 = vector.load %arg21[%c0_116, %c0_117] : memref<1x16xf32, #tpu.memory_space<vmem>>, vector<1x16xf32>
    %286 = vector.broadcast %285 : vector<1x16xf32> to vector<8x16xf32>
    %287 = arith.addf %284, %286 : vector<8x16xf32>
    %c0_118 = arith.constant 0 : index
    %c0_119 = arith.constant 0 : index
    %c0_120 = arith.constant 0 : index
    %288 = vector.load %arg22[%c0_118, %c0_119, %c0_120] : memref<1x8x16xf32, #tpu.memory_space<vmem>>, vector<1x8x16xf32>
    %289 = vector.shape_cast %288 : vector<1x8x16xf32> to vector<8x16xf32>
    %290 = vector.shape_cast %287 : vector<8x16xf32> to vector<1x8x16xf32>
    tpu.vector_store %arg22[%c0_118, %c0_119, %c0_120], %290 {strides = array<i32>} : memref<1x8x16xf32, #tpu.memory_space<vmem>>, vector<1x8x16xf32>,
    %c0_121 = arith.constant 0 : index
    %c0_122 = arith.constant 0 : index
    %c0_123 = arith.constant 0 : index
    %c0_124 = arith.constant 0 : index
    %291 = vector.load %arg23[%c0_121, %c0_122, %c0_123, %c0_124] : memref<1x4x8x8xf32, #tpu.memory_space<vmem>>, vector<1x1x8x8xf32>
    %292 = vector.shape_cast %291 : vector<1x1x8x8xf32> to vector<8x8xf32>
    %293 = vector.shape_cast %158 : vector<8x8xf32> to vector<1x1x8x8xf32>
    tpu.vector_store %arg23[%c0_121, %c0_122, %c0_123, %c0_124], %293 {strides = array<i32>} : memref<1x4x8x8xf32, #tpu.memory_space<vmem>>, vector<1x1x8x8xf32>,
    %c0_125 = arith.constant 0 : index
    %c1 = arith.constant 1 : index
    %c0_126 = arith.constant 0 : index
    %c0_127 = arith.constant 0 : index
    %294 = vector.load %arg23[%c0_125, %c1, %c0_126, %c0_127] : memref<1x4x8x8xf32, #tpu.memory_space<vmem>>, vector<1x1x8x8xf32>
    %295 = vector.shape_cast %294 : vector<1x1x8x8xf32> to vector<8x8xf32>
    %296 = vector.shape_cast %176 : vector<8x8xf32> to vector<1x1x8x8xf32>
    tpu.vector_store %arg23[%c0_125, %c1, %c0_126, %c0_127], %296 {strides = array<i32>} : memref<1x4x8x8xf32, #tpu.memory_space<vmem>>, vector<1x1x8x8xf32>,
    %c0_128 = arith.constant 0 : index
    %c2 = arith.constant 2 : index
    %c0_129 = arith.constant 0 : index
    %c0_130 = arith.constant 0 : index
    %297 = vector.load %arg23[%c0_128, %c2, %c0_129, %c0_130] : memref<1x4x8x8xf32, #tpu.memory_space<vmem>>, vector<1x1x8x8xf32>
    %298 = vector.shape_cast %297 : vector<1x1x8x8xf32> to vector<8x8xf32>
    %299 = vector.shape_cast %194 : vector<8x8xf32> to vector<1x1x8x8xf32>
    tpu.vector_store %arg23[%c0_128, %c2, %c0_129, %c0_130], %299 {strides = array<i32>} : memref<1x4x8x8xf32, #tpu.memory_space<vmem>>, vector<1x1x8x8xf32>,
    %c0_131 = arith.constant 0 : index
    %c3 = arith.constant 3 : index
    %c0_132 = arith.constant 0 : index
    %c0_133 = arith.constant 0 : index
    %300 = vector.load %arg23[%c0_131, %c3, %c0_132, %c0_133] : memref<1x4x8x8xf32, #tpu.memory_space<vmem>>, vector<1x1x8x8xf32>
    %301 = vector.shape_cast %300 : vector<1x1x8x8xf32> to vector<8x8xf32>
    %302 = vector.shape_cast %212 : vector<8x8xf32> to vector<1x1x8x8xf32>
    tpu.vector_store %arg23[%c0_131, %c3, %c0_132, %c0_133], %302 {strides = array<i32>} : memref<1x4x8x8xf32, #tpu.memory_space<vmem>>, vector<1x1x8x8xf32>,
    return
  }
  func.func @transform_0(%arg0: i32) -> (i32, i32, i32) {
    %c0_i32 = arith.constant 0 : i32
    %c0_i32_0 = arith.constant 0 : i32
    %c0_i32_1 = arith.constant 0 : i32
    return %arg0, %c0_i32, %c0_i32_0 : i32, i32, i32
  }
  func.func @transform_1(%arg0: i32) -> (i32, i32, i32) {
    %c0_i32 = arith.constant 0 : i32
    %c0_i32_0 = arith.constant 0 : i32
    %c0_i32_1 = arith.constant 0 : i32
    return %arg0, %c0_i32, %c0_i32_0 : i32, i32, i32
  }
  func.func @transform_2(%arg0: i32) -> (i32, i32, i32) {
    %c0_i32 = arith.constant 0 : i32
    %c0_i32_0 = arith.constant 0 : i32
    %c0_i32_1 = arith.constant 0 : i32
    return %arg0, %c0_i32, %c0_i32_0 : i32, i32, i32
  }
  func.func @transform_3(%arg0: i32) -> (i32, i32, i32) {
    %c0_i32 = arith.constant 0 : i32
    %c0_i32_0 = arith.constant 0 : i32
    %c0_i32_1 = arith.constant 0 : i32
    return %arg0, %c0_i32, %c0_i32_0 : i32, i32, i32
  }
  func.func @transform_4(%arg0: i32) -> (i32, i32) {
    %c0_i32 = arith.constant 0 : i32
    %c0_i32_0 = arith.constant 0 : i32
    %c0_i32_1 = arith.constant 0 : i32
    return %c0_i32, %c0_i32_0 : i32, i32
  }
  func.func @transform_5(%arg0: i32) -> (i32, i32) {
    %c0_i32 = arith.constant 0 : i32
    %c0_i32_0 = arith.constant 0 : i32
    %c0_i32_1 = arith.constant 0 : i32
    return %c0_i32, %c0_i32_0 : i32, i32
  }
  func.func @transform_6(%arg0: i32) -> (i32, i32) {
    %c0_i32 = arith.constant 0 : i32
    %c0_i32_0 = arith.constant 0 : i32
    %c0_i32_1 = arith.constant 0 : i32
    return %c0_i32, %c0_i32_0 : i32, i32
  }
  func.func @transform_7(%arg0: i32) -> (i32, i32) {
    %c0_i32 = arith.constant 0 : i32
    %c0_i32_0 = arith.constant 0 : i32
    %c0_i32_1 = arith.constant 0 : i32
    return %c0_i32, %c0_i32_0 : i32, i32
  }
  func.func @transform_8(%arg0: i32) -> (i32, i32) {
    %c0_i32 = arith.constant 0 : i32
    %c0_i32_0 = arith.constant 0 : i32
    %c0_i32_1 = arith.constant 0 : i32
    return %c0_i32, %c0_i32_0 : i32, i32
  }
  func.func @transform_9(%arg0: i32) -> (i32, i32) {
    %c0_i32 = arith.constant 0 : i32
    %c0_i32_0 = arith.constant 0 : i32
    %c0_i32_1 = arith.constant 0 : i32
    return %c0_i32, %c0_i32_0 : i32, i32
  }
  func.func @transform_10(%arg0: i32) -> (i32, i32) {
    %c0_i32 = arith.constant 0 : i32
    %c0_i32_0 = arith.constant 0 : i32
    %c0_i32_1 = arith.constant 0 : i32
    return %c0_i32, %c0_i32_0 : i32, i32
  }
  func.func @transform_11(%arg0: i32) -> (i32, i32) {
    %c0_i32 = arith.constant 0 : i32
    %c0_i32_0 = arith.constant 0 : i32
    %c0_i32_1 = arith.constant 0 : i32
    return %c0_i32, %c0_i32_0 : i32, i32
  }
  func.func @transform_12(%arg0: i32) -> (i32, i32) {
    %c0_i32 = arith.constant 0 : i32
    %c0_i32_0 = arith.constant 0 : i32
    %c0_i32_1 = arith.constant 0 : i32
    return %c0_i32, %c0_i32_0 : i32, i32
  }
  func.func @transform_13(%arg0: i32) -> (i32, i32) {
    %c0_i32 = arith.constant 0 : i32
    %c0_i32_0 = arith.constant 0 : i32
    %c0_i32_1 = arith.constant 0 : i32
    return %c0_i32, %c0_i32_0 : i32, i32
  }
  func.func @transform_14(%arg0: i32) -> (i32, i32) {
    %c0_i32 = arith.constant 0 : i32
    %c0_i32_0 = arith.constant 0 : i32
    %c0_i32_1 = arith.constant 0 : i32
    return %c0_i32, %c0_i32_0 : i32, i32
  }
  func.func @transform_15(%arg0: i32) -> (i32, i32) {
    %c0_i32 = arith.constant 0 : i32
    %c0_i32_0 = arith.constant 0 : i32
    %c0_i32_1 = arith.constant 0 : i32
    return %c0_i32, %c0_i32_0 : i32, i32
  }
  func.func @transform_16(%arg0: i32) -> (i32, i32) {
    %c0_i32 = arith.constant 0 : i32
    %c0_i32_0 = arith.constant 0 : i32
    %c0_i32_1 = arith.constant 0 : i32
    return %c0_i32, %c0_i32_0 : i32, i32
  }
  func.func @transform_17(%arg0: i32) -> (i32, i32) {
    %c0_i32 = arith.constant 0 : i32
    %c0_i32_0 = arith.constant 0 : i32
    %c0_i32_1 = arith.constant 0 : i32
    return %c0_i32, %c0_i32_0 : i32, i32
  }
  func.func @transform_18(%arg0: i32) -> (i32, i32) {
    %c0_i32 = arith.constant 0 : i32
    %c0_i32_0 = arith.constant 0 : i32
    %c0_i32_1 = arith.constant 0 : i32
    return %c0_i32, %c0_i32_0 : i32, i32
  }
  func.func @transform_19(%arg0: i32) -> (i32, i32) {
    %c0_i32 = arith.constant 0 : i32
    %c0_i32_0 = arith.constant 0 : i32
    %c0_i32_1 = arith.constant 0 : i32
    return %c0_i32, %c0_i32_0 : i32, i32
  }
  func.func @transform_20(%arg0: i32) -> (i32, i32) {
    %c0_i32 = arith.constant 0 : i32
    %c0_i32_0 = arith.constant 0 : i32
    %c0_i32_1 = arith.constant 0 : i32
    return %c0_i32, %c0_i32_0 : i32, i32
  }
  func.func @transform_21(%arg0: i32) -> (i32, i32, i32) {
    %c0_i32 = arith.constant 0 : i32
    %c0_i32_0 = arith.constant 0 : i32
    %c0_i32_1 = arith.constant 0 : i32
    return %arg0, %c0_i32, %c0_i32_0 : i32, i32, i32
  }
  func.func @transform_22(%arg0: i32) -> (i32, i32, i32, i32) {
    %c0_i32 = arith.constant 0 : i32
    %c0_i32_0 = arith.constant 0 : i32
    %c0_i32_1 = arith.constant 0 : i32
    %c0_i32_2 = arith.constant 0 : i32
    return %arg0, %c0_i32, %c0_i32_0, %c0_i32_1 : i32, i32, i32, i32
  }
}

</mosaic_0001>

<bundles_post_ra>
// kernel: seq2seq_forward.6
= control target key start
LH: loop header
LB: loop body
LE: loop exit
PB: predicated region body
PF: predicated region fallthrough
CT: control target
= control target key end

     0   :  { %s2303_s0 = inlined_call_operand.vmem [shape: f32[2,8,32], index: 0, kind: input, shape index: {}]   ;;  %s2304_s1 = inlined_call_operand.vmem [shape: f32[2,8,32], index: 1, kind: input, shape index: {}]   ;;  %s2305_s2 = inlined_call_operand.vmem [shape: f32[2,1,8], index: 2, kind: input, shape index: {}]   ;;  %s2306_s3 = inlined_call_operand.vmem [shape: f32[2,1,8], index: 3, kind: input, shape index: {}]   ;;  %s2307_s4 = inlined_call_operand.vmem [shape: f32[32,96], index: 4, kind: input, shape index: {}]   ;;  %s2308_s5 = inlined_call_operand.vmem [shape: f32[1,96], index: 5, kind: input, shape index: {}]   ;;  %s2309_s6 = inlined_call_operand.vmem [shape: f32[32,32], index: 6, kind: input, shape index: {}]   ;;  %s2310_s7 = inlined_call_operand.vmem [shape: f32[1,32], index: 7, kind: input, shape index: {}]   ;;  %s2311_s8 = inlined_call_operand.vmem [shape: f32[32,32], index: 8, kind: input, shape index: {}]   ;;  %s2312_s9 = inlined_call_operand.vmem [shape: f32[1,32], index: 9, kind: input, shape index: {}]   ;;  %s2313_s10 = inlined_call_operand.vmem [shape: f32[32,64], index: 10, kind: input, shape index: {}]   ;;  %s2314_s11 = inlined_call_operand.vmem [shape: f32[1,64], index: 11, kind: input, shape index: {}]   ;;  %s2315_s12 = inlined_call_operand.vmem [shape: f32[32,32], index: 12, kind: input, shape index: {}]   ;;  %s2316_s13 = inlined_call_operand.vmem [shape: f32[1,32], index: 13, kind: input, shape index: {}]   ;;  %s2317_s14 = inlined_call_operand.vmem [shape: f32[6,32], index: 14, kind: input, shape index: {}]   ;;  %s2318_s15 = inlined_call_operand.vmem [shape: f32[32,64], index: 15, kind: input, shape index: {}]   ;;  %s2319_s16 = inlined_call_operand.vmem [shape: f32[1,64], index: 16, kind: input, shape index: {}]   ;;  %s2320_s17 = inlined_call_operand.vmem [shape: f32[64,32], index: 17, kind: input, shape index: {}]   ;;  %s2321_s18 = inlined_call_operand.vmem [shape: f32[1,32], index: 18, kind: input, shape index: {}]   ;;  %s2322_s19 = inlined_call_operand.vmem [shape: f32[2,8,32], index: 19, kind: output, shape index: {}]  }
   0x1   :  { %2336 = sst [smem:[#allocation2_spill]] %s2303_s0  ;;  %s1964_s0 = smov 0  }
   0x2   :  { %2337 = sst [smem:[#allocation3_spill]] %s2304_s1 }
   0x3   :  { %2338 = sst [smem:[#allocation4_spill]] %s2305_s2 }
   0x4   :  { %2339 = sst [smem:[#allocation5_spill]] %s2306_s3 }
   0x5 LB: > { %s1728_s30 = sadd.s32 4294967295, %s1846_s0   ;;  %p1732_p0 = scmp.ge.s32.totalorder %s1846_s0, 1  ;;  %s1846_s0 = sphi %s1964_s0, %s29_s0  }
   0x6   : > { %p561_p1 = scmp.lt.s32.totalorder %s1846_s0, 3 }
   0x8   : > { %p562_p2 = pnand %p1732_p0, %p561_p1 }
   0x9   : > { %p625_p3 = scmp.lt.s32.totalorder (!%p562_p2), %s1728_s30, 1  ;;  %s2340_s28 = sld [smem:[#allocation2_spill]] (!%p562_p2) }
   0xa   : > { %565 = sbr.rel (%p562_p2) target bundleno = 3191 (0xc77), region = 96  ;;  %s2325_s1 = smov (!%p562_p2), 72  }
   0xb   : > { %s2334_s22 = smov (!%p562_p2), 120   ;;  %s2326_s2 = smov (!%p562_p2), 96  }
   0xc   : > { %s2332_s23 = smov (!%p562_p2), 112   ;;  %s2324_s24 = smov (!%p562_p2), 80  }
   0xd   : > { %s2323_s25 = smov (!%p562_p2), 88   ;;  %s2330_s26 = smov (!%p562_p2), 104  }
   0xe   : > { %s1856_s21 = smov (!%p562_p2), 56   ;;  %s1857_s27 = smov (!%p562_p2), 40  }
   0xf   : > { %v651_v0 = vld [vmem:[%s2307_s4 + $0x18] sm:$0xff]  ;;  %v650_v1 = vld [vmem:[%s2307_s4 + $0x10] sm:$0xff]  ;;  %v649_v2 = vld [vmem:[%s2307_s4 + $0x8] sm:$0xff]  ;;  %s2359_s30 = smov (!%p625_p3, %s1728_s30), 1  ;;  %vm656_vm0 = vcmask 261120   ;;  %vm693_vm1 = vcmask 64512   ;;  %v681_v16 = vlaneseq }
  0x10   : > { %672 = vmatpush.msra.mxu0 %v651_v0  ;;  %v648_v3 = vld [vmem:[%s2307_s4] sm:$0xff]  ;;  %s1987_s3 = sshll.u32 %s2359_s30, 3  ;;  %v1855_v17 = vmov 0  }
  0x11   : > { %s628_s29 = scalar_lea.vmem %s2340_s28, %s1987_s3  ;;  %v1793_v5 = vld [vmem:[%s2308_s5] ss:$0 sm:$0xff]  ;;  %v682_v19 = vshrl.u32 %v681_v16, 7  ;;  %v684_v20 = vand.u32 127, %v681_v16  ;;  %s1858_s28 = smov 64  }
  0x12   : > { %673 = vmatpush.msra.mxu0 %v650_v1  ;;  %v1993_v4 = vld [vmem:[%s628_s29] sm:$0xff]  ;;  %s2341_s29 = sld [smem:[#allocation4_spill]] }
  0x13   : > { %vm685_vm3 = vcmp.le.s32.totalorder %v684_v20, %v682_v19 }
  0x14   : > { %674 = vmatpush.msra.mxu0 %v649_v2 }
  0x16   : > { %675 = vmatpush.msra.mxu0 %v648_v3 }
  0x17   : > { %1736 = vmatmul.msk.f32.vlgmr.msra.gmra.mxu0 %vm656_vm0, %v1993_v4 }
  0x18   : > { %s635_s20 = scalar_lea.vmem %s2341_s29, %s2359_s30  ;;  %s1859_s29 = smov 48  }
  0x19   : > { %v645_v15 = vld [vmem:[%s635_s20] sm:$0x1]  ;;  %s2328_s20 = smov 8  }
  0x1a   : > { %vm680_vm2 = vcmp.gt.f32.partialorder %v645_v15, 0.5 }
  0x1b   : > { %v686_v18 = vsel %vm680_vm2, 1, %v1855_v17 }
  0x1c   : > { %v687_v21 = vperm.slane %v686_v18, 0 }
  0x1e   : > { %vm688_vm4 = vcmp.eq.s32.totalorder %v687_v21, 1 }
  0x1f   : > { %vm2030_vm5 = vmand %vm688_vm4, %vm685_vm3 }
  0x94   : > { %v677_v6 = vpop.f32.mrf.mxu0 }
  0x95   : > { %v2000_v7 = vadd.f32 %v1793_v5, %v677_v6 }
  0x97   : > { %932 = vrot.lane.b32.xlu2 %v2000_v7, %s2325_s1  ;;  %770 = vrot.lane.b32.xlu1 %v2000_v7, %s2334_s22  ;;  %s2345_s1 = smov 120   ;;  %s2347_s22 = smov 104  }
  0x98   : > { %691 = vrot.lane.b32.xlu0 %v2000_v7, %s2326_s2  ;;  %s2346_s2 = smov 112  }
  0x9f   : > { %850 = vrot.lane.b32.xlu2 %v2000_v7, %s2332_s23  ;;  %852 = vrot.lane.b32.xlu1 %v2000_v7, %s2324_s24  ;;  %s2356_s23 = smov 8   ;;  %s642_s24 = scalar_lea.vmem %s2322_s19, %s1987_s3 }
  0xa0   : > { %772 = vrot.lane.b32.xlu0 %v2000_v7, %s2323_s25 }
  0xa8   : > { %930 = vrot.lane.b32.xlu0 %v2000_v7, %s2330_s26 }
  0xf1   : > { %v933_v10 = vpop.permute.xlu2 %932 }
  0xf9   : > { %v851_v13 = vpop.permute.xlu2 %850 }
 0x109   : > { %v771_v8 = vpop.permute.xlu1 %770 }
 0x10a   : > { %v692_v9 = vpop.permute.xlu0 %691 }
 0x10b   : > { %1737 = vmatpush.xpose.msk.msra.mxu1 %vm693_vm1, %v692_v9 }
 0x10e   : > { %1738 = vmatmul.msk.f32.vlgmr.msra.gmra.mxu1 %vm693_vm1, %v2000_v7 }
 0x111   : > { %v853_v11 = vpop.permute.xlu1 %852 }
 0x112   : > { %v773_v12 = vpop.permute.xlu0 %772  ;;  %1743 = vmatpush.xpose.msk.msrb.mxu1 %vm693_vm1, %v853_v11 }
 0x113   : > { %1740 = vmatpush.xpose.msk.msrb.mxu0 %vm693_vm1, %v773_v12 }
 0x116   : > { %1741 = vmatmul.msk.f32.vlgmr.msrb.gmra.mxu0 %vm693_vm1, %v771_v8  ;;  %1744 = vmatmul.msk.f32.vlgmr.msrb.gmra.mxu1 %vm693_vm1, %v851_v13 }
 0x117   : > { %1746 = vmatpush.xpose.msk.msra.mxu0 %vm693_vm1, %v933_v10 }
 0x11a   : > { %v931_v14 = vpop.permute.xlu0 %930 }
 0x11e   : > { %1747 = vmatmul.msk.f32.vlgmr.msra.gmra.mxu0 %vm693_vm1, %v931_v14 }
 0x18b   : > { %v715_v22 = vpop.f32.mrf.mxu1 }
 0x18c   : > { %v718_v24 = vmul.f32 0.35355338, %v715_v22 }
 0x18e   : > { %v719_v25 = vsel %vm2030_vm5, %v718_v24, -1e+10 }
 0x18f   : > { %v720_v26 = vsel %vm693_vm1, %v719_v25, -inf }
 0x190   : > { %721 = vmax.xlane.f32.xlu1 %v720_v26 }
 0x193   : > { %v795_v27 = vpop.f32.mrf.mxu0  ;;  %v875_v28 = vpop.f32.mrf.mxu1 }
 0x194   : > { %v798_v29 = vmul.f32 0.35355338, %v795_v27  ;;  %v878_v30 = vmul.f32 0.35355338, %v875_v28 }
 0x196   : > { %v879_v31 = vsel %vm2030_vm5, %v878_v30, -1e+10  ;;  %v799_v32 = vsel %vm2030_vm5, %v798_v29, -1e+10 }
 0x197   : > { %v880_v33 = vsel %vm693_vm1, %v879_v31, -inf  ;;  %v800_v34 = vsel %vm693_vm1, %v799_v32, -inf }
 0x198   : > { %881 = vmax.xlane.f32.xlu0 %v880_v33  ;;  %801 = vmax.xlane.f32.xlu2 %v800_v34 }
 0x19b   : > { %v955_v35 = vpop.f32.mrf.mxu0 }
 0x19c   : > { %v958_v36 = vmul.f32 0.35355338, %v955_v35 }
 0x19e   : > { %v959_v37 = vsel %vm2030_vm5, %v958_v36, -1e+10 }
 0x19f   : > { %v960_v38 = vsel %vm693_vm1, %v959_v37, -inf }
 0x1a0   : > { %961 = vmax.xlane.f32.xlu2 %v960_v38 }
 0x1ac   : > { %824 = vrot.lane.b32.xlu0 %v2000_v7, %s1856_s21  ;;  %s2327_s21 = smov 24  }
 0x203   : > { %v722_v39 = vpop.xlane.xlu1 %721 }
 0x204   : > { %v723_v40 = vsub.f32 %v719_v25, %v722_v39 }
 0x206   : > { %v724_v41 = vmul.f32 1.442695, %v723_v40 }
 0x208   : > { %1800 = vpow2.f32 %v724_v41 }
 0x20b   : > { %v802_v42 = vpop.xlane.xlu2 %801  ;;  %v882_v43 = vpop.xlane.xlu0 %881 }
 0x20c   : > { %v803_v44 = vsub.f32 %v799_v32, %v802_v42  ;;  %v883_v45 = vsub.f32 %v879_v31, %v882_v43 }
 0x20e   : > { %v1801_v46 = vpop.eup %1800  ;;  %v804_v47 = vmul.f32 1.442695, %v803_v44  ;;  %v884_v48 = vmul.f32 1.442695, %v883_v45 }
 0x20f   : > { %v726_v49 = vsel %vm693_vm1, %v1801_v46, 0.0 }
 0x210   : > { %1802 = vpow2.f32 %v804_v47  ;;  %727 = vadd.xlane.f32.xlu1 %v726_v49 }
 0x211   : > { %1804 = vpow2.f32 %v884_v48 }
 0x213   : > { %v962_v50 = vpop.xlane.xlu2 %961 }
 0x214   : > { %v963_v51 = vsub.f32 %v959_v37, %v962_v50 }
 0x216   : > { %v2048_v52 = vpop.eup %1802  ;;  %v964_v53 = vmul.f32 1.442695, %v963_v51 }
 0x217   : > { %v2050_v54 = vpop.eup %1804  ;;  %v806_v55 = vsel %vm693_vm1, %v2048_v52, 0.0 }
 0x218   : > { %1806 = vpow2.f32 %v964_v53  ;;  %807 = vadd.xlane.f32.xlu2 %v806_v55  ;;  %v886_v56 = vsel %vm693_vm1, %v2050_v54, 0.0  ;;  %v1030_v53 = vld [vmem:[%s2309_s6 + $0x18] sm:$0xff]  ;;  %v1028_v55 = vld [vmem:[%s2309_s6 + $0x8] sm:$0xff] }
 0x219   : > { %887 = vadd.xlane.f32.xlu0 %v886_v56  ;;  %1050 = vmatpush.msra.mxu1 %v1030_v53  ;;  %v1027_v56 = vld [vmem:[%s2309_s6] sm:$0xff] }
 0x21e   : > { %v2056_v57 = vpop.eup %1806  ;;  %v825_v60 = vpop.permute.xlu0 %824 }
 0x21f   : > { %v966_v58 = vsel %vm693_vm1, %v2056_v57, 0.0 }
 0x220   : > { %967 = vadd.xlane.f32.xlu1 %v966_v58 }
 0x22d   : > { %984 = vrot.lane.b32.xlu0 %v2000_v7, %s1857_s27  ;;  %s2329_s27 = smov 16  }
 0x230   : > { %744 = vrot.lane.b32.xlu2 %v2000_v7, %s1858_s28 }
 0x239   : > { %904 = vrot.lane.b32.xlu1 %v2000_v7, %s1859_s29  ;;  %s2352_s29 = smov 72  }
 0x283   : > { %v728_v59 = vpop.xlane.xlu1 %727 }
 0x284   : > { %1808 = vrcp.f32 %v728_v59  ;;  %v740_v3 = vand.u32 2147483648, %v728_v59  ;;  %v738_v5 = vand.u32 2147483647, %v728_v59  ;;  %vm734_vm7 = vweird.f32 %v728_v59 }
 0x286   : > { %v741_v9 = vor.u32 1.1754944e-38, %v740_v3  ;;  %vm739_vm9 = vcmp.eq.f32.partialorder %v738_v5, 8.507059e+37  ;;  %v1863_v5 = vmov 32.0  }
 0x28a   : > { %v1809_v61 = vpop.eup %1808 }
 0x28b   : > { %v730_v62 = vmul.f32 %v1809_v61, %v728_v59  ;;  %v808_v63 = vpop.xlane.xlu2 %807  ;;  %vm735_vm6 = vweird.f32 %v1809_v61 }
 0x28c   : > { %1810 = vrcp.f32 %v808_v63  ;;  %v2063_v0 = vpop.xlane.xlu0 %887  ;;  %vm736_vm8 = vmor %vm734_vm7, %vm735_vm6  ;;  %v820_v18 = vand.u32 2147483648, %v808_v63  ;;  %v818_v21 = vand.u32 2147483647, %v808_v63  ;;  %vm814_vm11 = vweird.f32 %v808_v63 }
 0x28d   : > { %v731_v1 = vsub.f32 1.0, %v730_v62  ;;  %1812 = vrcp.f32 %v2063_v0  ;;  %v900_v38 = vand.u32 2147483648, %v2063_v0  ;;  %vm894_vm4 = vweird.f32 %v2063_v0 }
 0x28e   : > { %v821_v25 = vor.u32 1.1754944e-38, %v820_v18  ;;  %vm819_vm13 = vcmp.eq.f32.partialorder %v818_v21, 8.507059e+37  ;;  %v898_v41 = vand.u32 2147483647, %v2063_v0 }
 0x28f   : > { %v732_v2 = vmul.f32 %v1809_v61, %v731_v1  ;;  %v901_v45 = vor.u32 1.1754944e-38, %v900_v38 }
 0x290   : > { %vm899_vm7 = vcmp.eq.f32.partialorder %v898_v41, 8.507059e+37 }
 0x291   : > { %v733_v6 = vadd.f32 %v1809_v61, %v732_v2 }
 0x292   : > { %v1811_v8 = vpop.eup %1810 }
 0x293   : > { %v1813_v7 = vpop.eup %1812  ;;  %v810_v10 = vmul.f32 %v1811_v8, %v808_v63  ;;  %v968_v11 = vpop.xlane.xlu1 %967  ;;  %v737_v13 = vsel %vm736_vm8, %v1809_v61, %v733_v6  ;;  %vm815_vm10 = vweird.f32 %v1811_v8  ;;  %vm1023_vm8 = vcmask 130048   ;;  %v1794_v63 = vld [vmem:[%s2310_s7] ss:$0 sm:$0xff]  ;;  %v1126_v6 = vld [vmem:[%s2313_s10 + $0x18] sm:$0xff] }
 0x294   : > { %v745_v12 = vpop.permute.xlu2 %744  ;;  %1814 = vrcp.f32 %v968_v11  ;;  %v890_v15 = vmul.f32 %v1813_v7, %v2063_v0  ;;  %v742_v16 = vsel %vm739_vm9, %v741_v9, %v737_v13  ;;  %vm816_vm12 = vmor %vm814_vm11, %vm815_vm10  ;;  %v980_v32 = vand.u32 2147483648, %v968_v11  ;;  %1146 = vmatpush.msrb.mxu0 %v1126_v6  ;;  %v1123_v9 = vld [vmem:[%s2313_s10] sm:$0xff] }
 0x295   : > { %765 = vmatpush.msra.mxu2 %v745_v12  ;;  %v811_v14 = vsub.f32 1.0, %v810_v10  ;;  %v743_v19 = vmul.f32 %v1801_v46, %v742_v16  ;;  %v978_v34 = vand.u32 2147483647, %v968_v11  ;;  %vm974_vm15 = vweird.f32 %v968_v11 }
 0x296   : > { %v891_v23 = vsub.f32 1.0, %v890_v15  ;;  %vm895_vm2 = vweird.f32 %v1813_v7  ;;  %v981_v39 = vor.u32 1.1754944e-38, %v980_v32  ;;  %vm1025_vm9 = vcmask 195584  }
 0x297   : > { %845 = vmatpush.msrb.mxu2 %v825_v60  ;;  %v812_v20 = vmul.f32 %v1811_v8, %v811_v14  ;;  %vm979_vm5 = vcmp.eq.f32.partialorder %v978_v34, 8.507059e+37  ;;  %vm896_vm6 = vmor %vm894_vm4, %vm895_vm2  ;;  %1816 = vrcp.f32 %v1863_v5 }
 0x298   : > { %1739 = vmatmul.msk.f32.vlgmr.msra.gmra.mxu2 %vm693_vm1, %v743_v19  ;;  %v892_v29 = vmul.f32 %v1813_v7, %v891_v23  ;;  %v1094_v23 = vld [vmem:[%s2311_s8 + $0x10] sm:$0xff] }
 0x299   : > { %v813_v22 = vadd.f32 %v1811_v8, %v812_v20 }
 0x29a   : > { %v1815_v24 = vpop.eup %1814  ;;  %v893_v37 = vadd.f32 %v1813_v7, %v892_v29 }
 0x29b   : > { %v970_v26 = vmul.f32 %v1815_v24, %v968_v11  ;;  %v817_v27 = vsel %vm816_vm12, %v1811_v8, %v813_v22  ;;  %vm975_vm14 = vweird.f32 %v1815_v24  ;;  %v1125_v8 = vld [vmem:[%s2313_s10 + $0x10] sm:$0xff]  ;;  %v1095_v22 = vld [vmem:[%s2311_s8 + $0x18] sm:$0xff] }
 0x29c   : > { %v822_v28 = vsel %vm819_vm13, %v821_v25, %v817_v27  ;;  %vm976_vm3 = vmor %vm974_vm15, %vm975_vm14  ;;  %v897_v44 = vsel %vm896_vm6, %v1813_v7, %v893_v37  ;;  %v1124_v7 = vld [vmem:[%s2313_s10 + $0x8] sm:$0xff]  ;;  %1147 = vmatpush.msrb.mxu0 %v1125_v8  ;;  %v1092_v25 = vld [vmem:[%s2311_s8] sm:$0xff] }
 0x29d   : > { %v971_v30 = vsub.f32 1.0, %v970_v26  ;;  %v823_v31 = vmul.f32 %v2048_v52, %v822_v28  ;;  %v902_v46 = vsel %vm899_vm7, %v901_v45, %v897_v44  ;;  %v1795_v26 = vld [vmem:[%s2314_s11] ss:$0 sm:$0xff] }
 0x29e   : > { %v903_v48 = vmul.f32 %v2050_v54, %v902_v46  ;;  %v1029_v54 = vld [vmem:[%s2309_s6 + $0x10] sm:$0xff]  ;;  %1148 = vmatpush.msrb.mxu0 %v1124_v7  ;;  %v2151_v37 = vld [vmem:[%s2317_s14] sm:$0x3f] }
 0x29f   : > { %v972_v33 = vmul.f32 %v1815_v24, %v971_v30  ;;  %v985_v35 = vpop.permute.xlu0 %984  ;;  %1051 = vmatpush.msra.mxu1 %v1029_v54 }
 0x2a0   : > { %1742 = vmatmul.msk.f32.vlgmr.msrb.gmra.mxu2 %vm693_vm1, %v823_v31  ;;  %1149 = vmatpush.msrb.mxu0 %v1123_v9 }
 0x2a1   : > { %v973_v36 = vadd.f32 %v1815_v24, %v972_v33  ;;  %1005 = vmatpush.msra.mxu2 %v985_v35  ;;  %1052 = vmatpush.msra.mxu1 %v1028_v55 }
 0x2a3   : > { %v977_v40 = vsel %vm976_vm3, %v1815_v24, %v973_v36  ;;  %1053 = vmatpush.msra.mxu1 %v1027_v56  ;;  %v1093_v24 = vld [vmem:[%s2311_s8 + $0x8] sm:$0xff] }
 0x2a4   : > { %v982_v42 = vsel %vm979_vm5, %v981_v39, %v977_v40  ;;  %v1088_v39 = vperm.slane %v2151_v37, 0 }
 0x2a5   : > { %v983_v43 = vmul.f32 %v2056_v57, %v982_v42  ;;  %v1090_v42 = vperm.slane %v2151_v37, 1 }
 0x2a8   : > { %1748 = vmatmul.msk.f32.vlgmr.msra.gmra.mxu2 %vm693_vm1, %v983_v43 }
 0x2ab   : > { %v905_v47 = vpop.permute.xlu1 %904 }
 0x2ac   : > { %925 = vmatpush.msra.mxu3 %v905_v47  ;;  %v1796_v47 = vld [vmem:[%s2312_s9] ss:$0 sm:$0xff] }
 0x2ad   : > { %1745 = vmatmul.msk.f32.vlgmr.msra.gmra.mxu3 %vm693_vm1, %v903_v48 }
 0x2ae   : > { %1115 = vmatpush.msrb.mxu3 %v1095_v22 }
 0x2b0   : > { %1116 = vmatpush.msrb.mxu3 %v1094_v23 }
 0x2b2   : > { %1117 = vmatpush.msrb.mxu3 %v1093_v24 }
 0x2b4   : > { %1118 = vmatpush.msrb.mxu3 %v1092_v25 }
 0x31b   : > { %v767_v49 = vpop.f32.mrf.mxu2 }
 0x323   : > { %v847_v50 = vpop.f32.mrf.mxu2 }
 0x324   : > { %1011 = vrot.lane.b32.xlu2 %v847_v50, %s2328_s20 }
 0x32b   : > { %v1007_v51 = vpop.f32.mrf.mxu2 }
 0x32c   : > { %1019 = vrot.lane.b32.xlu0 %v1007_v51, %s2327_s21  ;;  %s2348_s21 = sld [smem:[#allocation5_spill]] }
 0x330   : > { %v927_v52 = vpop.f32.mrf.mxu3 }
 0x331   : > { %1015 = vrot.lane.b32.xlu1 %v927_v52, %s2329_s27  ;;  %s2344_s27 = sld [smem:[#allocation3_spill]] }
 0x332   : > { %s638_s28 = scalar_lea.vmem %s2348_s21, %s2359_s30  ;;  %s2351_s30 = smov 96  }
 0x333   : > { %v646_v52 = vld [vmem:[%s638_s28] sm:$0x1] }
 0x334   : > { %vm1154_vm14 = vcmp.gt.f32.partialorder %v646_v52, 0.5 }
 0x335   : > { %v1155_v55 = vsel %vm1154_vm14, 1, %v1855_v17 }
 0x336   : > { %v1156_v56 = vperm.slane %v1155_v55, 0 }
 0x337   : > { %s632_s26 = scalar_lea.vmem %s2344_s27, %s1987_s3 }
 0x338   : > { %v644_v10 = vld [vmem:[%s632_s26] sm:$0xff]  ;;  %vm2177_vm15 = vcmp.eq.s32.totalorder %v1156_v56, 1  ;;  %s2357_s26 = smov 24  }
 0x339   : > { %1751 = vmatmul.msk.f32.vlgmr.msrb.gmra.mxu0 %vm656_vm0, %v644_v10 }
 0x37e   : > { %v1012_v57 = vpop.permute.xlu2 %1011 }
 0x37f   : > { %v1022_v58 = vsel %vm693_vm1, %v767_v49, %v1012_v57 }
 0x39e   : > { %v1020_v60 = vpop.permute.xlu0 %1019 }
 0x3a3   : > { %v1016_v59 = vpop.permute.xlu1 %1015 }
 0x3a4   : > { %v1024_v61 = vsel %vm1023_vm8, %v1022_v58, %v1016_v59 }
 0x3a5   : > { %v1026_v62 = vsel %vm1025_vm9, %v1024_v61, %v1020_v60 }
 0x3a6   : > { %1749 = vmatmul.msk.f32.vlgmr.msra.gmra.mxu1 %vm656_vm0, %v1026_v62 }
 0x3b6   : > { %v1151_v27 = vpop.f32.mrf.mxu0 }
 0x3b7   : > { %v2137_v28 = vadd.f32 %v1795_v26, %v1151_v27 }
 0x3b9   : > { %1238 = vrot.lane.b32.xlu0 %v2137_v28, %s2345_s1  ;;  %1752 = vmatpush.xpose.msk.msrb.mxu2 %vm693_vm1, %v2137_v28 }
 0x3c1   : > { %1318 = vrot.lane.b32.xlu0 %v2137_v28, %s2346_s2 }
 0x3c9   : > { %1398 = vrot.lane.b32.xlu0 %v2137_v28, %s2347_s22 }
 0x423   : > { %v1055_v0 = vpop.f32.mrf.mxu1 }
 0x424   : > { %v1056_v1 = vadd.f32 %v1794_v63, %v1055_v0 }
 0x426   : > { %v1058_v2 = vadd.f32 %v1056_v1, %v1993_v4  ;;  %v1817_v4 = vpop.eup %1816 }
 0x427   : > { %v1063_v11 = vmul.f32 32.0, %v1817_v4  ;;  %vm1067_vm10 = vweird.f32 %v1817_v4 }
 0x428   : > { %v1059_v3 = vsel %vm656_vm0, %v1058_v2, 0.0 }
 0x429   : > { %1060 = vadd.xlane.f32.xlu2 %v1059_v3  ;;  %v1064_v12 = vsub.f32 1.0, %v1063_v11 }
 0x42b   : > { %v1065_v13 = vmul.f32 %v1817_v4, %v1064_v12  ;;  %v1239_v45 = vpop.permute.xlu0 %1238 }
 0x42c   : > { %1755 = vmatpush.xpose.msk.msra.mxu3 %vm693_vm1, %v1239_v45 }
 0x42d   : > { %v1066_v14 = vadd.f32 %v1817_v4, %v1065_v13 }
 0x42f   : > { %v2118_v15 = vsel %vm1067_vm10, %v1817_v4, %v1066_v14 }
 0x433   : > { %v1319_v46 = vpop.permute.xlu0 %1318 }
 0x434   : > { %1758 = vmatpush.xpose.msk.msra.mxu2 %vm693_vm1, %v1319_v46 }
 0x43b   : > { %v1399_v50 = vpop.permute.xlu0 %1398 }
 0x49c   : > { %v1061_v16 = vpop.xlane.xlu2 %1060 }
 0x49d   : > { %v1069_v18 = vmul.f32 %v2118_v15, %v1061_v16 }
 0x49f   : > { %v1070_v19 = vsub.f32 %v1058_v2, %v1069_v18 }
 0x4a1   : > { %v1071_v20 = vmul.f32 %v1070_v19, %v1070_v19 }
 0x4a3   : > { %v1072_v21 = vsel %vm656_vm0, %v1071_v20, 0.0 }
 0x4a4   : > { %1073 = vadd.xlane.f32.xlu1 %v1072_v21 }
 0x517   : > { %v1074_v29 = vpop.xlane.xlu1 %1073 }
 0x518   : > { %v1075_v30 = vmul.f32 %v1074_v29, %v2118_v15 }
 0x51a   : > { %v1076_v31 = vadd.f32 1e-05, %v1075_v30 }
 0x51c   : > { %1818 = vrsqrt.f32 %v1076_v31  ;;  %vm1083_vm12 = vweird.f32 %v1076_v31 }
 0x522   : > { %v1819_v32 = vpop.eup %1818 }
 0x523   : > { %v1078_v33 = vmul.f32 %v1819_v32, %v1076_v31  ;;  %vm1084_vm11 = vweird.f32 %v1819_v32 }
 0x524   : > { %vm1085_vm13 = vmor %vm1083_vm12, %vm1084_vm11 }
 0x525   : > { %v1079_v34 = vmul.f32 %v1819_v32, %v1078_v33 }
 0x527   : > { %v1080_v35 = vmul.f32 0.5, %v1079_v34 }
 0x529   : > { %v1081_v36 = vsub.f32 1.5, %v1080_v35 }
 0x52b   : > { %v1082_v38 = vmul.f32 %v1819_v32, %v1081_v36 }
 0x52d   : > { %v1086_v40 = vsel %vm1085_vm13, %v1819_v32, %v1082_v38 }
 0x52e   : > { %v1087_v41 = vmul.f32 %v1086_v40, %v1070_v19 }
 0x530   : > { %v1089_v43 = vmul.f32 %v1088_v39, %v1087_v41 }
 0x532   : > { %v2155_v44 = vadd.f32 %v1090_v42, %v1089_v43 }
 0x534   : > { %1750 = vmatmul.msk.f32.vlgmr.msrb.gmra.mxu3 %vm656_vm0, %v2155_v44 }
 0x535   : > { %1761 = vmatpush.xpose.msk.msrb.mxu3 %vm693_vm1, %v1399_v50 }
 0x5b7   : > { %v1120_v48 = vpop.f32.mrf.mxu3 }
 0x5b8   : > { %v1121_v49 = vadd.f32 %v1796_v47, %v1120_v48 }
 0x5ba   : > { %1396 = vrot.lane.b32.xlu2 %v1121_v49, %s2347_s22  ;;  %1236 = vrot.lane.b32.xlu0 %v1121_v49, %s2345_s1  ;;  %s2353_s1 = smov 80   ;;  %s2355_s22 = smov 16  }
 0x5bb   : > { %1753 = vmatmul.msk.f32.vlgmr.msrb.gmra.mxu2 %vm693_vm1, %v1121_v49 }
 0x5c2   : > { %1316 = vrot.lane.b32.xlu0 %v1121_v49, %s2346_s2  ;;  %s2354_s2 = smov 88  }
 0x614   : > { %v1397_v53 = vpop.permute.xlu2 %1396 }
 0x62c   : > { %v1237_v51 = vpop.permute.xlu0 %1236 }
 0x62d   : > { %1756 = vmatmul.msk.f32.vlgmr.msra.gmra.mxu3 %vm693_vm1, %v1237_v51 }
 0x634   : > { %v1317_v54 = vpop.permute.xlu0 %1316 }
 0x635   : > { %1759 = vmatmul.msk.f32.vlgmr.msra.gmra.mxu2 %vm693_vm1, %v1317_v54  ;;  %1762 = vmatmul.msk.f32.vlgmr.msrb.gmra.mxu3 %vm693_vm1, %v1397_v53 }
 0x63e   : > { %v1181_v57 = vpop.f32.mrf.mxu2 }
 0x63f   : > { %v1184_v59 = vmul.f32 0.35355338, %v1181_v57 }
 0x641   : > { %v1185_v60 = vsel %vm2177_vm15, %v1184_v59, -1e+10 }
 0x642   : > { %v1186_v61 = vsel %vm693_vm1, %v1185_v60, -inf }
 0x643   : > { %1187 = vmax.xlane.f32.xlu1 %v1186_v61 }
 0x6b0   : > { %v1261_v62 = vpop.f32.mrf.mxu3 }
 0x6b1   : > { %v1264_v63 = vmul.f32 0.35355338, %v1261_v62 }
 0x6b3   : > { %v1265_v0 = vsel %vm2177_vm15, %v1264_v63, -1e+10 }
 0x6b4   : > { %v1266_v17 = vsel %vm693_vm1, %v1265_v0, -inf }
 0x6b5   : > { %1267 = vmax.xlane.f32.xlu0 %v1266_v17 }
 0x6b6   : > { %v1188_v1 = vpop.xlane.xlu1 %1187 }
 0x6b7   : > { %v1189_v2 = vsub.f32 %v1185_v60, %v1188_v1 }
 0x6b8   : > { %v1341_v3 = vpop.f32.mrf.mxu2  ;;  %v1421_v8 = vpop.f32.mrf.mxu3 }
 0x6b9   : > { %v1190_v5 = vmul.f32 1.442695, %v1189_v2  ;;  %v1344_v6 = vmul.f32 0.35355338, %v1341_v3  ;;  %v1424_v9 = vmul.f32 0.35355338, %v1421_v8 }
 0x6bb   : > { %1820 = vpow2.f32 %v1190_v5  ;;  %v1345_v7 = vsel %vm2177_vm15, %v1344_v6, -1e+10  ;;  %v1425_v11 = vsel %vm2177_vm15, %v1424_v9, -1e+10 }
 0x6bc   : > { %v1346_v4 = vsel %vm693_vm1, %v1345_v7, -inf  ;;  %v1426_v13 = vsel %vm693_vm1, %v1425_v11, -inf }
 0x6bd   : > { %1347 = vmax.xlane.f32.xlu1 %v1346_v4 }
 0x6c1   : > { %v1821_v10 = vpop.eup %1820 }
 0x6c2   : > { %v1192_v12 = vsel %vm693_vm1, %v1821_v10, 0.0 }
 0x6c3   : > { %1193 = vadd.xlane.f32.xlu2 %v1192_v12 }
 0x6c5   : > { %1427 = vmax.xlane.f32.xlu1 %v1426_v13 }
 0x6c9   : > { %1210 = vrot.lane.b32.xlu0 %v2137_v28, %s2351_s30 }
 0x6d1   : > { %1450 = vrot.lane.b32.xlu0 %v2137_v28, %s2352_s29 }
 0x6db   : > { %1370 = vrot.lane.b32.xlu2 %v2137_v28, %s2353_s1 }
 0x728   : > { %v1268_v14 = vpop.xlane.xlu0 %1267 }
 0x729   : > { %v1269_v16 = vsub.f32 %v1265_v0, %v1268_v14 }
 0x72b   : > { %v1270_v18 = vmul.f32 1.442695, %v1269_v16 }
 0x72d   : > { %1822 = vpow2.f32 %v1270_v18 }
 0x730   : > { %v1348_v19 = vpop.xlane.xlu1 %1347 }
 0x731   : > { %v1349_v20 = vsub.f32 %v1345_v7, %v1348_v19 }
 0x733   : > { %v2200_v21 = vpop.eup %1822  ;;  %v1350_v22 = vmul.f32 1.442695, %v1349_v20 }
 0x734   : > { %v1272_v23 = vsel %vm693_vm1, %v2200_v21, 0.0 }
 0x735   : > { %1824 = vpow2.f32 %v1350_v22  ;;  %1273 = vadd.xlane.f32.xlu1 %v1272_v23 }
 0x736   : > { %v1194_v24 = vpop.xlane.xlu2 %1193 }
 0x737   : > { %1826 = vrcp.f32 %v1194_v24  ;;  %v1206_v36 = vand.u32 2147483648, %v1194_v24  ;;  %v1204_v39 = vand.u32 2147483647, %v1194_v24  ;;  %vm1200_vm3 = vweird.f32 %v1194_v24 }
 0x738   : > { %v1428_v25 = vpop.xlane.xlu1 %1427 }
 0x739   : > { %v1429_v26 = vsub.f32 %v1425_v11, %v1428_v25  ;;  %v1207_v43 = vor.u32 1.1754944e-38, %v1206_v36  ;;  %vm1205_vm5 = vcmp.eq.f32.partialorder %v1204_v39, 8.507059e+37 }
 0x73b   : > { %v1825_v27 = vpop.eup %1824  ;;  %v1430_v29 = vmul.f32 1.442695, %v1429_v26  ;;  %v1211_v30 = vpop.permute.xlu0 %1210  ;;  %v1494_v26 = vld [vmem:[%s2315_s12 + $0x18] sm:$0xff] }
 0x73c   : > { %1231 = vmatpush.msrb.mxu1 %v1211_v30  ;;  %v1352_v31 = vsel %vm693_vm1, %v1825_v27, 0.0  ;;  %1514 = vmatpush.msrb.mxu2 %v1494_v26  ;;  %v1491_v30 = vld [vmem:[%s2315_s12] sm:$0xff] }
 0x73d   : > { %v1827_v32 = vpop.eup %1826  ;;  %1828 = vpow2.f32 %v1430_v29  ;;  %1353 = vadd.xlane.f32.xlu1 %v1352_v31  ;;  %v1492_v29 = vld [vmem:[%s2315_s12 + $0x8] sm:$0xff] }
 0x73e   : > { %v1196_v33 = vmul.f32 %v1827_v32, %v1194_v24  ;;  %v1371_v34 = vpop.permute.xlu2 %1370  ;;  %vm1201_vm2 = vweird.f32 %v1827_v32 }
 0x73f   : > { %1391 = vmatpush.msra.mxu1 %v1371_v34  ;;  %vm1202_vm4 = vmor %vm1200_vm3, %vm1201_vm2 }
 0x740   : > { %v1197_v35 = vsub.f32 1.0, %v1196_v33 }
 0x742   : > { %v1198_v38 = vmul.f32 %v1827_v32, %v1197_v35 }
 0x743   : > { %v2205_v40 = vpop.eup %1828  ;;  %v1451_v16 = vpop.permute.xlu0 %1450 }
 0x744   : > { %v1199_v41 = vadd.f32 %v1827_v32, %v1198_v38  ;;  %v1432_v42 = vsel %vm693_vm1, %v2205_v40, 0.0  ;;  %v1797_v38 = vld [vmem:[%s2316_s13] ss:$0 sm:$0xff] }
 0x745   : > { %1433 = vadd.xlane.f32.xlu1 %v1432_v42 }
 0x746   : > { %v1203_v45 = vsel %vm1202_vm4, %v1827_v32, %v1199_v41 }
 0x747   : > { %v1208_v46 = vsel %vm1205_vm5, %v1207_v43, %v1203_v45 }
 0x748   : > { %v1209_v47 = vmul.f32 %v1821_v10, %v1208_v46 }
 0x74a   : > { %1754 = vmatmul.msk.f32.vlgmr.msrb.gmra.mxu1 %vm693_vm1, %v1209_v47 }
 0x75e   : > { %1290 = vrot.lane.b32.xlu1 %v2137_v28, %s2354_s2 }
 0x7a8   : > { %v1274_v48 = vpop.xlane.xlu1 %1273 }
 0x7a9   : > { %1830 = vrcp.f32 %v1274_v48  ;;  %v1286_v5 = vand.u32 2147483648, %v1274_v48  ;;  %vm1280_vm13 = vweird.f32 %v1274_v48  ;;  %v1284_v6 = vand.u32 2147483647, %v1274_v48 }
 0x7ab   : > { %v1287_v4 = vor.u32 1.1754944e-38, %v1286_v5  ;;  %vm1285_vm15 = vcmp.eq.f32.partialorder %v1284_v6, 8.507059e+37 }
 0x7af   : > { %v1831_v50 = vpop.eup %1830 }
 0x7b0   : > { %v1354_v49 = vpop.xlane.xlu1 %1353  ;;  %v1276_v54 = vmul.f32 %v1831_v50, %v1274_v48  ;;  %vm1281_vm12 = vweird.f32 %v1831_v50 }
 0x7b1   : > { %1832 = vrcp.f32 %v1354_v49  ;;  %v1366_v56 = vand.u32 2147483648, %v1354_v49  ;;  %v1364_v58 = vand.u32 2147483647, %v1354_v49  ;;  %vm1360_vm7 = vweird.f32 %v1354_v49  ;;  %vm1282_vm14 = vmor %vm1280_vm13, %vm1281_vm12 }
 0x7b2   : > { %v1277_v59 = vsub.f32 1.0, %v1276_v54  ;;  %v1586_v54 = vld [vmem:[%s2320_s17 + $0x28] sm:$0xff] }
 0x7b3   : > { %v1367_v28 = vor.u32 1.1754944e-38, %v1366_v56  ;;  %vm1365_vm11 = vcmp.eq.f32.partialorder %v1364_v58, 8.507059e+37 }
 0x7b4   : > { %v1278_v0 = vmul.f32 %v1831_v50, %v1277_v59  ;;  %v1584_v59 = vld [vmem:[%s2320_s17 + $0x18] sm:$0xff] }
 0x7b6   : > { %v1279_v2 = vadd.f32 %v1831_v50, %v1278_v0 }
 0x7b7   : > { %v1833_v51 = vpop.eup %1832 }
 0x7b8   : > { %v1356_v52 = vmul.f32 %v1833_v51, %v1354_v49  ;;  %v1434_v53 = vpop.xlane.xlu1 %1433  ;;  %vm1361_vm6 = vweird.f32 %v1833_v51  ;;  %v1283_v8 = vsel %vm1282_vm14, %v1831_v50, %v1279_v2  ;;  %v1552_v49 = vld [vmem:[%s2318_s15 + $0x18] sm:$0xff]  ;;  %v1550_v50 = vld [vmem:[%s2318_s15 + $0x8] sm:$0xff] }
 0x7b9   : > { %1834 = vrcp.f32 %v1434_v53  ;;  %vm1362_vm10 = vmor %vm1360_vm7, %vm1361_vm6  ;;  %v1288_v9 = vsel %vm1285_vm15, %v1287_v4, %v1283_v8  ;;  %v1446_v11 = vand.u32 2147483648, %v1434_v53  ;;  %vm1440_vm3 = vweird.f32 %v1434_v53  ;;  %1572 = vmatpush.msrb.mxu1 %v1552_v49  ;;  %v1583_v8 = vld [vmem:[%s2320_s17 + $0x10] sm:$0xff]  ;;  %v1581_v4 = vld [vmem:[%s2320_s17] sm:$0xff] }
 0x7ba   : > { %v1357_v55 = vsub.f32 1.0, %v1356_v52  ;;  %v1444_v12 = vand.u32 2147483647, %v1434_v53  ;;  %v1289_v14 = vmul.f32 %v2200_v21, %v1288_v9  ;;  %v1588_v52 = vld [vmem:[%s2320_s17 + $0x38] sm:$0xff]  ;;  %v1798_v9 = vld [vmem:[%s2319_s16] ss:$0 sm:$0xff] }
 0x7bb   : > { %v1447_v19 = vor.u32 1.1754944e-38, %v1446_v11  ;;  %1605 = vmatpush.msra.mxu3 %v1588_v52  ;;  %vm1593_vm6 = vcmask 523264  }
 0x7bc   : > { %v1358_v57 = vmul.f32 %v1833_v51, %v1357_v55  ;;  %vm1445_vm5 = vcmp.eq.f32.partialorder %v1444_v12, 8.507059e+37 }
 0x7be   : > { %v1359_v60 = vadd.f32 %v1833_v51, %v1358_v57  ;;  %v1585_v57 = vld [vmem:[%s2320_s17 + $0x20] sm:$0xff] }
 0x7bf   : > { %v1835_v61 = vpop.eup %1834 }
 0x7c0   : > { %v1363_v62 = vsel %vm1362_vm10, %v1833_v51, %v1359_v60  ;;  %v1436_v17 = vmul.f32 %v1835_v61, %v1434_v53  ;;  %vm1441_vm2 = vweird.f32 %v1835_v61  ;;  %v1549_v51 = vld [vmem:[%s2318_s15] sm:$0xff]  ;;  %v1587_v53 = vld [vmem:[%s2320_s17 + $0x30] sm:$0xff] }
 0x7c1   : > { %v1368_v63 = vsel %vm1365_vm11, %v1367_v28, %v1363_v62  ;;  %vm1442_vm4 = vmor %vm1440_vm3, %vm1441_vm2  ;;  %1606 = vmatpush.msra.mxu3 %v1587_v53 }
 0x7c2   : > { %v1369_v1 = vmul.f32 %v1825_v27, %v1368_v63  ;;  %v1437_v3 = vsub.f32 1.0, %v1436_v17  ;;  %v1493_v27 = vld [vmem:[%s2315_s12 + $0x10] sm:$0xff]  ;;  %v1545_v17 = vperm.slane %v2151_v37, 2 }
 0x7c3   : > { %1515 = vmatpush.msrb.mxu2 %v1493_v27  ;;  %1607 = vmatpush.msra.mxu3 %v1586_v54 }
 0x7c4   : > { %1760 = vmatmul.msk.f32.vlgmr.msra.gmra.mxu1 %vm693_vm1, %v1369_v1  ;;  %v1438_v7 = vmul.f32 %v1835_v61, %v1437_v3  ;;  %v1547_v3 = vperm.slane %v2151_v37, 3 }
 0x7c5   : > { %1516 = vmatpush.msrb.mxu2 %v1492_v29  ;;  %1608 = vmatpush.msra.mxu3 %v1585_v57 }
 0x7c6   : > { %v1439_v10 = vadd.f32 %v1835_v61, %v1438_v7  ;;  %v1582_v7 = vld [vmem:[%s2320_s17 + $0x8] sm:$0xff] }
 0x7c7   : > { %v1233_v23 = vpop.f32.mrf.mxu1  ;;  %1517 = vmatpush.msrb.mxu2 %v1491_v30  ;;  %1609 = vmatpush.msra.mxu3 %v1584_v59 }
 0x7c8   : > { %v1443_v18 = vsel %vm1442_vm4, %v1835_v61, %v1439_v10 }
 0x7c9   : > { %v1448_v20 = vsel %vm1445_vm5, %v1447_v19, %v1443_v18  ;;  %1610 = vmatpush.msra.mxu3 %v1583_v8 }
 0x7ca   : > { %v1449_v22 = vmul.f32 %v2205_v40, %v1448_v20 }
 0x7cb   : > { %1611 = vmatpush.msra.mxu3 %v1582_v7 }
 0x7cd   : > { %1612 = vmatpush.msra.mxu3 %v1581_v4 }
 0x7d0   : > { %v1291_v13 = vpop.permute.xlu1 %1290 }
 0x7d1   : > { %1311 = vmatpush.msra.mxu0 %v1291_v13  ;;  %v1799_v13 = vld [vmem:[%s2321_s18] ss:$0 sm:$0xff] }
 0x7d2   : > { %1757 = vmatmul.msk.f32.vlgmr.msra.gmra.mxu0 %vm693_vm1, %v1289_v14 }
 0x7d3   : > { %1471 = vmatpush.msrb.mxu0 %v1451_v16 }
 0x7da   : > { %1763 = vmatmul.msk.f32.vlgmr.msrb.gmra.mxu0 %vm693_vm1, %v1449_v22 }
 0x841   : > { %v1393_v24 = vpop.f32.mrf.mxu1 }
 0x842   : > { %1481 = vrot.lane.b32.xlu1 %v1393_v24, %s2355_s22 }
 0x84f   : > { %v1313_v25 = vpop.f32.mrf.mxu0 }
 0x850   : > { %1477 = vrot.lane.b32.xlu0 %v1313_v25, %s2356_s23 }
 0x857   : > { %v1473_v21 = vpop.f32.mrf.mxu0 }
 0x858   : > { %1485 = vrot.lane.b32.xlu0 %v1473_v21, %s2357_s26 }
 0x8b4   : > { %v1482_v33 = vpop.permute.xlu1 %1481 }
 0x8c2   : > { %v1478_v31 = vpop.permute.xlu0 %1477 }
 0x8c3   : > { %v1488_v32 = vsel %vm693_vm1, %v1233_v23, %v1478_v31 }
 0x8c4   : > { %v1489_v34 = vsel %vm1023_vm8, %v1488_v32, %v1482_v33 }
 0x8ca   : > { %v1486_v35 = vpop.permute.xlu0 %1485 }
 0x8cb   : > { %v1490_v36 = vsel %vm1025_vm9, %v1489_v34, %v1486_v35  ;;  %v1640_v35 = vperm.slane %v2151_v37, 4 }
 0x8cc   : > { %1764 = vmatmul.msk.f32.vlgmr.msrb.gmra.mxu2 %vm656_vm0, %v1490_v36 }
 0x94f   : > { %v1519_v39 = vpop.f32.mrf.mxu2 }
 0x950   : > { %v1520_v40 = vadd.f32 %v1797_v38, %v1519_v39  ;;  %v1642_v38 = vperm.slane %v2151_v37, 5 }
 0x952   : > { %v1522_v41 = vadd.f32 %v1520_v40, %v2155_v44  ;;  %v1551_v44 = vld [vmem:[%s2318_s15 + $0x10] sm:$0xff] }
 0x953   : > { %1573 = vmatpush.msrb.mxu1 %v1551_v44 }
 0x954   : > { %v1523_v42 = vsel %vm656_vm0, %v1522_v41, 0.0 }
 0x955   : > { %1524 = vadd.xlane.f32.xlu1 %v1523_v42  ;;  %1574 = vmatpush.msrb.mxu1 %v1550_v50 }
 0x957   : > { %1575 = vmatpush.msrb.mxu1 %v1549_v51 }
 0x9c8   : > { %v1525_v43 = vpop.xlane.xlu1 %1524 }
 0x9c9   : > { %v1526_v45 = vmul.f32 %v1525_v43, %v2118_v15 }
 0x9cb   : > { %v1527_v46 = vsub.f32 %v1522_v41, %v1526_v45 }
 0x9cd   : > { %v1528_v47 = vmul.f32 %v1527_v46, %v1527_v46 }
 0x9cf   : > { %v1529_v48 = vsel %vm656_vm0, %v1528_v47, 0.0 }
 0x9d0   : > { %1530 = vadd.xlane.f32.xlu2 %v1529_v48 }
 0xa43   : > { %v1531_v55 = vpop.xlane.xlu2 %1530 }
 0xa44   : > { %v1532_v56 = vmul.f32 %v1531_v55, %v2118_v15 }
 0xa46   : > { %v1533_v58 = vadd.f32 1e-05, %v1532_v56 }
 0xa48   : > { %1836 = vrsqrt.f32 %v1533_v58  ;;  %vm1540_vm8 = vweird.f32 %v1533_v58 }
 0xa4e   : > { %v1837_v60 = vpop.eup %1836 }
 0xa4f   : > { %v1535_v61 = vmul.f32 %v1837_v60, %v1533_v58  ;;  %vm1541_vm1 = vweird.f32 %v1837_v60 }
 0xa50   : > { %vm1542_vm9 = vmor %vm1540_vm8, %vm1541_vm1 }
 0xa51   : > { %v1536_v28 = vmul.f32 %v1837_v60, %v1535_v61 }
 0xa53   : > { %v1537_v62 = vmul.f32 0.5, %v1536_v28 }
 0xa55   : > { %v1538_v63 = vsub.f32 1.5, %v1537_v62 }
 0xa57   : > { %v1539_v0 = vmul.f32 %v1837_v60, %v1538_v63 }
 0xa59   : > { %v1543_v1 = vsel %vm1542_vm9, %v1837_v60, %v1539_v0 }
 0xa5a   : > { %v1544_v2 = vmul.f32 %v1543_v1, %v1527_v46 }
 0xa5c   : > { %v1546_v5 = vmul.f32 %v1545_v17, %v1544_v2 }
 0xa5e   : > { %v1548_v6 = vadd.f32 %v1547_v3, %v1546_v5 }
 0xa60   : > { %1765 = vmatmul.msk.f32.vlgmr.msrb.gmra.mxu1 %vm656_vm0, %v1548_v6 }
 0xadd   : > { %v1577_v10 = vpop.f32.mrf.mxu1 }
 0xade   : > { %v1578_v11 = vadd.f32 %v1798_v9, %v1577_v10 }
 0xae0   : > { %v1580_v12 = vmax.f32 %v1578_v11, 0.0 }
 0xae2   : > { %1766 = vmatmul.msk.f32.vlgmr.msra.gmra.mxu3 %vm1593_vm6, %v1580_v12 }
 0xb65   : > { %v1614_v14 = vpop.f32.mrf.mxu3 }
 0xb66   : > { %v1615_v16 = vadd.f32 %v1799_v13, %v1614_v14 }
 0xb68   : > { %v1617_v18 = vadd.f32 %v1615_v16, %v1548_v6 }
 0xb6a   : > { %v1618_v19 = vsel %vm656_vm0, %v1617_v18, 0.0 }
 0xb6b   : > { %1619 = vadd.xlane.f32.xlu0 %v1618_v19 }
 0xbde   : > { %v1620_v20 = vpop.xlane.xlu0 %1619 }
 0xbdf   : > { %v1621_v22 = vmul.f32 %v1620_v20, %v2118_v15 }
 0xbe1   : > { %v1622_v23 = vsub.f32 %v1617_v18, %v1621_v22 }
 0xbe3   : > { %v1623_v24 = vmul.f32 %v1622_v23, %v1622_v23 }
 0xbe5   : > { %v1624_v25 = vsel %vm656_vm0, %v1623_v24, 0.0 }
 0xbe6   : > { %1625 = vadd.xlane.f32.xlu1 %v1624_v25 }
 0xc59   : > { %v1626_v21 = vpop.xlane.xlu1 %1625 }
 0xc5a   : > { %v1627_v26 = vmul.f32 %v1626_v21, %v2118_v15 }
 0xc5c   : > { %v1628_v27 = vadd.f32 1e-05, %v1627_v26 }
 0xc5e   : > { %1838 = vrsqrt.f32 %v1628_v27  ;;  %vm1635_vm10 = vweird.f32 %v1628_v27 }
 0xc64   : > { %v1839_v29 = vpop.eup %1838 }
 0xc65   : > { %v1630_v30 = vmul.f32 %v1839_v29, %v1628_v27  ;;  %vm1636_vm7 = vweird.f32 %v1839_v29 }
 0xc66   : > { %vm1637_vm11 = vmor %vm1635_vm10, %vm1636_vm7 }
 0xc67   : > { %v1631_v31 = vmul.f32 %v1839_v29, %v1630_v30 }
 0xc69   : > { %v1632_v32 = vmul.f32 0.5, %v1631_v31 }
 0xc6b   : > { %v1633_v33 = vsub.f32 1.5, %v1632_v32 }
 0xc6d   : > { %v1634_v34 = vmul.f32 %v1839_v29, %v1633_v33 }
 0xc6f   : > { %v1638_v36 = vsel %vm1637_vm11, %v1839_v29, %v1634_v34 }
 0xc70   : > { %v1639_v39 = vmul.f32 %v1638_v36, %v1622_v23 }
 0xc72   : > { %v1641_v40 = vmul.f32 %v1640_v35, %v1639_v39 }
 0xc74   : > { %v1643_v15 = vadd.f32 %v1642_v38, %v1641_v40 }
 0xc76   : > { %1644 = vst.msk [vmem:[%s642_s24] sm:$0xff] %vm656_vm0, %v1643_v15 }
 0xc77 PF: > { %s29_s0 = sadd.s32 1, %s1846_s0  }
 0xc78   : > { %p26_p4 = scmp.ge.s32.totalorder %s29_s0, 4  }
 0xc7a   :  { %28 = sbr.rel (!%p26_p4) target bundleno = 5 (0x5), region = 135 }

// kernel: seq2seq_forward.7
= control target key start
LH: loop header
LB: loop body
LE: loop exit
PB: predicated region body
PF: predicated region fallthrough
CT: control target
= control target key end

     0   :  { %s3008_s0 = inlined_call_operand.vmem [shape: f32[2,8,32], index: 0, kind: input, shape index: {}]   ;;  %s3009_s1 = inlined_call_operand.vmem [shape: f32[2,8,32], index: 1, kind: input, shape index: {}]   ;;  %s3010_s2 = inlined_call_operand.vmem [shape: f32[2,1,8], index: 2, kind: input, shape index: {}]   ;;  %s3011_s3 = inlined_call_operand.vmem [shape: f32[2,1,8], index: 3, kind: input, shape index: {}]   ;;  %s3012_s4 = inlined_call_operand.vmem [shape: f32[32,96], index: 4, kind: input, shape index: {}]   ;;  %s3013_s5 = inlined_call_operand.vmem [shape: f32[1,96], index: 5, kind: input, shape index: {}]   ;;  %s3014_s6 = inlined_call_operand.vmem [shape: f32[32,32], index: 6, kind: input, shape index: {}]   ;;  %s3015_s7 = inlined_call_operand.vmem [shape: f32[1,32], index: 7, kind: input, shape index: {}]   ;;  %s3016_s8 = inlined_call_operand.vmem [shape: f32[32,32], index: 8, kind: input, shape index: {}]   ;;  %s3017_s9 = inlined_call_operand.vmem [shape: f32[1,32], index: 9, kind: input, shape index: {}]   ;;  %s3018_s10 = inlined_call_operand.vmem [shape: f32[32,64], index: 10, kind: input, shape index: {}]   ;;  %s3019_s11 = inlined_call_operand.vmem [shape: f32[1,64], index: 11, kind: input, shape index: {}]   ;;  %s3020_s12 = inlined_call_operand.vmem [shape: f32[32,32], index: 12, kind: input, shape index: {}]   ;;  %s3021_s13 = inlined_call_operand.vmem [shape: f32[1,32], index: 13, kind: input, shape index: {}]   ;;  %s3022_s14 = inlined_call_operand.vmem [shape: f32[6,32], index: 14, kind: input, shape index: {}]   ;;  %s3023_s15 = inlined_call_operand.vmem [shape: f32[32,64], index: 15, kind: input, shape index: {}]   ;;  %s3024_s16 = inlined_call_operand.hbm [shape: f32[1,64], index: 16, kind: input, shape index: {}]   ;;  %s3025_s17 = inlined_call_operand.vmem [shape: f32[64,32], index: 17, kind: input, shape index: {}]   ;;  %s3026_s18 = inlined_call_operand.hbm [shape: f32[1,32], index: 18, kind: input, shape index: {}]   ;;  %s3027_s19 = inlined_call_operand.vmem [shape: f32[32,16], index: 19, kind: input, shape index: {}]   ;;  %s3028_s20 = inlined_call_operand.hbm [shape: f32[1,16], index: 20, kind: input, shape index: {}]   ;;  %s3029_s21 = inlined_call_operand.hbm [shape: f32[2,8,16], index: 21, kind: output, shape index: {0}]   ;;  %s3030_s22 = inlined_call_operand.hbm [shape: f32[2,4,8,8], index: 22, kind: output, shape index: {1}]  }
   0x1   :  { %3053 = sst [smem:[#allocation21_spill]] %s3008_s0 }
   0x2   :  { %3054 = sst [smem:[#allocation22_spill]] %s3009_s1 }
   0x3   :  { %3055 = sst [smem:[#allocation23_spill]] %s3010_s2 }
   0x4   :  { %3056 = sst [smem:[#allocation24_spill]] %s3011_s3 }
   0x5   :  { %3057 = sst [smem:[#allocation25_spill]] %s3012_s4 }
   0x6   :  { %3058 = sst [smem:[#allocation26_spill]] %s3013_s5 }
   0x7   :  { %3059 = sst [smem:[#allocation27_spill]] %s3014_s6 }
   0x8   :  { %3060 = sst [smem:[#allocation28_spill]] %s3015_s7 }
   0x9   :  { %3061 = sst [smem:[#allocation29_spill]] %s3016_s8 }
   0xa   :  { %3062 = sst [smem:[#allocation30_spill]] %s3017_s9 }
   0xb   :  { %3063 = sst [smem:[#allocation31_spill]] %s3024_s16 }
   0xc   :  { %3064 = sst [smem:[#allocation32_spill]] %s3026_s18 }
   0xd   :  { %3065 = sst [smem:[#allocation33_spill]] %s3028_s20 }
   0xe   :  { %28 = vsyncpa [#allocation3], 0 }
   0xf   :  { %29 = vsyncpa [#allocation6], 0 }
  0x10   :  { %30 = vsyncpa [#allocation4], 0 }
  0x11   :  { %32 = vsyncpa [#allocation4 + $0x1], 0 }
  0x12   :  { %33 = vsyncpa [#allocation10], 0 }
  0x13   :  { %35 = vsyncpa [#allocation10 + $0x1], 0  ;;  %s2536_s3 = smov 0   ;;  %s2538_s28 = smov 0  }
  0x14   :  { %s2540_s29 = smov 0   ;;  %s2542_s30 = smov 0  }
  0x15 LB: > { %3066 = sst [smem:[#allocation15_spill]] %s2387_s3  ;;  %s2557_s4 = sadd.s32 4294967295, %s2399_s30   ;;  %s2399_s30 = sphi %s2542_s30, %s3105_s30   ;;  %s2395_s29 = sphi %s2540_s29, %s3107_s29   ;;  %s2391_s28 = sphi %s2538_s28, %s3109_s28   ;;  %s2387_s3 = sphi %s2536_s3, %s3108_s3  }
  0x16   : > { %3067 = sst [smem:[#allocation16_spill]] %s2395_s29  ;;  %s2010_s0 = sadd.s32 4294967294, %s2399_s30  }
  0x17   : > { %3068 = sst [smem:[#allocation17_spill]] %s2399_s30  ;;  %s2561_s23 = sadd.s32 1, %s2399_s30  }
  0x18   : > { %3069 = sst [smem:[#allocation18_spill]] %s2561_s23  ;;  %s509_s1 = sadd.s32 1, %s2395_s29 }
  0x19   : > { %s506_s5 = ssub.s32 %s2399_s30, %s2561_s23  ;;  %p519_p0 = scmp.ne.s32.totalorder %s2395_s29, %s2391_s28 }
  0x1a   : > { %p507_p1 = scmp.eq.s32.totalorder %s506_s5, 0  ;;  %p520_p2 = scmp.eq.s32.totalorder %s2557_s4, 1 }
  0x1b   : > { %p525_p3 = scmp.ne.s32.totalorder %s2391_s28, %s2387_s3  ;;  %p526_p4 = scmp.eq.s32.totalorder %s2010_s0, 1 }
  0x1c   : > { %s2572_s24 = scalar_select %p507_p1, %s2395_s29, %s509_s1  }
  0x1d   : > { %p2574_p5 = por %p520_p2, %p519_p0  ;;  %p2578_p6 = por %p526_p4, %p525_p3 }
  0x1e   : > { %3070 = sst [smem:[#allocation19_spill]] %s2572_s24  ;;  %p2011_p7 = scmp.ge.s32.totalorder %s2399_s30, 1 }
  0x1f   : > { %s3072_s25 = scalar_select %p2578_p6, 1, 0 }
  0x20   : > { %p559_p8 = scmp.lt.s32.totalorder %s2399_s30, 3  ;;  %p2100_p9 = scmp.eq.s32.totalorder %s2557_s4, 0 }
  0x21   : > { %3073 = sst [smem:[#allocation20_spill]] %s3072_s25  ;;  %s2401_s1 = smov [#allocation5]  }
  0x22   : > { %p2585_p10 = pnand %p2011_p7, %p559_p8  ;;  %s3075_s18 = sld [smem:[#allocation32_spill]] }
  0x23   : > { %s624_s5 = sshll.u32 %s2401_s1, 4  ;;  %s3076_s16 = sld [smem:[#allocation31_spill]]  ;;  %s625_s5 = int_to_ptr.vmem [resolvable:$true] %s624_s5 }
  0x24   : > { %p2083_p11 = pneg %p2585_p10  ;;  %s3077_s20 = sld [smem:[#allocation33_spill]] }
  0x25   : > { %s2402_s2 = smov [#allocation2]  }
  0x26   : > { %p2084_p12 = pnand %p2100_p9, %p2083_p11  ;;  %s609_s27 = sshll.u32 %s2402_s2, 4  ;;  %s610_s27 = int_to_ptr.vmem [resolvable:$true] %s609_s27 }
  0x28   : > { %s622_s0 = sshll.u32 %s3075_s18, 4  ;;  %s2403_s18 = smov [#allocation7]   ;;  %s623_s0 = int_to_ptr.hbm [resolvable:$true] %s622_s0 }
  0x29   : > { %s607_s23 = sshll.u32 %s3076_s16, 4  ;;  %s639_s1 = sshll.u32 %s2403_s18, 4  ;;  %s608_s23 = int_to_ptr.hbm [resolvable:$true] %s607_s23  ;;  %s640_s1 = int_to_ptr.vmem [resolvable:$true] %s639_s1 }
  0x2a   : > { %s637_s30 = sshll.u32 %s3077_s20, 4  ;;  %678 = sbr.rel (%p2585_p10) target bundleno = 3740 (0xe9c), region = 104  ;;  %s638_s30 = int_to_ptr.hbm [resolvable:$true] %s637_s30 }
  0x2b   : > { %2089 = dma.hbm_to_vmem [thread:$0]  (!%p2084_p12), %s623_s0, 16, %s625_s5, [#allocation6]  }
  0x2c   : > { %2086 = dma.hbm_to_vmem [thread:$0]  (!%p2084_p12), %s608_s23, 16, %s610_s27, [#allocation3]  }
  0x2d   : > { %2092 = dma.hbm_to_vmem [thread:$0]  (!%p2084_p12), %s638_s30, 16, %s640_s1, [#allocation6]  }
  0x2f   : > { %2370 = dma.done.wait (%p2100_p9), [#allocation3], 16  }
  0x30   : > { %2372 = vsyncadd (%p2100_p9), [#allocation3], 4294967280 }
  0x31   : > { %2374 = dma.done.wait (%p2100_p9), [#allocation6], 32  }
  0x32   : > { %2376 = vsyncadd (%p2100_p9), [#allocation6], 4294967264  ;;  %p765_p13 = scmp.lt.s32.totalorder %s2557_s4, 1  ;;  %s3078_s23 = sld [smem:[#allocation25_spill]]  ;;  %vm792_vm0 = vcmask 261120   ;;  %vm829_vm1 = vcmask 64512   ;;  %v817_v16 = vlaneseq }
  0x33   : > { %s3079_s27 = sld [smem:[#allocation21_spill]]  ;;  %s3039_s25 = smov 88   ;;  %v2411_v17 = vmov 0  }
  0x34   : > { %s2614_s18 = scalar_select %p765_p13, %s2557_s4, 1  ;;  %v818_v19 = vshrl.u32 %v817_v16, 7  ;;  %v820_v20 = vand.u32 127, %v817_v16 }
  0x35   : > { %s3080_s24 = sld [smem:[#allocation26_spill]]  ;;  %s2405_s16 = smov 64  }
  0x36   : > { %s2022_s3 = sshll.u32 %s2614_s18, 3  ;;  %s3042_s20 = smov 96   ;;  %vm821_vm3 = vcmp.le.s32.totalorder %v820_v20, %v818_v19 }
  0x37   : > { %s3051_s26 = smov 120   ;;  %s3040_s0 = smov 80  }
  0x38   : > { %v787_v0 = vld [vmem:[%s3078_s23 + $0x18] sm:$0xff]  ;;  %v786_v1 = vld [vmem:[%s3078_s23 + $0x10] sm:$0xff]  ;;  %v785_v2 = vld [vmem:[%s3078_s23 + $0x8] sm:$0xff]  ;;  %s3041_s5 = smov 72   ;;  %s3049_s2 = smov 112  }
  0x39   : > { %808 = vmatpush.msra.mxu0 %v787_v0  ;;  %s768_s1 = scalar_lea.vmem %s3079_s27, %s2022_s3  ;;  %v784_v3 = vld [vmem:[%s3078_s23] sm:$0xff]  ;;  %s3081_s29 = sld [smem:[#allocation23_spill]] }
  0x3a   : > { %v2634_v4 = vld [vmem:[%s768_s1] sm:$0xff]  ;;  %s2414_s27 = smov 56   ;;  %s2415_s1 = smov 48  }
  0x3b   : > { %809 = vmatpush.msra.mxu0 %v786_v1  ;;  %v2159_v5 = vld [vmem:[%s3080_s24] ss:$0 sm:$0xff]  ;;  %s3043_s24 = smov 104   ;;  %s3085_s7 = sld [smem:[#allocation28_spill]] }
  0x3c   : > { %s3087_s8 = sld [smem:[#allocation29_spill]] }
  0x3d   : > { %810 = vmatpush.msra.mxu0 %v785_v2  ;;  %s3091_s9 = sld [smem:[#allocation30_spill]] }
  0x3f   : > { %811 = vmatpush.msra.mxu0 %v784_v3  ;;  %s775_s30 = scalar_lea.vmem %s3081_s29, %s2614_s18  ;;  %s3046_s29 = smov 8  }
  0x40   : > { %2024 = vmatmul.msk.f32.vlgmr.msra.gmra.mxu0 %vm792_vm0, %v2634_v4  ;;  %v781_v15 = vld [vmem:[%s775_s30] sm:$0x1]  ;;  %s3045_s30 = smov 16  }
  0x41   : > { %vm816_vm2 = vcmp.gt.f32.partialorder %v781_v15, 0.5 }
  0x42   : > { %v822_v18 = vsel %vm816_vm2, 1, %v2411_v17 }
  0x43   : > { %v823_v21 = vperm.slane %v822_v18, 0 }
  0x45   : > { %vm824_vm4 = vcmp.eq.s32.totalorder %v823_v21, 1 }
  0x46   : > { %vm2670_vm5 = vmand %vm824_vm4, %vm821_vm3 }
  0xbd   : > { %v813_v6 = vpop.f32.mrf.mxu0 }
  0xbe   : > { %v2641_v7 = vadd.f32 %v2159_v5, %v813_v6 }
  0xc0   : > { %908 = vrot.lane.b32.xlu2 %v2641_v7, %s3039_s25  ;;  %880 = vrot.lane.b32.xlu1 %v2641_v7, %s2405_s16  ;;  %s2413_s16 = smov 40   ;;  %s3084_s25 = sld [smem:[#allocation27_spill]] }
  0xc1   : > { %827 = vrot.lane.b32.xlu0 %v2641_v7, %s3042_s20  ;;  %s3086_s20 = sld [smem:[#allocation22_spill]] }
  0xc8   : > { %906 = vrot.lane.b32.xlu2 %v2641_v7, %s3051_s26  ;;  %s3100_s26 = smov 16  }
  0xd0   : > { %988 = vrot.lane.b32.xlu2 %v2641_v7, %s3040_s0  ;;  %s772_s0 = scalar_lea.vmem %s3086_s20, %s2022_s3  ;;  %s3089_s20 = smov 112  }
  0xd1   : > { %s3099_s3 = smov 8  }
  0xd8   : > { %1068 = vrot.lane.b32.xlu2 %v2641_v7, %s3041_s5 }
  0xe0   : > { %986 = vrot.lane.b32.xlu2 %v2641_v7, %s3049_s2  ;;  %s3101_s2 = smov 24  }
 0x11a   : > { %v909_v8 = vpop.permute.xlu2 %908 }
 0x122   : > { %v2656_v9 = vpop.permute.xlu2 %906 }
 0x12a   : > { %v989_v10 = vpop.permute.xlu2 %988 }
 0x132   : > { %v1069_v11 = vpop.permute.xlu2 %1068  ;;  %v881_v12 = vpop.permute.xlu1 %880 }
 0x133   : > { %v828_v13 = vpop.permute.xlu0 %827  ;;  %901 = vmatpush.msra.mxu2 %v881_v12  ;;  %2034 = vmatpush.xpose.msk.msrb.mxu0 %vm829_vm1, %v1069_v11 }
 0x134   : > { %2025 = vmatpush.xpose.msk.msra.mxu1 %vm829_vm1, %v828_v13 }
 0x135   : > { %2028 = vmatpush.xpose.msk.msrb.mxu2 %vm829_vm1, %v909_v8 }
 0x137   : > { %2026 = vmatmul.msk.f32.vlgmr.msra.gmra.mxu1 %vm829_vm1, %v2641_v7 }
 0x138   : > { %2031 = vmatpush.xpose.msk.msrb.mxu1 %vm829_vm1, %v989_v10 }
 0x13a   : > { %v987_v14 = vpop.permute.xlu2 %986 }
 0x13f   : > { %2032 = vmatmul.msk.f32.vlgmr.msrb.gmra.mxu1 %vm829_vm1, %v987_v14 }
 0x1b4   : > { %v851_v22 = vpop.f32.mrf.mxu1 }
 0x1b5   : > { %v854_v24 = vmul.f32 0.35355338, %v851_v22 }
 0x1b7   : > { %v855_v25 = vsel %vm2670_vm5, %v854_v24, -1e+10 }
 0x1b8   : > { %v856_v26 = vsel %vm829_vm1, %v855_v25, -inf }
 0x1b9   : > { %857 = vmax.xlane.f32.xlu0 %v856_v26 }
 0x1bc   : > { %v1011_v32 = vpop.f32.mrf.mxu1 }
 0x1bd   : > { %v1014_v33 = vmul.f32 0.35355338, %v1011_v32 }
 0x1bf   : > { %v1015_v34 = vsel %vm2670_vm5, %v1014_v33, -1e+10 }
 0x1c0   : > { %v1016_v35 = vsel %vm829_vm1, %v1015_v34, -inf }
 0x22c   : > { %v858_v27 = vpop.xlane.xlu0 %857 }
 0x22d   : > { %v859_v28 = vsub.f32 %v855_v25, %v858_v27 }
 0x22f   : > { %v860_v29 = vmul.f32 1.442695, %v859_v28 }
 0x231   : > { %2167 = vpow2.f32 %v860_v29 }
 0x237   : > { %v2168_v30 = vpop.eup %2167 }
 0x238   : > { %v862_v31 = vsel %vm829_vm1, %v2168_v30, 0.0 }
 0x239   : > { %863 = vadd.xlane.f32.xlu1 %v862_v31 }
 0x252   : > { %1066 = vrot.lane.b32.xlu1 %v2641_v7, %s3043_s24  ;;  %s3092_s24 = sld [smem:[#allocation24_spill]] }
 0x27c   : > { %1017 = vmax.xlane.f32.xlu1 %v1016_v35 }
 0x295   : > { %1120 = vrot.lane.b32.xlu1 %v2641_v7, %s2413_s16  ;;  %s3048_s16 = smov 24  }
 0x2ac   : > { %v864_v36 = vpop.xlane.xlu1 %863 }
 0x2ad   : > { %2169 = vrcp.f32 %v864_v36  ;;  %v876_v40 = vand.u32 2147483648, %v864_v36  ;;  %v874_v42 = vand.u32 2147483647, %v864_v36  ;;  %vm870_vm7 = vweird.f32 %v864_v36 }
 0x2af   : > { %v877_v44 = vor.u32 1.1754944e-38, %v876_v40  ;;  %vm875_vm9 = vcmp.eq.f32.partialorder %v874_v42, 8.507059e+37 }
 0x2b3   : > { %v2170_v37 = vpop.eup %2169 }
 0x2b4   : > { %v866_v38 = vmul.f32 %v2170_v37, %v864_v36  ;;  %vm871_vm6 = vweird.f32 %v2170_v37 }
 0x2b5   : > { %vm872_vm8 = vmor %vm870_vm7, %vm871_vm6 }
 0x2b6   : > { %v867_v39 = vsub.f32 1.0, %v866_v38 }
 0x2b8   : > { %v868_v41 = vmul.f32 %v2170_v37, %v867_v39 }
 0x2ba   : > { %v869_v43 = vadd.f32 %v2170_v37, %v868_v41 }
 0x2bc   : > { %v873_v45 = vsel %vm872_vm8, %v2170_v37, %v869_v43  ;;  %vm1159_vm8 = vcmask 130048  }
 0x2bd   : > { %v878_v46 = vsel %vm875_vm9, %v877_v44, %v873_v45  ;;  %vm1161_vm9 = vcmask 195584  }
 0x2be   : > { %v879_v47 = vmul.f32 %v2168_v30, %v878_v46 }
 0x2c0   : > { %2027 = vmatmul.msk.f32.vlgmr.msra.gmra.mxu2 %vm829_vm1, %v879_v47 }
 0x2c4   : > { %v1067_v48 = vpop.permute.xlu1 %1066 }
 0x2c5   : > { %2035 = vmatmul.msk.f32.vlgmr.msrb.gmra.mxu0 %vm829_vm1, %v1067_v48 }
 0x2c8   : > { %2029 = vmatmul.msk.f32.vlgmr.msrb.gmra.mxu2 %vm829_vm1, %v2656_v9 }
 0x2ef   : > { %v1018_v49 = vpop.xlane.xlu1 %1017 }
 0x2f0   : > { %v1019_v50 = vsub.f32 %v1015_v34, %v1018_v49 }
 0x2f2   : > { %v1020_v51 = vmul.f32 1.442695, %v1019_v50 }
 0x2f4   : > { %2171 = vpow2.f32 %v1020_v51 }
 0x2fa   : > { %v2693_v57 = vpop.eup %2171 }
 0x2fb   : > { %v1022_v60 = vsel %vm829_vm1, %v2693_v57, 0.0 }
 0x307   : > { %v1121_v10 = vpop.permute.xlu1 %1120 }
 0x342   : > { %v1091_v52 = vpop.f32.mrf.mxu0 }
 0x343   : > { %v1094_v53 = vmul.f32 0.35355338, %v1091_v52  ;;  %v2688_v54 = vpop.f32.mrf.mxu2 }
 0x345   : > { %v1095_v55 = vsel %vm2670_vm5, %v1094_v53, -1e+10  ;;  %v1166_v53 = vld [vmem:[%s3084_s25 + $0x18] sm:$0xff] }
 0x346   : > { %v1096_v56 = vsel %vm829_vm1, %v1095_v55, -inf  ;;  %1186 = vmatpush.msra.mxu1 %v1166_v53 }
 0x347   : > { %1097 = vmax.xlane.f32.xlu0 %v1096_v56  ;;  %v1164_v56 = vld [vmem:[%s3084_s25 + $0x8] sm:$0xff] }
 0x34b   : > { %v931_v58 = vpop.f32.mrf.mxu2 }
 0x34c   : > { %v934_v59 = vmul.f32 0.35355338, %v931_v58 }
 0x34e   : > { %v935_v61 = vsel %vm2670_vm5, %v934_v59, -1e+10 }
 0x34f   : > { %1023 = vadd.xlane.f32.xlu0 %v1022_v60  ;;  %v936_v62 = vsel %vm829_vm1, %v935_v61, -inf }
 0x350   : > { %937 = vmax.xlane.f32.xlu2 %v936_v62 }
 0x368   : > { %960 = vrot.lane.b32.xlu2 %v2641_v7, %s2414_s27  ;;  %s3097_s27 = smov 80  }
 0x3ba   : > { %v1098_v63 = vpop.xlane.xlu0 %1097 }
 0x3bb   : > { %v1099_v0 = vsub.f32 %v1095_v55, %v1098_v63  ;;  %v1165_v55 = vld [vmem:[%s3084_s25 + $0x10] sm:$0xff] }
 0x3bc   : > { %1187 = vmatpush.msra.mxu1 %v1165_v55 }
 0x3bd   : > { %v1100_v1 = vmul.f32 1.442695, %v1099_v0  ;;  %v2160_v0 = vld [vmem:[%s3085_s7] ss:$0 sm:$0xff]  ;;  %s3098_s7 = smov 88  }
 0x3be   : > { %1188 = vmatpush.msra.mxu1 %v1164_v56 }
 0x3bf   : > { %2173 = vpow2.f32 %v1100_v1 }
 0x3c2   : > { %v1024_v13 = vpop.xlane.xlu0 %1023 }
 0x3c3   : > { %v938_v2 = vpop.xlane.xlu2 %937  ;;  %vm1030_vm11 = vweird.f32 %v1024_v13  ;;  %v1036_v27 = vand.u32 2147483648, %v1024_v13  ;;  %v1034_v28 = vand.u32 2147483647, %v1024_v13 }
 0x3c4   : > { %v939_v3 = vsub.f32 %v935_v61, %v938_v2 }
 0x3c5   : > { %v2701_v5 = vpop.eup %2173  ;;  %v1037_v34 = vor.u32 1.1754944e-38, %v1036_v27  ;;  %vm1035_vm15 = vcmp.eq.f32.partialorder %v1034_v28, 8.507059e+37  ;;  %v2161_v27 = vld [vmem:[%s3019_s11] ss:$0 sm:$0xff] }
 0x3c6   : > { %v940_v6 = vmul.f32 1.442695, %v939_v3  ;;  %v1102_v8 = vsel %vm829_vm1, %v2701_v5, 0.0 }
 0x3c7   : > { %1103 = vadd.xlane.f32.xlu0 %v1102_v8  ;;  %v1261_v8 = vld [vmem:[%s3018_s10 + $0x10] sm:$0xff] }
 0x3c8   : > { %2175 = vpow2.f32 %v940_v6  ;;  %v1262_v6 = vld [vmem:[%s3018_s10 + $0x18] sm:$0xff] }
 0x3c9   : > { %2177 = vrcp.f32 %v1024_v13  ;;  %1282 = vmatpush.msra.mxu0 %v1262_v6 }
 0x3cb   : > { %v961_v9 = vpop.permute.xlu2 %960  ;;  %1283 = vmatpush.msra.mxu0 %v1261_v8 }
 0x3cc   : > { %981 = vmatpush.msra.mxu2 %v961_v9 }
 0x3ce   : > { %1141 = vmatpush.msrb.mxu2 %v1121_v10  ;;  %v2176_v11 = vpop.eup %2175  ;;  %v1259_v10 = vld [vmem:[%s3018_s10] sm:$0xff] }
 0x3cf   : > { %v942_v12 = vsel %vm829_vm1, %v2176_v11, 0.0  ;;  %v2178_v15 = vpop.eup %2177 }
 0x3d0   : > { %943 = vadd.xlane.f32.xlu0 %v942_v12  ;;  %v1026_v16 = vmul.f32 %v2178_v15, %v1024_v13  ;;  %vm1031_vm10 = vweird.f32 %v2178_v15 }
 0x3d1   : > { %vm1032_vm12 = vmor %vm1030_vm11, %vm1031_vm10 }
 0x3d2   : > { %v1027_v18 = vsub.f32 1.0, %v1026_v16 }
 0x3d4   : > { %v1028_v21 = vmul.f32 %v2178_v15, %v1027_v18 }
 0x3d6   : > { %v1029_v24 = vadd.f32 %v2178_v15, %v1028_v21 }
 0x3d8   : > { %v1033_v30 = vsel %vm1032_vm12, %v2178_v15, %v1029_v24  ;;  %v1230_v24 = vld [vmem:[%s3087_s8 + $0x10] sm:$0xff] }
 0x3d9   : > { %v1038_v37 = vsel %vm1035_vm15, %v1037_v34, %v1033_v30 }
 0x3da   : > { %v1039_v45 = vmul.f32 %v2693_v57, %v1038_v37  ;;  %v1163_v57 = vld [vmem:[%s3084_s25] sm:$0xff] }
 0x3db   : > { %1189 = vmatpush.msra.mxu1 %v1163_v57  ;;  %v2788_v37 = vld [vmem:[%s3022_s14] sm:$0x3f] }
 0x3e4   : > { %1040 = vrot.lane.b32.xlu0 %v2641_v7, %s2415_s1  ;;  %s3088_s1 = smov 120  }
 0x43a   : > { %v1104_v14 = vpop.xlane.xlu0 %1103 }
 0x43b   : > { %2179 = vrcp.f32 %v1104_v14  ;;  %v1116_v40 = vand.u32 2147483648, %v1104_v14  ;;  %vm1110_vm5 = vweird.f32 %v1104_v14  ;;  %v1114_v42 = vand.u32 2147483647, %v1104_v14 }
 0x43d   : > { %v1117_v47 = vor.u32 1.1754944e-38, %v1116_v40  ;;  %vm1115_vm7 = vcmp.eq.f32.partialorder %v1114_v42, 8.507059e+37  ;;  %v1226_v42 = vperm.slane %v2788_v37, 1 }
 0x441   : > { %v2180_v20 = vpop.eup %2179 }
 0x442   : > { %v1106_v22 = vmul.f32 %v2180_v20, %v1104_v14  ;;  %vm1111_vm3 = vweird.f32 %v2180_v20 }
 0x443   : > { %v944_v19 = vpop.xlane.xlu0 %943  ;;  %vm1112_vm6 = vmor %vm1110_vm5, %vm1111_vm3 }
 0x444   : > { %2181 = vrcp.f32 %v944_v19  ;;  %v1107_v25 = vsub.f32 1.0, %v1106_v22  ;;  %v956_v29 = vand.u32 2147483648, %v944_v19  ;;  %v954_v33 = vand.u32 2147483647, %v944_v19 }
 0x445   : > { %vm950_vm14 = vweird.f32 %v944_v19 }
 0x446   : > { %v1108_v31 = vmul.f32 %v2180_v20, %v1107_v25  ;;  %v957_v36 = vor.u32 1.1754944e-38, %v956_v29  ;;  %vm955_vm4 = vcmp.eq.f32.partialorder %v954_v33, 8.507059e+37  ;;  %v1229_v25 = vld [vmem:[%s3087_s8 + $0x8] sm:$0xff] }
 0x448   : > { %v1109_v38 = vadd.f32 %v2180_v20, %v1108_v31 }
 0x44a   : > { %v2182_v23 = vpop.eup %2181  ;;  %v1113_v46 = vsel %vm1112_vm6, %v2180_v20, %v1109_v38 }
 0x44b   : > { %v946_v26 = vmul.f32 %v2182_v23, %v944_v19  ;;  %vm951_vm13 = vweird.f32 %v2182_v23  ;;  %v1118_v48 = vsel %vm1115_vm7, %v1117_v47, %v1113_v46 }
 0x44c   : > { %vm952_vm2 = vmor %vm950_vm14, %vm951_vm13  ;;  %v1119_v49 = vmul.f32 %v2701_v5, %v1118_v48  ;;  %v2419_v5 = vmov 32.0   ;;  %v2162_v48 = vld [vmem:[%s3091_s9] ss:$0 sm:$0xff] }
 0x44d   : > { %v947_v7 = vsub.f32 1.0, %v946_v26  ;;  %2183 = vrcp.f32 %v2419_v5  ;;  %v1228_v26 = vld [vmem:[%s3087_s8] sm:$0xff] }
 0x44f   : > { %v948_v32 = vmul.f32 %v2182_v23, %v947_v7 }
 0x451   : > { %v949_v35 = vadd.f32 %v2182_v23, %v948_v32 }
 0x453   : > { %v953_v39 = vsel %vm952_vm2, %v2182_v23, %v949_v35  ;;  %v2184_v9 = vpop.eup %2183  ;;  %v1231_v23 = vld [vmem:[%s3087_s8 + $0x18] sm:$0xff] }
 0x454   : > { %v958_v41 = vsel %vm955_vm4, %v957_v36, %v953_v39  ;;  %v1199_v12 = vmul.f32 32.0, %v2184_v9  ;;  %vm1203_vm10 = vweird.f32 %v2184_v9  ;;  %v1224_v39 = vperm.slane %v2788_v37, 0 }
 0x455   : > { %v959_v43 = vmul.f32 %v2176_v11, %v958_v41  ;;  %v780_v11 = vld [vmem:[%s772_s0] sm:$0xff]  ;;  %s3090_s0 = smov 104  }
 0x456   : > { %v1041_v44 = vpop.permute.xlu0 %1040  ;;  %v1200_v13 = vsub.f32 1.0, %v1199_v12 }
 0x457   : > { %2030 = vmatmul.msk.f32.vlgmr.msra.gmra.mxu2 %vm829_vm1, %v959_v43  ;;  %1061 = vmatpush.msra.mxu3 %v1041_v44 }
 0x458   : > { %2033 = vmatmul.msk.f32.vlgmr.msra.gmra.mxu3 %vm829_vm1, %v1039_v45  ;;  %v1201_v14 = vmul.f32 %v2184_v9, %v1200_v13 }
 0x459   : > { %1251 = vmatpush.msrb.mxu3 %v1231_v23 }
 0x45a   : > { %v1202_v15 = vadd.f32 %v2184_v9, %v1201_v14 }
 0x45b   : > { %1252 = vmatpush.msrb.mxu3 %v1230_v24 }
 0x45c   : > { %v2755_v16 = vsel %vm1203_vm10, %v2184_v9, %v1202_v15 }
 0x45d   : > { %1253 = vmatpush.msrb.mxu3 %v1229_v25 }
 0x45f   : > { %2036 = vmatmul.msk.f32.vlgmr.msrb.gmra.mxu2 %vm829_vm1, %v1119_v49  ;;  %1254 = vmatpush.msrb.mxu3 %v1228_v26 }
 0x4da   : > { %v983_v50 = vpop.f32.mrf.mxu2 }
 0x4db   : > { %1147 = vrot.lane.b32.xlu0 %v983_v50, %s3046_s29  ;;  %v1063_v51 = vpop.f32.mrf.mxu3  ;;  %s778_s29 = scalar_lea.vmem %s3092_s24, %s2614_s18  ;;  %s3095_s18 = smov 96  }
 0x4dc   : > { %1151 = vrot.lane.b32.xlu2 %v1063_v51, %s3045_s30  ;;  %s3096_s30 = smov 72  }
 0x4e2   : > { %v1143_v52 = vpop.f32.mrf.mxu2 }
 0x4e3   : > { %1155 = vrot.lane.b32.xlu1 %v1143_v52, %s3048_s16  ;;  %v782_v52 = vld [vmem:[%s778_s29] sm:$0x1] }
 0x4e4   : > { %vm1290_vm14 = vcmp.gt.f32.partialorder %v782_v52, 0.5 }
 0x4e5   : > { %v1291_v56 = vsel %vm1290_vm14, 1, %v2411_v17 }
 0x4e6   : > { %v1292_v57 = vperm.slane %v1291_v56, 0 }
 0x4e8   : > { %vm2814_vm15 = vcmp.eq.s32.totalorder %v1292_v57, 1 }
 0x536   : > { %v1152_v60 = vpop.permute.xlu2 %1151 }
 0x54d   : > { %v1148_v58 = vpop.permute.xlu0 %1147 }
 0x54e   : > { %v1158_v59 = vsel %vm829_vm1, %v2688_v54, %v1148_v58 }
 0x54f   : > { %v1160_v61 = vsel %vm1159_vm8, %v1158_v59, %v1152_v60 }
 0x555   : > { %v1156_v62 = vpop.permute.xlu1 %1155 }
 0x556   : > { %v1162_v63 = vsel %vm1161_vm9, %v1160_v61, %v1156_v62 }
 0x557   : > { %2037 = vmatmul.msk.f32.vlgmr.msra.gmra.mxu1 %vm792_vm0, %v1162_v63 }
 0x5d4   : > { %v1191_v1 = vpop.f32.mrf.mxu1 }
 0x5d5   : > { %v1192_v2 = vadd.f32 %v2160_v0, %v1191_v1 }
 0x5d7   : > { %v1194_v3 = vadd.f32 %v1192_v2, %v2634_v4  ;;  %v1260_v4 = vld [vmem:[%s3018_s10 + $0x8] sm:$0xff] }
 0x5d8   : > { %1284 = vmatpush.msra.mxu0 %v1260_v4 }
 0x5d9   : > { %v1195_v54 = vsel %vm792_vm0, %v1194_v3, 0.0 }
 0x5da   : > { %1196 = vadd.xlane.f32.xlu0 %v1195_v54  ;;  %1285 = vmatpush.msra.mxu0 %v1259_v10 }
 0x5db   : > { %2039 = vmatmul.msk.f32.vlgmr.msra.gmra.mxu0 %vm792_vm0, %v780_v11 }
 0x64d   : > { %v1197_v18 = vpop.xlane.xlu0 %1196 }
 0x64e   : > { %v1205_v19 = vmul.f32 %v2755_v16, %v1197_v18 }
 0x650   : > { %v1206_v20 = vsub.f32 %v1194_v3, %v1205_v19 }
 0x652   : > { %v1207_v21 = vmul.f32 %v1206_v20, %v1206_v20 }
 0x654   : > { %v1208_v22 = vsel %vm792_vm0, %v1207_v21, 0.0 }
 0x655   : > { %1209 = vadd.xlane.f32.xlu2 %v1208_v22 }
 0x658   : > { %v1287_v7 = vpop.f32.mrf.mxu0 }
 0x659   : > { %v2774_v28 = vadd.f32 %v2161_v27, %v1287_v7 }
 0x65b   : > { %1374 = vrot.lane.b32.xlu1 %v2774_v28, %s3088_s1  ;;  %2040 = vmatpush.xpose.msk.msra.mxu2 %vm829_vm1, %v2774_v28 }
 0x663   : > { %1454 = vrot.lane.b32.xlu1 %v2774_v28, %s3089_s20 }
 0x66b   : > { %1534 = vrot.lane.b32.xlu1 %v2774_v28, %s3090_s0 }
 0x6c8   : > { %v1210_v29 = vpop.xlane.xlu2 %1209 }
 0x6c9   : > { %v1211_v30 = vmul.f32 %v1210_v29, %v2755_v16 }
 0x6cb   : > { %v1212_v31 = vadd.f32 1e-05, %v1211_v30 }
 0x6cd   : > { %2185 = vrsqrt.f32 %v1212_v31  ;;  %vm1219_vm12 = vweird.f32 %v1212_v31  ;;  %v1375_v45 = vpop.permute.xlu1 %1374 }
 0x6ce   : > { %2043 = vmatpush.xpose.msk.msra.mxu3 %vm829_vm1, %v1375_v45 }
 0x6d3   : > { %v2186_v32 = vpop.eup %2185 }
 0x6d4   : > { %v1214_v33 = vmul.f32 %v2186_v32, %v1212_v31  ;;  %vm1220_vm11 = vweird.f32 %v2186_v32 }
 0x6d5   : > { %vm1221_vm13 = vmor %vm1219_vm12, %vm1220_vm11  ;;  %v1455_v46 = vpop.permute.xlu1 %1454 }
 0x6d6   : > { %v1215_v34 = vmul.f32 %v2186_v32, %v1214_v33  ;;  %2046 = vmatpush.xpose.msk.msrb.mxu2 %vm829_vm1, %v1455_v46 }
 0x6d8   : > { %v1216_v35 = vmul.f32 0.5, %v1215_v34 }
 0x6da   : > { %v1217_v36 = vsub.f32 1.5, %v1216_v35 }
 0x6dc   : > { %v1218_v38 = vmul.f32 %v2186_v32, %v1217_v36 }
 0x6dd   : > { %v1535_v47 = vpop.permute.xlu1 %1534 }
 0x6de   : > { %v1222_v40 = vsel %vm1221_vm13, %v2186_v32, %v1218_v38 }
 0x6df   : > { %v1223_v41 = vmul.f32 %v1222_v40, %v1206_v20 }
 0x6e1   : > { %v1225_v43 = vmul.f32 %v1224_v39, %v1223_v41 }
 0x6e3   : > { %v2792_v44 = vadd.f32 %v1226_v42, %v1225_v43 }
 0x6e5   : > { %2038 = vmatmul.msk.f32.vlgmr.msrb.gmra.mxu3 %vm792_vm0, %v2792_v44 }
 0x6e6   : > { %2049 = vmatpush.xpose.msk.msrb.mxu3 %vm829_vm1, %v1535_v47 }
 0x768   : > { %v1256_v49 = vpop.f32.mrf.mxu3 }
 0x769   : > { %v1257_v50 = vadd.f32 %v2162_v48, %v1256_v49 }
 0x76b   : > { %1532 = vrot.lane.b32.xlu0 %v1257_v50, %s3090_s0  ;;  %1372 = vrot.lane.b32.xlu1 %v1257_v50, %s3088_s1  ;;  %s2846_s1 = sand.u32 1, %s2391_s28  }
 0x76c   : > { %2041 = vmatmul.msk.f32.vlgmr.msra.gmra.mxu2 %vm829_vm1, %v1257_v50 }
 0x773   : > { %1452 = vrot.lane.b32.xlu1 %v1257_v50, %s3089_s20  ;;  %s2021_s20 = sshll.u32 %s2846_s1, 5 }
 0x774   : > { %s2854_s0 = scalar_lea.vmem [#allocation9], %s2021_s20 }
 0x7dd   : > { %v1373_v51 = vpop.permute.xlu1 %1372  ;;  %v1533_v53 = vpop.permute.xlu0 %1532 }
 0x7de   : > { %2044 = vmatmul.msk.f32.vlgmr.msra.gmra.mxu3 %vm829_vm1, %v1373_v51 }
 0x7e5   : > { %v1453_v55 = vpop.permute.xlu1 %1452 }
 0x7e6   : > { %2047 = vmatmul.msk.f32.vlgmr.msrb.gmra.mxu2 %vm829_vm1, %v1453_v55  ;;  %2050 = vmatmul.msk.f32.vlgmr.msrb.gmra.mxu3 %vm829_vm1, %v1533_v53 }
 0x7ef   : > { %v1317_v58 = vpop.f32.mrf.mxu2 }
 0x7f0   : > { %v1320_v60 = vmul.f32 0.35355338, %v1317_v58 }
 0x7f2   : > { %v1321_v61 = vsel %vm2814_vm15, %v1320_v60, -1e+10 }
 0x7f3   : > { %v1322_v62 = vsel %vm829_vm1, %v1321_v61, -inf }
 0x7f4   : > { %1323 = vmax.xlane.f32.xlu2 %v1322_v62 }
 0x861   : > { %v1397_v63 = vpop.f32.mrf.mxu3 }
 0x862   : > { %v1400_v0 = vmul.f32 0.35355338, %v1397_v63 }
 0x864   : > { %v1401_v1 = vsel %vm2814_vm15, %v1400_v0, -1e+10 }
 0x865   : > { %v1402_v17 = vsel %vm829_vm1, %v1401_v1, -inf }
 0x866   : > { %1403 = vmax.xlane.f32.xlu1 %v1402_v17 }
 0x867   : > { %v1324_v2 = vpop.xlane.xlu2 %1323 }
 0x868   : > { %v1325_v3 = vsub.f32 %v1321_v61, %v1324_v2 }
 0x869   : > { %v1477_v54 = vpop.f32.mrf.mxu2  ;;  %v1557_v8 = vpop.f32.mrf.mxu3 }
 0x86a   : > { %v1326_v5 = vmul.f32 1.442695, %v1325_v3  ;;  %v1480_v6 = vmul.f32 0.35355338, %v1477_v54  ;;  %v1560_v10 = vmul.f32 0.35355338, %v1557_v8 }
 0x86c   : > { %2187 = vpow2.f32 %v1326_v5  ;;  %v1481_v4 = vsel %vm2814_vm15, %v1480_v6, -1e+10  ;;  %v1561_v12 = vsel %vm2814_vm15, %v1560_v10, -1e+10 }
 0x86d   : > { %v1482_v9 = vsel %vm829_vm1, %v1481_v4, -inf  ;;  %v1562_v14 = vsel %vm829_vm1, %v1561_v12, -inf }
 0x86e   : > { %1483 = vmax.xlane.f32.xlu2 %v1482_v9 }
 0x872   : > { %v2188_v11 = vpop.eup %2187 }
 0x873   : > { %v1328_v13 = vsel %vm829_vm1, %v2188_v11, 0.0 }
 0x874   : > { %1329 = vadd.xlane.f32.xlu0 %v1328_v13 }
 0x876   : > { %1563 = vmax.xlane.f32.xlu2 %v1562_v14 }
 0x87f   : > { %1346 = vrot.lane.b32.xlu1 %v2774_v28, %s3095_s18  ;;  %s1825_s18 = scalar_lea.sflag [#allocation10], %s2846_s1 }
 0x887   : > { %1586 = vrot.lane.b32.xlu1 %v2774_v28, %s3096_s30 }
 0x888   : > { %1506 = vrot.lane.b32.xlu0 %v2774_v28, %s3097_s27 }
 0x8d9   : > { %v1404_v15 = vpop.xlane.xlu1 %1403 }
 0x8da   : > { %v1405_v18 = vsub.f32 %v1401_v1, %v1404_v15 }
 0x8dc   : > { %v1406_v19 = vmul.f32 1.442695, %v1405_v18 }
 0x8de   : > { %2189 = vpow2.f32 %v1406_v19 }
 0x8e1   : > { %v1484_v20 = vpop.xlane.xlu2 %1483 }
 0x8e2   : > { %v1485_v21 = vsub.f32 %v1481_v4, %v1484_v20 }
 0x8e4   : > { %v2837_v22 = vpop.eup %2189  ;;  %v1486_v23 = vmul.f32 1.442695, %v1485_v21 }
 0x8e5   : > { %v1408_v24 = vsel %vm829_vm1, %v2837_v22, 0.0 }
 0x8e6   : > { %2191 = vpow2.f32 %v1486_v23  ;;  %1409 = vadd.xlane.f32.xlu2 %v1408_v24 }
 0x8e7   : > { %v1330_v25 = vpop.xlane.xlu0 %1329 }
 0x8e8   : > { %2193 = vrcp.f32 %v1330_v25  ;;  %v1342_v35 = vand.u32 2147483648, %v1330_v25  ;;  %v1340_v38 = vand.u32 2147483647, %v1330_v25  ;;  %vm1336_vm3 = vweird.f32 %v1330_v25 }
 0x8e9   : > { %v1564_v26 = vpop.xlane.xlu2 %1563 }
 0x8ea   : > { %v1565_v27 = vsub.f32 %v1561_v12, %v1564_v26  ;;  %v1343_v42 = vor.u32 1.1754944e-38, %v1342_v35  ;;  %vm1341_vm5 = vcmp.eq.f32.partialorder %v1340_v38, 8.507059e+37  ;;  %v2163_v38 = vld [vmem:[%s3021_s13] ss:$0 sm:$0xff] }
 0x8ec   : > { %v2841_v7 = vpop.eup %2191  ;;  %v1566_v29 = vmul.f32 1.442695, %v1565_v27  ;;  %v1630_v27 = vld [vmem:[%s3020_s12 + $0x18] sm:$0xff] }
 0x8ed   : > { %v1488_v30 = vsel %vm829_vm1, %v2841_v7, 0.0  ;;  %1650 = vmatpush.msra.mxu2 %v1630_v27  ;;  %v1782_v27 = vld [vmem:[%s3027_s19 + $0x10] sm:$0xff] }
 0x8ee   : > { %v2194_v31 = vpop.eup %2193  ;;  %2195 = vpow2.f32 %v1566_v29  ;;  %1489 = vadd.xlane.f32.xlu2 %v1488_v30  ;;  %v1628_v29 = vld [vmem:[%s3020_s12 + $0x8] sm:$0xff]  ;;  %v1627_v30 = vld [vmem:[%s3020_s12] sm:$0xff] }
 0x8ef   : > { %v1332_v32 = vmul.f32 %v2194_v31, %v1330_v25  ;;  %vm1337_vm2 = vweird.f32 %v2194_v31 }
 0x8f0   : > { %vm1338_vm4 = vmor %vm1336_vm3, %vm1337_vm2 }
 0x8f1   : > { %v1333_v33 = vsub.f32 1.0, %v1332_v32  ;;  %v1347_v34 = vpop.permute.xlu1 %1346 }
 0x8f2   : > { %1367 = vmatpush.msrb.mxu1 %v1347_v34 }
 0x8f3   : > { %v1334_v36 = vmul.f32 %v2194_v31, %v1333_v33 }
 0x8f4   : > { %v2848_v39 = vpop.eup %2195 }
 0x8f5   : > { %v1335_v40 = vadd.f32 %v2194_v31, %v1334_v36  ;;  %v1568_v41 = vsel %vm829_vm1, %v2848_v39, 0.0 }
 0x8f6   : > { %1569 = vadd.xlane.f32.xlu2 %v1568_v41 }
 0x8f7   : > { %v1339_v43 = vsel %vm1338_vm4, %v2194_v31, %v1335_v40 }
 0x8f8   : > { %v1344_v45 = vsel %vm1341_vm5, %v1343_v42, %v1339_v43 }
 0x8f9   : > { %v1345_v46 = vmul.f32 %v2188_v11, %v1344_v45  ;;  %v1587_v10 = vpop.permute.xlu1 %1586 }
 0x8fa   : > { %v1507_v47 = vpop.permute.xlu0 %1506 }
 0x8fb   : > { %2042 = vmatmul.msk.f32.vlgmr.msrb.gmra.mxu1 %vm829_vm1, %v1345_v46  ;;  %1812 = vst.msk [vmem:[%s2854_s0] sm:$0xff] %vm829_vm1, %v1345_v46 }
 0x8fc   : > { %1527 = vmatpush.msra.mxu1 %v1507_v47 }
 0x90e   : > { %1426 = vrot.lane.b32.xlu2 %v2774_v28, %s3098_s7 }
 0x959   : > { %v1410_v48 = vpop.xlane.xlu2 %1409 }
 0x95a   : > { %2197 = vrcp.f32 %v1410_v48  ;;  %v1422_v53 = vand.u32 2147483648, %v1410_v48  ;;  %v1420_v56 = vand.u32 2147483647, %v1410_v48  ;;  %vm1416_vm7 = vweird.f32 %v1410_v48 }
 0x95c   : > { %v1423_v59 = vor.u32 1.1754944e-38, %v1422_v53  ;;  %vm1421_vm11 = vcmp.eq.f32.partialorder %v1420_v56, 8.507059e+37  ;;  %v1723_v53 = vld [vmem:[%s3025_s17 + $0x30] sm:$0xff] }
 0x960   : > { %v2198_v49 = vpop.eup %2197 }
 0x961   : > { %v1412_v50 = vmul.f32 %v2198_v49, %v1410_v48  ;;  %v1490_v51 = vpop.xlane.xlu2 %1489  ;;  %vm1417_vm6 = vweird.f32 %v2198_v49 }
 0x962   : > { %2199 = vrcp.f32 %v1490_v51  ;;  %vm1418_vm10 = vmor %vm1416_vm7, %vm1417_vm6  ;;  %v1502_v1 = vand.u32 2147483648, %v1490_v51  ;;  %v1500_v2 = vand.u32 2147483647, %v1490_v51  ;;  %vm1496_vm13 = vweird.f32 %v1490_v51 }
 0x963   : > { %v1413_v52 = vsub.f32 1.0, %v1412_v50  ;;  %v1686_v50 = vld [vmem:[%s3023_s15 + $0x8] sm:$0xff]  ;;  %vm1729_vm7 = vcmask 523264  }
 0x964   : > { %v1503_v5 = vor.u32 1.1754944e-38, %v1502_v1  ;;  %vm1501_vm15 = vcmp.eq.f32.partialorder %v1500_v2, 8.507059e+37 }
 0x965   : > { %v1414_v55 = vmul.f32 %v2198_v49, %v1413_v52  ;;  %v1724_v52 = vld [vmem:[%s3025_s17 + $0x38] sm:$0xff] }
 0x966   : > { %1741 = vmatpush.msra.mxu3 %v1724_v52 }
 0x967   : > { %v1415_v57 = vadd.f32 %v2198_v49, %v1414_v55  ;;  %v1722_v55 = vld [vmem:[%s3025_s17 + $0x28] sm:$0xff] }
 0x968   : > { %v2200_v58 = vpop.eup %2199  ;;  %1742 = vmatpush.msra.mxu3 %v1723_v53 }
 0x969   : > { %v1419_v60 = vsel %vm1418_vm10, %v2198_v49, %v1415_v57  ;;  %v1492_v28 = vmul.f32 %v2200_v58, %v1490_v51  ;;  %v1570_v61 = vpop.xlane.xlu2 %1569  ;;  %vm1497_vm12 = vweird.f32 %v2200_v58  ;;  %v1688_v49 = vld [vmem:[%s3023_s15 + $0x18] sm:$0xff]  ;;  %v1685_v51 = vld [vmem:[%s3023_s15] sm:$0xff] }
 0x96a   : > { %v1424_v62 = vsel %vm1421_vm11, %v1423_v59, %v1419_v60  ;;  %2201 = vrcp.f32 %v1570_v61  ;;  %vm1498_vm14 = vmor %vm1496_vm13, %vm1497_vm12  ;;  %v1582_v13 = vand.u32 2147483648, %v1570_v61  ;;  %v1580_v15 = vand.u32 2147483647, %v1570_v61  ;;  %1708 = vmatpush.msrb.mxu1 %v1688_v49  ;;  %1743 = vmatpush.msra.mxu3 %v1722_v55  ;;  %v1720_v60 = vld [vmem:[%s3025_s17 + $0x18] sm:$0xff] }
 0x96b   : > { %v1493_v63 = vsub.f32 1.0, %v1492_v28  ;;  %v1425_v0 = vmul.f32 %v2837_v22, %v1424_v62  ;;  %vm1576_vm3 = vweird.f32 %v1570_v61 }
 0x96c   : > { %v1583_v19 = vor.u32 1.1754944e-38, %v1582_v13  ;;  %vm1581_vm5 = vcmp.eq.f32.partialorder %v1580_v15, 8.507059e+37 }
 0x96d   : > { %v1494_v17 = vmul.f32 %v2200_v58, %v1493_v63  ;;  %2056 = vst.msk [vmem:[%s2854_s0 + $0x8] sm:$0xff] %vm829_vm1, %v1425_v0 }
 0x96f   : > { %v1495_v3 = vadd.f32 %v2200_v58, %v1494_v17  ;;  %v1681_v17 = vperm.slane %v2788_v37, 2 }
 0x970   : > { %v2202_v54 = vpop.eup %2201 }
 0x971   : > { %v1499_v6 = vsel %vm1498_vm14, %v2200_v58, %v1495_v3  ;;  %v1572_v8 = vmul.f32 %v2202_v54, %v1570_v61  ;;  %v1427_v4 = vpop.permute.xlu2 %1426  ;;  %vm1577_vm2 = vweird.f32 %v2202_v54  ;;  %v1721_v58 = vld [vmem:[%s3025_s17 + $0x20] sm:$0xff] }
 0x972   : > { %v1504_v9 = vsel %vm1501_vm15, %v1503_v5, %v1499_v6  ;;  %1447 = vmatpush.msrb.mxu0 %v1427_v4  ;;  %vm1578_vm4 = vmor %vm1576_vm3, %vm1577_vm2  ;;  %1744 = vmatpush.msra.mxu3 %v1721_v58  ;;  %v1718_v4 = vld [vmem:[%s3025_s17 + $0x8] sm:$0xff] }
 0x973   : > { %v1573_v11 = vsub.f32 1.0, %v1572_v8  ;;  %2045 = vmatmul.msk.f32.vlgmr.msrb.gmra.mxu0 %vm829_vm1, %v1425_v0  ;;  %v1505_v12 = vmul.f32 %v2841_v7, %v1504_v9  ;;  %v1629_v7 = vld [vmem:[%s3020_s12 + $0x10] sm:$0xff]  ;;  %v1717_v9 = vld [vmem:[%s3025_s17] sm:$0xff] }
 0x974   : > { %1607 = vmatpush.msra.mxu0 %v1587_v10  ;;  %1651 = vmatpush.msra.mxu2 %v1629_v7  ;;  %v1719_v8 = vld [vmem:[%s3025_s17 + $0x10] sm:$0xff]  ;;  %v2164_v10 = vld [vmem:[#allocation2] ss:$0 sm:$0xff]  ;;  %v1781_v7 = vld [vmem:[%s3027_s19 + $0x8] sm:$0xff] }
 0x975   : > { %v1574_v14 = vmul.f32 %v2202_v54, %v1573_v11  ;;  %2048 = vmatmul.msk.f32.vlgmr.msra.gmra.mxu1 %vm829_vm1, %v1505_v12  ;;  %2057 = vst.msk [vmem:[%s2854_s0 + $0x10] sm:$0xff] %vm829_vm1, %v1505_v12  ;;  %1745 = vmatpush.msra.mxu3 %v1720_v60 }
 0x976   : > { %1652 = vmatpush.msra.mxu2 %v1628_v29  ;;  %v1780_v29 = vld [vmem:[%s3027_s19] sm:$0xff] }
 0x977   : > { %v1575_v18 = vadd.f32 %v2202_v54, %v1574_v14  ;;  %1746 = vmatpush.msra.mxu3 %v1719_v8  ;;  %v2165_v14 = vld [vmem:[#allocation5] ss:$0 sm:$0xff] }
 0x978   : > { %v1369_v23 = vpop.f32.mrf.mxu1  ;;  %1653 = vmatpush.msra.mxu2 %v1627_v30 }
 0x979   : > { %v1579_v20 = vsel %vm1578_vm4, %v2202_v54, %v1575_v18  ;;  %v1683_v54 = vperm.slane %v2788_v37, 3  ;;  %1747 = vmatpush.msra.mxu3 %v1718_v4 }
 0x97a   : > { %v1584_v21 = vsel %vm1581_vm5, %v1583_v19, %v1579_v20 }
 0x97b   : > { %v1585_v22 = vmul.f32 %v2848_v39, %v1584_v21  ;;  %1748 = vmatpush.msra.mxu3 %v1717_v9 }
 0x97d   : > { %2051 = vmatmul.msk.f32.vlgmr.msra.gmra.mxu0 %vm829_vm1, %v1585_v22  ;;  %2058 = vst.msk [vmem:[%s2854_s0 + $0x18] sm:$0xff] %vm829_vm1, %v1585_v22 }
 0x9f0   : > { %v1449_v24 = vpop.f32.mrf.mxu0 }
 0x9f1   : > { %1613 = vrot.lane.b32.xlu2 %v1449_v24, %s3099_s3 }
 0x9f2   : > { %v1529_v25 = vpop.f32.mrf.mxu1 }
 0x9f3   : > { %1617 = vrot.lane.b32.xlu1 %v1529_v25, %s3100_s26  ;;  %s1851_s26 = sshll.u32 %s2854_s0, 4  ;;  %s2317_s0 = scalar_lea.hbm %s3030_s22, 64  ;;  %s1852_s26 = int_to_ptr.vmem [resolvable:$true] %s1851_s26 }
 0x9fa   : > { %v1609_v26 = vpop.f32.mrf.mxu0 }
 0x9fb   : > { %1621 = vrot.lane.b32.xlu0 %v1609_v26, %s3101_s2  ;;  %v1783_v26 = vld [vmem:[%s3027_s19 + $0x18] sm:$0xff]  ;;  %s2066_s2 = sshll.u32 %s2557_s4, 5 }
 0x9fc   : > { %1803 = vmatpush.msrb.mxu0 %v1783_v26  ;;  %s1850_s24 = scalar_lea.hbm %s3030_s22, %s2066_s2 }
 0x9fd   : > { %s1853_s29 = sshll.u32 %s1850_s24, 4  ;;  %s1854_s29 = int_to_ptr.hbm [resolvable:$true] %s1853_s29 }
 0x9fe   : > { %1804 = vmatpush.msrb.mxu0 %v1782_v27  ;;  %s2311_s30 = sshra.s32 %s1854_s29, 4  ;;  %s2312_s30 = int_to_ptr.hbm [resolvable:$true] %s2311_s30 }
 0x9ff   : > { %s2313_s27 = scalar_lea.hbm %s2312_s30, 32  ;;  %p2318_p3 = scmp.lt.s32.totalorder %s2312_s30, %s3030_s22 }
 0xa00   : > { %1805 = vmatpush.msrb.mxu0 %v1781_v7  ;;  %p2314_p0 = scmp.ne.s32.totalorder %s2312_s30, %s2313_s27  ;;  %p2319_p4 = scmp.lt.s32.totalorder %s2317_s0, %s2313_s27 }
 0xa02   : > { %1806 = vmatpush.msrb.mxu0 %v1780_v29  ;;  %p2315_p1 = pnand %p2314_p0, %p2574_p5  ;;  %p2320_p7 = por %p2319_p4, %p2318_p3 }
 0xa04   : > { %p2316_p2 = pneg %p2315_p1 }
 0xa06   : > { %p2321_p8 = pnand %p2320_p7, %p2316_p2 }
 0xa4b   : > { %v1614_v31 = vpop.permute.xlu2 %1613 }
 0xa4c   : > { %v1624_v33 = vsel %vm829_vm1, %v1369_v23, %v1614_v31 }
 0xa65   : > { %v1618_v32 = vpop.permute.xlu1 %1617 }
 0xa66   : > { %v1625_v34 = vsel %vm1159_vm8, %v1624_v33, %v1618_v32 }
 0xa6d   : > { %v1622_v35 = vpop.permute.xlu0 %1621 }
 0xa6e   : > { %v1626_v36 = vsel %vm1161_vm9, %v1625_v34, %v1622_v35 }
 0xa6f   : > { %2052 = vmatmul.msk.f32.vlgmr.msra.gmra.mxu2 %vm792_vm0, %v1626_v36 }
 0xaf2   : > { %v1655_v39 = vpop.f32.mrf.mxu2 }
 0xaf3   : > { %v1656_v40 = vadd.f32 %v2163_v38, %v1655_v39 }
 0xaf5   : > { %v1658_v41 = vadd.f32 %v1656_v40, %v2792_v44  ;;  %v1687_v44 = vld [vmem:[%s3023_s15 + $0x10] sm:$0xff]  ;;  %v1776_v40 = vperm.slane %v2788_v37, 4 }
 0xaf6   : > { %1709 = vmatpush.msrb.mxu1 %v1687_v44 }
 0xaf7   : > { %v1659_v42 = vsel %vm792_vm0, %v1658_v41, 0.0 }
 0xaf8   : > { %1660 = vadd.xlane.f32.xlu2 %v1659_v42  ;;  %1710 = vmatpush.msrb.mxu1 %v1686_v50 }
 0xafa   : > { %1711 = vmatpush.msrb.mxu1 %v1685_v51 }
 0xb6b   : > { %v1661_v43 = vpop.xlane.xlu2 %1660 }
 0xb6c   : > { %v1662_v45 = vmul.f32 %v1661_v43, %v2755_v16 }
 0xb6e   : > { %v1663_v46 = vsub.f32 %v1658_v41, %v1662_v45 }
 0xb70   : > { %v1664_v47 = vmul.f32 %v1663_v46, %v1663_v46 }
 0xb72   : > { %v1665_v48 = vsel %vm792_vm0, %v1664_v47, 0.0 }
 0xb73   : > { %1666 = vadd.xlane.f32.xlu1 %v1665_v48 }
 0xbe6   : > { %v1667_v56 = vpop.xlane.xlu1 %1666 }
 0xbe7   : > { %v1668_v57 = vmul.f32 %v1667_v56, %v2755_v16 }
 0xbe9   : > { %v1669_v59 = vadd.f32 1e-05, %v1668_v57 }
 0xbeb   : > { %2203 = vrsqrt.f32 %v1669_v59  ;;  %vm1676_vm9 = vweird.f32 %v1669_v59 }
 0xbf1   : > { %v2204_v28 = vpop.eup %2203 }
 0xbf2   : > { %v1671_v61 = vmul.f32 %v2204_v28, %v1669_v59  ;;  %vm1677_vm1 = vweird.f32 %v2204_v28 }
 0xbf3   : > { %vm1678_vm6 = vmor %vm1676_vm9, %vm1677_vm1 }
 0xbf4   : > { %v1672_v62 = vmul.f32 %v2204_v28, %v1671_v61 }
 0xbf6   : > { %v1673_v63 = vmul.f32 0.5, %v1672_v62 }
 0xbf8   : > { %v1674_v0 = vsub.f32 1.5, %v1673_v63 }
 0xbfa   : > { %v1675_v1 = vmul.f32 %v2204_v28, %v1674_v0 }
 0xbfc   : > { %v1679_v2 = vsel %vm1678_vm6, %v2204_v28, %v1675_v1 }
 0xbfd   : > { %v1680_v3 = vmul.f32 %v1679_v2, %v1663_v46 }
 0xbff   : > { %v1682_v5 = vmul.f32 %v1681_v17, %v1680_v3 }
 0xc01   : > { %v1684_v6 = vadd.f32 %v1683_v54, %v1682_v5 }
 0xc03   : > { %2053 = vmatmul.msk.f32.vlgmr.msrb.gmra.mxu1 %vm792_vm0, %v1684_v6 }
 0xc80   : > { %v1713_v11 = vpop.f32.mrf.mxu1 }
 0xc81   : > { %v1714_v12 = vadd.f32 %v2164_v10, %v1713_v11 }
 0xc83   : > { %v1716_v13 = vmax.f32 %v1714_v12, 0.0 }
 0xc85   : > { %2054 = vmatmul.msk.f32.vlgmr.msra.gmra.mxu3 %vm1729_vm7, %v1716_v13 }
 0xd08   : > { %v1750_v15 = vpop.f32.mrf.mxu3 }
 0xd09   : > { %v1751_v18 = vadd.f32 %v2165_v14, %v1750_v15 }
 0xd0b   : > { %v1753_v19 = vadd.f32 %v1751_v18, %v1684_v6 }
 0xd0d   : > { %v1754_v20 = vsel %vm792_vm0, %v1753_v19, 0.0 }
 0xd0e   : > { %1755 = vadd.xlane.f32.xlu0 %v1754_v20 }
 0xd81   : > { %v1756_v21 = vpop.xlane.xlu0 %1755 }
 0xd82   : > { %v1757_v22 = vmul.f32 %v1756_v21, %v2755_v16 }
 0xd84   : > { %v1758_v23 = vsub.f32 %v1753_v19, %v1757_v22 }
 0xd86   : > { %v1759_v24 = vmul.f32 %v1758_v23, %v1758_v23 }
 0xd88   : > { %v1760_v25 = vsel %vm792_vm0, %v1759_v24, 0.0 }
 0xd89   : > { %1761 = vadd.xlane.f32.xlu2 %v1760_v25 }
 0xdfc   : > { %v1762_v30 = vpop.xlane.xlu2 %1761 }
 0xdfd   : > { %v1763_v31 = vmul.f32 %v1762_v30, %v2755_v16  ;;  %v1778_v16 = vperm.slane %v2788_v37, 5 }
 0xdff   : > { %v1764_v32 = vadd.f32 1e-05, %v1763_v31 }
 0xe01   : > { %2205 = vrsqrt.f32 %v1764_v32  ;;  %vm1771_vm11 = vweird.f32 %v1764_v32 }
 0xe07   : > { %v2206_v33 = vpop.eup %2205 }
 0xe08   : > { %v1766_v34 = vmul.f32 %v2206_v33, %v1764_v32  ;;  %vm1772_vm10 = vweird.f32 %v2206_v33 }
 0xe09   : > { %vm1773_vm12 = vmor %vm1771_vm11, %vm1772_vm10 }
 0xe0a   : > { %v1767_v35 = vmul.f32 %v2206_v33, %v1766_v34 }
 0xe0c   : > { %v1768_v36 = vmul.f32 0.5, %v1767_v35 }
 0xe0e   : > { %v1769_v38 = vsub.f32 1.5, %v1768_v36 }
 0xe10   : > { %v1770_v39 = vmul.f32 %v2206_v33, %v1769_v38 }
 0xe12   : > { %v1774_v41 = vsel %vm1773_vm12, %v2206_v33, %v1770_v39 }
 0xe13   : > { %v1775_v42 = vmul.f32 %v1774_v41, %v1758_v23 }
 0xe15   : > { %v1777_v43 = vmul.f32 %v1776_v40, %v1775_v42 }
 0xe17   : > { %v1779_v45 = vadd.f32 %v1778_v16, %v1777_v43 }
 0xe19   : > { %2055 = vmatmul.msk.f32.vlgmr.msrb.gmra.mxu0 %vm792_vm0, %v1779_v45 }
 0xe1a   : > { %2324 = shalt.err (!%p2321_p8)
}
 0xe1b   : > { %s2420_s2 = smov 128   ;;  %s2020_s16 = sshll.u32 %s2846_s1, 3  ;;  %v2166_v37 = vld [vmem:[#allocation7] ss:$0 sm:$0xff] }
 0xe1c   : > { %2080 = dma.vmem_to_hbm [thread:$0]  (%p2574_p5), %s1852_s26, 512, %s1854_s29, %s1825_s18, %s2420_s2, %s2420_s2, %s3099_s3  }
 0xe1d   : > { %s2061_s5 = sshll.u32 %s2557_s4, 3  ;;  %s757_s9 = scalar_lea.vmem [#allocation8], %s2020_s16 }
 0xe1e   : > { %s1835_s8 = scalar_lea.hbm %s3029_s21, %s2061_s5  ;;  %s1837_s30 = sshll.u32 %s757_s9, 4  ;;  %s1838_s30 = int_to_ptr.vmem [resolvable:$true] %s1837_s30 }
 0xe1f   : > { %s1839_s27 = sshll.u32 %s1835_s8, 4  ;;  %s1820_s7 = scalar_lea.sflag [#allocation4], %s2846_s1  ;;  %s1840_s27 = int_to_ptr.hbm [resolvable:$true] %s1839_s27 }
 0xe20   : > { %s2339_s0 = sshra.s32 %s1840_s27, 4  ;;  %s2345_s29 = scalar_lea.hbm %s3029_s21, 16  ;;  %s2340_s0 = int_to_ptr.hbm [resolvable:$true] %s2339_s0 }
 0xe21   : > { %s2341_s3 = scalar_lea.hbm %s2340_s0, 8  ;;  %p2346_p12 = scmp.lt.s32.totalorder %s2340_s0, %s3029_s21 }
 0xe22   : > { %p2342_p9 = scmp.ne.s32.totalorder %s2340_s0, %s2341_s3  ;;  %p2347_p13 = scmp.lt.s32.totalorder %s2345_s29, %s2341_s3 }
 0xe24   : > { %p2343_p10 = pnand %p2342_p9, %p2574_p5  ;;  %p2348_p0 = por %p2347_p13, %p2346_p12 }
 0xe26   : > { %p2344_p11 = pneg %p2343_p10 }
 0xe28   : > { %p2349_p1 = pnand %p2348_p0, %p2344_p11 }
 0xe96   : > { %v1808_v46 = vpop.f32.mrf.mxu0 }
 0xe97   : > { %v1809_v47 = vadd.f32 %v2166_v37, %v1808_v46 }
 0xe99   : > { %1811 = vst.msk [vmem:[%s757_s9] sm:$0xff] %vm1159_vm8, %v1809_v47 }
 0xe9a   : > { %2352 = shalt.err (!%p2349_p1)
}
 0xe9b   : > { %2079 = dma.vmem_to_hbm [thread:$0]  (%p2574_p5), %s1838_s30, 128, %s1840_s27, %s1820_s7  }
 0xe9c PF: > { %s3102_s1 = sld [smem:[#allocation17_spill]] }
 0xe9d   : > { %s3103_s16 = sld [smem:[#allocation15_spill]] }
 0xea2   : > { %p2106_p2 = scmp.ge.s32.totalorder %s3102_s1, 2 }
 0xea3   : > { %s1868_s24 = sand.u32 1, %s3103_s16  }
 0xea4   : > { %p2094_p3 = pnand %p2106_p2, %p2578_p6  ;;  %s1869_s20 = scalar_lea.sflag [#allocation4], %s1868_s24 }
 0xea6   : > { %p2095_p4 = pneg %p2094_p3 }
 0xea8   : > { %2378 = dma.done.wait (%p2095_p4), %s1869_s20, 128  }
 0xea9   : > { %2380 = vsyncadd (%p2095_p4), %s1869_s20, 4294967168  ;;  %s1879_s8 = scalar_lea.sflag [#allocation10], %s1868_s24 }
 0xeaa   : > { %2382 = dma.done.wait (%p2095_p4), %s1879_s8, 512  }
 0xeab   : > { %2384 = vsyncadd (%p2095_p4), %s1879_s8, 4294966784  ;;  %s3105_s30 = sld [smem:[#allocation18_spill]]  ;;  %s3108_s3 = smov %s2391_s28 }
 0xeac   : > { %s3106_s9 = sld [smem:[#allocation16_spill]] }
 0xead   : > { %s3107_s29 = sld [smem:[#allocation19_spill]] }
 0xeb1   : > { %p38_p5 = scmp.ge.s32.totalorder %s3105_s30, 4  }
 0xeb2   : > { %s3109_s28 = smov %s3106_s9 }
 0xeb3   :  { %40 = sbr.rel (!%p38_p5) target bundleno = 21 (0x15), region = 181 }
 0xeb8   :  { %1885 = vsyncpa [#allocation3], 1 }
 0xeb9   :  { %1887 = vsyncpa [#allocation3 + $0x1], 1 }
 0xeba   :  { %1888 = vsyncpa [#allocation6], 1 }
 0xebb   :  { %1889 = vsyncpa [#allocation4], 1 }
 0xebc   :  { %1891 = vsyncpa [#allocation4 + $0x1], 1 }
 0xebd   :  { %1892 = vsyncpa [#allocation10], 1 }
 0xebe   :  { %1894 = vsyncpa [#allocation10 + $0x1], 1 }

// kernel: seq2seq_forward.4
= control target key start
LH: loop header
LB: loop body
LE: loop exit
PB: predicated region body
PF: predicated region fallthrough
CT: control target
= control target key end

     0   :  { %s1154_s17 = smov 0   ;;  %s1325_s0 = inlined_call_operand.vmem [shape: f32[2,8,32], index: 0, kind: input, shape index: {}]   ;;  %s1326_s1 = inlined_call_operand.vmem [shape: f32[2,1,8], index: 1, kind: input, shape index: {}]   ;;  %s1327_s2 = inlined_call_operand.vmem [shape: f32[32,96], index: 2, kind: input, shape index: {}]   ;;  %s1328_s3 = inlined_call_operand.vmem [shape: f32[1,96], index: 3, kind: input, shape index: {}]   ;;  %s1329_s4 = inlined_call_operand.vmem [shape: f32[32,32], index: 4, kind: input, shape index: {}]   ;;  %s1330_s5 = inlined_call_operand.vmem [shape: f32[1,32], index: 5, kind: input, shape index: {}]   ;;  %s1331_s6 = inlined_call_operand.vmem [shape: f32[4,32], index: 6, kind: input, shape index: {}]   ;;  %s1332_s7 = inlined_call_operand.vmem [shape: f32[32,64], index: 7, kind: input, shape index: {}]   ;;  %s1333_s8 = inlined_call_operand.vmem [shape: f32[1,64], index: 8, kind: input, shape index: {}]   ;;  %s1334_s9 = inlined_call_operand.vmem [shape: f32[64,32], index: 9, kind: input, shape index: {}]   ;;  %s1335_s10 = inlined_call_operand.vmem [shape: f32[1,32], index: 10, kind: input, shape index: {}]   ;;  %s1336_s11 = inlined_call_operand.vmem [shape: f32[2,8,32], index: 11, kind: output, shape index: {}]  }
   0x1 LB: > { %s995_s18 = sadd.s32 4294967295, %s1076_s17   ;;  %p999_p0 = scmp.ge.s32.totalorder %s1076_s17, 1  ;;  %s1076_s17 = sphi %s1154_s17, %s21_s17  }
   0x2   : > { %p344_p1 = scmp.lt.s32.totalorder %s1076_s17, 3 }
   0x4   : > { %p345_p2 = pnand %p999_p0, %p344_p1 }
   0x5   : > { %p385_p3 = scmp.lt.s32.totalorder (!%p345_p2), %s995_s18, 1  ;;  %s1078_s14 = smov (!%p345_p2), 64  }
   0x6   : > { %348 = sbr.rel (%p345_p2) target bundleno = 2261 (0x8d5), region = 64  ;;  %s1079_s15 = smov (!%p345_p2), 120  }
   0x7   : > { %s1080_s16 = smov (!%p345_p2), 96   ;;  %s1081_s19 = smov (!%p345_p2), 56  }
   0x8   : > { %s1082_s20 = smov (!%p345_p2), 88   ;;  %s1084_s24 = smov (!%p345_p2), 104  }
   0x9   : > { %s1085_s25 = smov (!%p345_p2), 72   ;;  %s1086_s26 = smov (!%p345_p2), 80  }
   0xa   : > { %s1087_s28 = smov (!%p345_p2), 112   ;;  %s1088_s29 = smov (!%p345_p2), 40  }
   0xb   : > { %v402_v0 = vld [vmem:[%s1327_s2 + $0x18] sm:$0xff]  ;;  %v401_v1 = vld [vmem:[%s1327_s2 + $0x10] sm:$0xff]  ;;  %v400_v2 = vld [vmem:[%s1327_s2 + $0x8] sm:$0xff]  ;;  %s1340_s18 = smov (!%p385_p3, %s995_s18), 1  ;;  %vm407_vm0 = vcmask 261120   ;;  %vm438_vm1 = vcmask 64512  }
   0xc   : > { %423 = vmatpush.msra.mxu0 %v402_v0  ;;  %v399_v3 = vld [vmem:[%s1327_s2] sm:$0xff]  ;;  %s1000_s27 = sshll.u32 %s1340_s18, 3  ;;  %s391_s23 = scalar_lea.vmem %s1326_s1, %s1340_s18  ;;  %v1083_v14 = vmov 0  }
   0xd   : > { %s388_s30 = scalar_lea.vmem %s1325_s0, %s1000_s27  ;;  %v1044_v5 = vld [vmem:[%s1328_s3] ss:$0 sm:$0xff]  ;;  %s1090_s12 = smov 48  }
   0xe   : > { %424 = vmatpush.msra.mxu0 %v401_v1  ;;  %v1182_v4 = vld [vmem:[%s388_s30] sm:$0xff]  ;;  %s1089_s30 = smov 8   ;;  %s1091_s13 = smov 16  }
   0xf   : > { %v397_v13 = vld [vmem:[%s391_s23] sm:$0x1] }
  0x10   : > { %425 = vmatpush.msra.mxu0 %v400_v2  ;;  %vm431_vm2 = vcmp.gt.f32.partialorder %v397_v13, 0.5 }
  0x11   : > { %v432_v15 = vsel %vm431_vm2, 1, %v1083_v14 }
  0x12   : > { %426 = vmatpush.msra.mxu0 %v399_v3  ;;  %v433_v16 = vperm.slane %v432_v15, 0 }
  0x13   : > { %1002 = vmatmul.msk.f32.vlgmr.msra.gmra.mxu0 %vm407_vm0, %v1182_v4 }
  0x14   : > { %vm1205_vm3 = vcmp.eq.s32.totalorder %v433_v16, 1 }
  0x90   : > { %v428_v6 = vpop.f32.mrf.mxu0 }
  0x91   : > { %v1189_v7 = vadd.f32 %v1044_v5, %v428_v6 }
  0x93   : > { %489 = vrot.lane.b32.xlu2 %v1189_v7, %s1078_s14  ;;  %515 = vrot.lane.b32.xlu1 %v1189_v7, %s1079_s15  ;;  %s1092_s14 = smov 24  }
  0x94   : > { %436 = vrot.lane.b32.xlu0 %v1189_v7, %s1080_s16 }
  0x9b   : > { %569 = vrot.lane.b32.xlu2 %v1189_v7, %s1081_s19 }
  0x9c   : > { %517 = vrot.lane.b32.xlu0 %v1189_v7, %s1082_s20 }
  0xed   : > { %v490_v8 = vpop.permute.xlu2 %489 }
  0xee   : > { %510 = vmatpush.msra.mxu2 %v490_v8 }
  0xf5   : > { %v570_v9 = vpop.permute.xlu2 %569 }
  0xf6   : > { %590 = vmatpush.msrb.mxu2 %v570_v9 }
 0x105   : > { %v516_v12 = vpop.permute.xlu1 %515 }
 0x106   : > { %v437_v10 = vpop.permute.xlu0 %436 }
 0x107   : > { %1003 = vmatpush.xpose.msk.msra.mxu1 %vm438_vm1, %v437_v10 }
 0x10a   : > { %1004 = vmatmul.msk.f32.vlgmr.msra.gmra.mxu1 %vm438_vm1, %v1189_v7 }
 0x10e   : > { %v518_v11 = vpop.permute.xlu0 %517 }
 0x10f   : > { %1006 = vmatpush.xpose.msk.msra.mxu3 %vm438_vm1, %v518_v11 }
 0x112   : > { %1007 = vmatmul.msk.f32.vlgmr.msra.gmra.mxu3 %vm438_vm1, %v516_v12 }
 0x187   : > { %v460_v17 = vpop.f32.mrf.mxu1 }
 0x188   : > { %v463_v19 = vmul.f32 0.35355338, %v460_v17 }
 0x18a   : > { %v464_v20 = vsel %vm1205_vm3, %v463_v19, -1e+10 }
 0x18b   : > { %v465_v21 = vsel %vm438_vm1, %v464_v20, -inf }
 0x18c   : > { %466 = vmax.xlane.f32.xlu1 %v465_v21 }
 0x195   : > { %v540_v22 = vpop.f32.mrf.mxu3 }
 0x196   : > { %v543_v23 = vmul.f32 0.35355338, %v540_v22 }
 0x198   : > { %v544_v24 = vsel %vm1205_vm3, %v543_v23, -1e+10 }
 0x199   : > { %v545_v25 = vsel %vm438_vm1, %v544_v24, -inf }
 0x19a   : > { %546 = vmax.xlane.f32.xlu2 %v545_v25 }
 0x1a5   : > { %675 = vrot.lane.b32.xlu1 %v1189_v7, %s1084_s24 }
 0x1b2   : > { %677 = vrot.lane.b32.xlu2 %v1189_v7, %s1085_s25 }
 0x1ff   : > { %v467_v26 = vpop.xlane.xlu1 %466 }
 0x200   : > { %v468_v27 = vsub.f32 %v464_v20, %v467_v26 }
 0x202   : > { %v469_v28 = vmul.f32 1.442695, %v468_v27 }
 0x204   : > { %1048 = vpow2.f32 %v469_v28 }
 0x20a   : > { %v1049_v29 = vpop.eup %1048 }
 0x20b   : > { %v471_v30 = vsel %vm438_vm1, %v1049_v29, 0.0 }
 0x20c   : > { %472 = vadd.xlane.f32.xlu2 %v471_v30 }
 0x20d   : > { %v547_v31 = vpop.xlane.xlu2 %546 }
 0x20e   : > { %v548_v32 = vsub.f32 %v544_v24, %v547_v31 }
 0x210   : > { %v549_v33 = vmul.f32 1.442695, %v548_v32 }
 0x212   : > { %1050 = vpow2.f32 %v549_v33 }
 0x215   : > { %v678_v36 = vpop.permute.xlu2 %677 }
 0x217   : > { %v676_v63 = vpop.permute.xlu1 %675 }
 0x218   : > { %v1051_v34 = vpop.eup %1050 }
 0x219   : > { %v551_v35 = vsel %vm438_vm1, %v1051_v34, 0.0 }
 0x21a   : > { %552 = vadd.xlane.f32.xlu0 %v551_v35 }
 0x224   : > { %597 = vrot.lane.b32.xlu2 %v1189_v7, %s1086_s26 }
 0x22e   : > { %595 = vrot.lane.b32.xlu0 %v1189_v7, %s1087_s28  ;;  %s395_s28 = scalar_lea.vmem %s1336_s11, %s1000_s27 }
 0x27f   : > { %v473_v37 = vpop.xlane.xlu2 %472 }
 0x280   : > { %1052 = vrcp.f32 %v473_v37  ;;  %v485_v42 = vand.u32 2147483648, %v473_v37  ;;  %v483_v44 = vand.u32 2147483647, %v473_v37  ;;  %vm479_vm5 = vweird.f32 %v473_v37 }
 0x282   : > { %v486_v47 = vor.u32 1.1754944e-38, %v485_v42  ;;  %vm484_vm7 = vcmp.eq.f32.partialorder %v483_v44, 8.507059e+37 }
 0x286   : > { %v1053_v38 = vpop.eup %1052 }
 0x287   : > { %v475_v39 = vmul.f32 %v1053_v38, %v473_v37  ;;  %v598_v40 = vpop.permute.xlu2 %597  ;;  %vm480_vm4 = vweird.f32 %v1053_v38 }
 0x288   : > { %1009 = vmatpush.xpose.msk.msrb.mxu1 %vm438_vm1, %v598_v40  ;;  %vm481_vm6 = vmor %vm479_vm5, %vm480_vm4 }
 0x289   : > { %v476_v41 = vsub.f32 1.0, %v475_v39 }
 0x28b   : > { %v477_v43 = vmul.f32 %v1053_v38, %v476_v41 }
 0x28d   : > { %v553_v45 = vpop.xlane.xlu0 %552  ;;  %v478_v46 = vadd.f32 %v1053_v38, %v477_v43 }
 0x28e   : > { %1054 = vrcp.f32 %v553_v45  ;;  %v565_v54 = vand.u32 2147483648, %v553_v45  ;;  %v563_v56 = vand.u32 2147483647, %v553_v45  ;;  %vm559_vm9 = vweird.f32 %v553_v45 }
 0x28f   : > { %v482_v48 = vsel %vm481_vm6, %v1053_v38, %v478_v46  ;;  %vm768_vm6 = vcmask 130048  }
 0x290   : > { %v487_v49 = vsel %vm484_vm7, %v486_v47, %v482_v48  ;;  %v566_v58 = vor.u32 1.1754944e-38, %v565_v54  ;;  %vm564_vm11 = vcmp.eq.f32.partialorder %v563_v56, 8.507059e+37  ;;  %vm770_vm7 = vcmask 195584  }
 0x291   : > { %v488_v50 = vmul.f32 %v1049_v29, %v487_v49  ;;  %v775_v49 = vld [vmem:[%s1329_s4 + $0x18] sm:$0xff] }
 0x292   : > { %795 = vmatpush.msra.mxu1 %v775_v49 }
 0x293   : > { %1005 = vmatmul.msk.f32.vlgmr.msra.gmra.mxu2 %vm438_vm1, %v488_v50  ;;  %v774_v50 = vld [vmem:[%s1329_s4 + $0x10] sm:$0xff] }
 0x294   : > { %v1055_v51 = vpop.eup %1054  ;;  %1012 = vmatpush.xpose.msk.msra.mxu2 %vm438_vm1, %v678_v36  ;;  %796 = vmatpush.msra.mxu1 %v774_v50 }
 0x295   : > { %v555_v52 = vmul.f32 %v1055_v51, %v553_v45  ;;  %vm560_vm8 = vweird.f32 %v1055_v51 }
 0x296   : > { %vm561_vm10 = vmor %vm559_vm9, %vm560_vm8 }
 0x297   : > { %v556_v53 = vsub.f32 1.0, %v555_v52  ;;  %v772_v52 = vld [vmem:[%s1329_s4] sm:$0xff] }
 0x299   : > { %v557_v55 = vmul.f32 %v1055_v51, %v556_v53 }
 0x29b   : > { %v558_v57 = vadd.f32 %v1055_v51, %v557_v55 }
 0x29d   : > { %v562_v59 = vsel %vm561_vm10, %v1055_v51, %v558_v57  ;;  %v773_v51 = vld [vmem:[%s1329_s4 + $0x8] sm:$0xff] }
 0x29e   : > { %v567_v60 = vsel %vm564_vm11, %v566_v58, %v562_v59  ;;  %797 = vmatpush.msra.mxu1 %v773_v51  ;;  %v1045_v59 = vld [vmem:[%s1330_s5] ss:$0 sm:$0xff]  ;;  %vm881_vm11 = vcmask 523264  }
 0x29f   : > { %v568_v61 = vmul.f32 %v1051_v34, %v567_v60 }
 0x2a0   : > { %v596_v62 = vpop.permute.xlu0 %595  ;;  %798 = vmatpush.msra.mxu1 %v772_v52 }
 0x2a1   : > { %1008 = vmatmul.msk.f32.vlgmr.msrb.gmra.mxu2 %vm438_vm1, %v568_v61  ;;  %1010 = vmatmul.msk.f32.vlgmr.msrb.gmra.mxu1 %vm438_vm1, %v596_v62 }
 0x2a9   : > { %1013 = vmatmul.msk.f32.vlgmr.msra.gmra.mxu2 %vm438_vm1, %v676_v63 }
 0x316   : > { %v1227_v0 = vpop.f32.mrf.mxu2 }
 0x31e   : > { %v620_v1 = vpop.f32.mrf.mxu1 }
 0x31f   : > { %v623_v2 = vmul.f32 0.35355338, %v620_v1  ;;  %v1093_v1 = vmov 32.0  }
 0x321   : > { %v624_v3 = vsel %vm1205_vm3, %v623_v2, -1e+10 }
 0x322   : > { %v625_v5 = vsel %vm438_vm1, %v624_v3, -inf }
 0x323   : > { %626 = vmax.xlane.f32.xlu2 %v625_v5 }
 0x324   : > { %v592_v6 = vpop.f32.mrf.mxu2 }
 0x32c   : > { %v700_v8 = vpop.f32.mrf.mxu2 }
 0x32d   : > { %v703_v9 = vmul.f32 0.35355338, %v700_v8 }
 0x32f   : > { %v704_v10 = vsel %vm1205_vm3, %v703_v9, -1e+10 }
 0x330   : > { %v705_v11 = vsel %vm438_vm1, %v704_v10, -inf }
 0x331   : > { %706 = vmax.xlane.f32.xlu1 %v705_v11 }
 0x34a   : > { %729 = vrot.lane.b32.xlu1 %v1189_v7, %s1088_s29 }
 0x396   : > { %v627_v12 = vpop.xlane.xlu2 %626 }
 0x397   : > { %v628_v13 = vsub.f32 %v624_v3, %v627_v12 }
 0x399   : > { %v629_v14 = vmul.f32 1.442695, %v628_v13  ;;  %v840_v13 = vld [vmem:[%s1332_s7 + $0x18] sm:$0xff] }
 0x39b   : > { %1056 = vpow2.f32 %v629_v14  ;;  %v839_v14 = vld [vmem:[%s1332_s7 + $0x10] sm:$0xff] }
 0x3a1   : > { %v1057_v15 = vpop.eup %1056 }
 0x3a2   : > { %v631_v16 = vsel %vm438_vm1, %v1057_v15, 0.0 }
 0x3a3   : > { %632 = vadd.xlane.f32.xlu0 %v631_v16  ;;  %v837_v16 = vld [vmem:[%s1332_s7] sm:$0xff] }
 0x3a4   : > { %v707_v17 = vpop.xlane.xlu1 %706 }
 0x3a5   : > { %v708_v19 = vsub.f32 %v704_v10, %v707_v17  ;;  %v876_v17 = vld [vmem:[%s1334_s9 + $0x38] sm:$0xff] }
 0x3a6   : > { %893 = vmatpush.msrb.mxu0 %v876_v17 }
 0x3a7   : > { %v709_v20 = vmul.f32 1.442695, %v708_v19  ;;  %v875_v19 = vld [vmem:[%s1334_s9 + $0x30] sm:$0xff] }
 0x3a8   : > { %894 = vmatpush.msrb.mxu0 %v875_v19 }
 0x3a9   : > { %1058 = vpow2.f32 %v709_v20  ;;  %v874_v20 = vld [vmem:[%s1334_s9 + $0x28] sm:$0xff] }
 0x3aa   : > { %895 = vmatpush.msrb.mxu0 %v874_v20 }
 0x3af   : > { %v1059_v18 = vpop.eup %1058 }
 0x3b0   : > { %v711_v21 = vsel %vm438_vm1, %v1059_v18, 0.0 }
 0x3b1   : > { %712 = vadd.xlane.f32.xlu2 %v711_v21 }
 0x3b7   : > { %756 = vrot.lane.b32.xlu0 %v592_v6, %s1089_s30 }
 0x3bc   : > { %v730_v22 = vpop.permute.xlu1 %729 }
 0x3bd   : > { %750 = vmatpush.msrb.mxu2 %v730_v22  ;;  %v873_v22 = vld [vmem:[%s1334_s9 + $0x20] sm:$0xff] }
 0x3be   : > { %896 = vmatpush.msrb.mxu0 %v873_v22 }
 0x3c9   : > { %649 = vrot.lane.b32.xlu2 %v1189_v7, %s1090_s12 }
 0x416   : > { %v633_v23 = vpop.xlane.xlu0 %632 }
 0x417   : > { %1060 = vrcp.f32 %v633_v23  ;;  %v645_v28 = vand.u32 2147483648, %v633_v23  ;;  %vm639_vm13 = vweird.f32 %v633_v23  ;;  %v643_v30 = vand.u32 2147483647, %v633_v23 }
 0x419   : > { %v646_v33 = vor.u32 1.1754944e-38, %v645_v28  ;;  %vm644_vm15 = vcmp.eq.f32.partialorder %v643_v30, 8.507059e+37 }
 0x41d   : > { %v1061_v24 = vpop.eup %1060 }
 0x41e   : > { %v635_v25 = vmul.f32 %v1061_v24, %v633_v23  ;;  %vm640_vm12 = vweird.f32 %v1061_v24 }
 0x41f   : > { %vm641_vm14 = vmor %vm639_vm13, %vm640_vm12 }
 0x420   : > { %v636_v26 = vsub.f32 1.0, %v635_v25 }
 0x422   : > { %v637_v27 = vmul.f32 %v1061_v24, %v636_v26 }
 0x424   : > { %v638_v29 = vadd.f32 %v1061_v24, %v637_v27  ;;  %v713_v31 = vpop.xlane.xlu2 %712 }
 0x425   : > { %1062 = vrcp.f32 %v713_v31  ;;  %v725_v39 = vand.u32 2147483648, %v713_v31  ;;  %v723_v41 = vand.u32 2147483647, %v713_v31  ;;  %vm719_vm3 = vweird.f32 %v713_v31 }
 0x426   : > { %v642_v32 = vsel %vm641_vm14, %v1061_v24, %v638_v29  ;;  %1064 = vrcp.f32 %v1093_v1  ;;  %v872_v24 = vld [vmem:[%s1334_s9 + $0x18] sm:$0xff]  ;;  %v398_v29 = vld [vmem:[%s1331_s6] sm:$0xf] }
 0x427   : > { %v647_v34 = vsel %vm644_vm15, %v646_v33, %v642_v32  ;;  %v726_v43 = vor.u32 1.1754944e-38, %v725_v39  ;;  %vm724_vm5 = vcmp.eq.f32.partialorder %v723_v41, 8.507059e+37  ;;  %897 = vmatpush.msrb.mxu0 %v872_v24  ;;  %v833_v32 = vperm.slane %v398_v29, 0  ;;  %v869_v39 = vld [vmem:[%s1334_s9] sm:$0xff] }
 0x428   : > { %v648_v37 = vmul.f32 %v1057_v15, %v647_v34  ;;  %v838_v15 = vld [vmem:[%s1332_s7 + $0x8] sm:$0xff] }
 0x429   : > { %v757_v53 = vpop.permute.xlu0 %756 }
 0x42a   : > { %v767_v55 = vsel %vm438_vm1, %v1227_v0, %v757_v53 }
 0x42b   : > { %v1063_v35 = vpop.eup %1062 }
 0x42c   : > { %v715_v7 = vmul.f32 %v1063_v35, %v713_v31  ;;  %v650_v36 = vpop.permute.xlu2 %649  ;;  %vm720_vm2 = vweird.f32 %v1063_v35  ;;  %v1065_v2 = vpop.eup %1064 }
 0x42d   : > { %670 = vmatpush.msrb.mxu3 %v650_v36  ;;  %vm721_vm4 = vmor %vm719_vm3, %vm720_vm2  ;;  %v808_v0 = vmul.f32 32.0, %v1065_v2 }
 0x42e   : > { %v716_v38 = vsub.f32 1.0, %v715_v7  ;;  %1011 = vmatmul.msk.f32.vlgmr.msrb.gmra.mxu3 %vm438_vm1, %v648_v37  ;;  %v871_v37 = vld [vmem:[%s1334_s9 + $0x10] sm:$0xff] }
 0x42f   : > { %v809_v3 = vsub.f32 1.0, %v808_v0  ;;  %860 = vmatpush.msra.mxu3 %v840_v13  ;;  %898 = vmatpush.msrb.mxu0 %v871_v37 }
 0x430   : > { %v717_v40 = vmul.f32 %v1063_v35, %v716_v38  ;;  %v870_v38 = vld [vmem:[%s1334_s9 + $0x8] sm:$0xff] }
 0x431   : > { %v810_v5 = vmul.f32 %v1065_v2, %v809_v3  ;;  %861 = vmatpush.msra.mxu3 %v839_v14  ;;  %899 = vmatpush.msrb.mxu0 %v870_v38 }
 0x432   : > { %v718_v42 = vadd.f32 %v1063_v35, %v717_v40  ;;  %v1046_v40 = vld [vmem:[%s1333_s8] ss:$0 sm:$0xff] }
 0x433   : > { %v811_v6 = vadd.f32 %v1065_v2, %v810_v5  ;;  %862 = vmatpush.msra.mxu3 %v838_v15  ;;  %900 = vmatpush.msrb.mxu0 %v869_v39 }
 0x434   : > { %v722_v44 = vsel %vm721_vm4, %v1063_v35, %v718_v42  ;;  %v835_v35 = vperm.slane %v398_v29, 1 }
 0x435   : > { %v727_v45 = vsel %vm724_vm5, %v726_v43, %v722_v44  ;;  %863 = vmatpush.msra.mxu3 %v837_v16  ;;  %v1047_v44 = vld [vmem:[%s1335_s10] ss:$0 sm:$0xff] }
 0x436   : > { %v728_v46 = vmul.f32 %v1059_v18, %v727_v45 }
 0x438   : > { %1014 = vmatmul.msk.f32.vlgmr.msrb.gmra.mxu2 %vm438_vm1, %v728_v46  ;;  %vm812_vm1 = vweird.f32 %v1065_v2 }
 0x439   : > { %v1261_v8 = vsel %vm812_vm1, %v1065_v2, %v811_v6  ;;  %v930_v2 = vperm.slane %v398_v29, 3 }
 0x4b1   : > { %v672_v47 = vpop.f32.mrf.mxu3 }
 0x4b2   : > { %760 = vrot.lane.b32.xlu2 %v672_v47, %s1091_s13 }
 0x4bb   : > { %v752_v48 = vpop.f32.mrf.mxu2 }
 0x4bc   : > { %764 = vrot.lane.b32.xlu0 %v752_v48, %s1092_s14 }
 0x50c   : > { %v761_v54 = vpop.permute.xlu2 %760 }
 0x50d   : > { %v769_v56 = vsel %vm768_vm6, %v767_v55, %v761_v54 }
 0x52e   : > { %v765_v57 = vpop.permute.xlu0 %764 }
 0x52f   : > { %v771_v58 = vsel %vm770_vm7, %v769_v56, %v765_v57 }
 0x530   : > { %1015 = vmatmul.msk.f32.vlgmr.msra.gmra.mxu1 %vm407_vm0, %v771_v58 }
 0x5ad   : > { %v800_v60 = vpop.f32.mrf.mxu1 }
 0x5ae   : > { %v801_v61 = vadd.f32 %v1045_v59, %v800_v60 }
 0x5b0   : > { %v803_v62 = vadd.f32 %v801_v61, %v1182_v4 }
 0x5b2   : > { %v804_v63 = vsel %vm407_vm0, %v803_v62, 0.0 }
 0x5b3   : > { %805 = vadd.xlane.f32.xlu1 %v804_v63  ;;  %v928_v63 = vperm.slane %v398_v29, 2 }
 0x626   : > { %v806_v9 = vpop.xlane.xlu1 %805 }
 0x627   : > { %v814_v10 = vmul.f32 %v1261_v8, %v806_v9 }
 0x629   : > { %v815_v11 = vsub.f32 %v803_v62, %v814_v10 }
 0x62b   : > { %v816_v12 = vmul.f32 %v815_v11, %v815_v11 }
 0x62d   : > { %v817_v4 = vsel %vm407_vm0, %v816_v12, 0.0 }
 0x62e   : > { %818 = vadd.xlane.f32.xlu2 %v817_v4 }
 0x6a1   : > { %v819_v18 = vpop.xlane.xlu2 %818 }
 0x6a2   : > { %v820_v21 = vmul.f32 %v819_v18, %v1261_v8 }
 0x6a4   : > { %v821_v23 = vadd.f32 1e-05, %v820_v21 }
 0x6a6   : > { %1066 = vrsqrt.f32 %v821_v23  ;;  %vm828_vm9 = vweird.f32 %v821_v23 }
 0x6ac   : > { %v1067_v25 = vpop.eup %1066 }
 0x6ad   : > { %v823_v26 = vmul.f32 %v1067_v25, %v821_v23  ;;  %vm829_vm8 = vweird.f32 %v1067_v25 }
 0x6ae   : > { %vm830_vm10 = vmor %vm828_vm9, %vm829_vm8 }
 0x6af   : > { %v824_v27 = vmul.f32 %v1067_v25, %v823_v26 }
 0x6b1   : > { %v825_v28 = vmul.f32 0.5, %v824_v27 }
 0x6b3   : > { %v826_v30 = vsub.f32 1.5, %v825_v28 }
 0x6b5   : > { %v827_v31 = vmul.f32 %v1067_v25, %v826_v30 }
 0x6b7   : > { %v831_v33 = vsel %vm830_vm10, %v1067_v25, %v827_v31 }
 0x6b8   : > { %v832_v34 = vmul.f32 %v831_v33, %v815_v11 }
 0x6ba   : > { %v834_v7 = vmul.f32 %v833_v32, %v832_v34 }
 0x6bc   : > { %v836_v36 = vadd.f32 %v835_v35, %v834_v7 }
 0x6be   : > { %1016 = vmatmul.msk.f32.vlgmr.msra.gmra.mxu3 %vm407_vm0, %v836_v36 }
 0x741   : > { %v865_v41 = vpop.f32.mrf.mxu3 }
 0x742   : > { %v866_v42 = vadd.f32 %v1046_v40, %v865_v41 }
 0x744   : > { %v868_v43 = vmax.f32 %v866_v42, 0.0 }
 0x746   : > { %1017 = vmatmul.msk.f32.vlgmr.msrb.gmra.mxu0 %vm881_vm11, %v868_v43 }
 0x7c3   : > { %v902_v45 = vpop.f32.mrf.mxu0 }
 0x7c4   : > { %v903_v46 = vadd.f32 %v1047_v44, %v902_v45 }
 0x7c6   : > { %v905_v47 = vadd.f32 %v903_v46, %v836_v36 }
 0x7c8   : > { %v906_v48 = vsel %vm407_vm0, %v905_v47, 0.0 }
 0x7c9   : > { %907 = vadd.xlane.f32.xlu0 %v906_v48 }
 0x83c   : > { %v908_v49 = vpop.xlane.xlu0 %907 }
 0x83d   : > { %v909_v50 = vmul.f32 %v908_v49, %v1261_v8 }
 0x83f   : > { %v910_v51 = vsub.f32 %v905_v47, %v909_v50 }
 0x841   : > { %v911_v52 = vmul.f32 %v910_v51, %v910_v51 }
 0x843   : > { %v912_v53 = vsel %vm407_vm0, %v911_v52, 0.0 }
 0x844   : > { %913 = vadd.xlane.f32.xlu1 %v912_v53 }
 0x8b7   : > { %v914_v54 = vpop.xlane.xlu1 %913 }
 0x8b8   : > { %v915_v55 = vmul.f32 %v914_v54, %v1261_v8 }
 0x8ba   : > { %v916_v56 = vadd.f32 1e-05, %v915_v55 }
 0x8bc   : > { %1068 = vrsqrt.f32 %v916_v56  ;;  %vm923_vm13 = vweird.f32 %v916_v56 }
 0x8c2   : > { %v1069_v57 = vpop.eup %1068 }
 0x8c3   : > { %v918_v58 = vmul.f32 %v1069_v57, %v916_v56  ;;  %vm924_vm12 = vweird.f32 %v1069_v57 }
 0x8c4   : > { %vm925_vm14 = vmor %vm923_vm13, %vm924_vm12 }
 0x8c5   : > { %v919_v59 = vmul.f32 %v1069_v57, %v918_v58 }
 0x8c7   : > { %v920_v60 = vmul.f32 0.5, %v919_v59 }
 0x8c9   : > { %v921_v61 = vsub.f32 1.5, %v920_v60 }
 0x8cb   : > { %v922_v62 = vmul.f32 %v1069_v57, %v921_v61 }
 0x8cd   : > { %v926_v1 = vsel %vm925_vm14, %v1069_v57, %v922_v62 }
 0x8ce   : > { %v927_v0 = vmul.f32 %v926_v1, %v910_v51 }
 0x8d0   : > { %v929_v3 = vmul.f32 %v928_v63, %v927_v0 }
 0x8d2   : > { %v931_v5 = vadd.f32 %v930_v2, %v929_v3 }
 0x8d4   : > { %932 = vst.msk [vmem:[%s395_s28] sm:$0xff] %vm407_vm0, %v931_v5 }
 0x8d5 PF: > { %s21_s17 = sadd.s32 1, %s1076_s17  }
 0x8d6   : > { %p18_p4 = scmp.ge.s32.totalorder %s21_s17, 4  }
 0x8d8   :  { %20 = sbr.rel (!%p18_p4) target bundleno = 1 (0x1), region = 97 }

</bundles_post_ra>
